<compile_context>
chip_gen: v6e
topology: v6e:2x2x1
jax: 0.10.0
libtpu: 0.0.40
codegen_flags: <defaults>
</compile_context>

<pallas_src>
import functools

import jax
import jax.numpy as jnp
from jax import lax
from jax.experimental import pallas as pl
from jax.experimental.pallas import tpu as pltpu  # noqa: F401  (not needed in grid-less config)


# ----------------------------- Pallas kernels -------------------------------

def conv_relu_pool_kernel(p_ref, w_ref, b_ref, o_ref, *, m):
    """Fused conv(as im2col matmul) + bias + ReLU + 2x2 max-pool.

    p_ref : (4*m, K) bf16  im2col patches, four pool-offset sets stacked on M
    w_ref : (K, N)   bf16  conv weight, rows in patch-feature order
    b_ref : (1, N)   f32   bias
    o_ref : (m, N)   bf16  pooled activation (rows ordered (b, ph, pw))

    ReLU and max commute, so the max over the four per-offset ReLU'd conv
    results equals max-pool(ReLU(conv)).  One MXU matmul (M=4m) instead of
    four quarter-filled ones; m is a multiple of 32, so the row-block slices
    are sublane-aligned and the max is pure VPU work.
    """
    y = jnp.dot(p_ref[...], w_ref[...], preferred_element_type=jnp.float32)
    y = jnp.maximum(y + b_ref[...], 0.0)
    pooled = jnp.maximum(jnp.maximum(y[0 * m:1 * m], y[1 * m:2 * m]),
                         jnp.maximum(y[2 * m:3 * m], y[3 * m:4 * m]))
    o_ref[...] = pooled.astype(o_ref.dtype)


def fc_fused_kernel(x_ref, w1_ref, b1_ref, w2_ref, b2_ref, o_ref):
    """fc1 + bias + ReLU (+ dropout = identity at eval) + fc2 + bias, fused.

    x_ref  : (B, 1024)    bf16  features (NHWC flatten; fc1 rows pre-permuted)
    w1_ref : (1024, 1024) bf16  fc1^T
    b1_ref : (1, 1024)    f32
    w2_ref : (1024, 128)  bf16  fc2^T zero-padded 10 -> 128 (lane-dense store)
    b2_ref : (1, 128)     f32   zero-padded
    o_ref  : (B, 128)     f32
    """
    h = jnp.dot(x_ref[...], w1_ref[...], preferred_element_type=jnp.float32)
    h = jnp.maximum(h + b1_ref[...], 0.0)
    # TODO(synk): nn.Dropout(0.5) is identity at inference; training-mode
    # dropout (PRNG mask + 1/(1-p) scaling) is not implemented.
    y = jnp.dot(h.astype(jnp.bfloat16), w2_ref[...],
                preferred_element_type=jnp.float32)
    o_ref[...] = y + b2_ref[...]


# ------------------------------- wrappers ------------------------------------
# Grid-less pallas_calls: every operand is a whole-array VMEM block (total
# residency <= ~2.6 MiB bf16, far under the scoped-VMEM default on every
# generation), so no BlockSpecs / grid / pipelining machinery is needed.

def conv_relu_pool(p_stacked, w, b, m):
    n = w.shape[1]
    return pl.pallas_call(
        functools.partial(conv_relu_pool_kernel, m=m),
        out_shape=jax.ShapeDtypeStruct((m, n), jnp.bfloat16),
    )(p_stacked, w, b)


def fc_fused(x, w1t, b1, w2t, b2):
    return pl.pallas_call(
        fc_fused_kernel,
        out_shape=jax.ShapeDtypeStruct((x.shape[0], w2t.shape[1]), jnp.float32),
    )(x, w1t, b1, w2t, b2)


# ------------------------------ layout prep -----------------------------------

def _patches(x_nhwc, k):
    # im2col in one XLA op (feature ordering matched by _conv_weight_matrix).
    return lax.conv_general_dilated_patches(
        x_nhwc, (k, k), (1, 1), 'VALID',
        dimension_numbers=('NHWC', 'HWIO', 'NHWC'))


def _conv_weight_matrix(w):
    # (O, I, KH, KW) -> (I*KH*KW, O) with rows ordered exactly like the
    # feature dim produced by _patches: run the weight itself through the
    # same patch extractor, so the ordering can never mismatch.
    O, I, KH, KW = w.shape
    w_img = jnp.transpose(w, (0, 2, 3, 1))                  # (O, KH, KW, I)
    wm = _patches(w_img, KH)                                # (O, 1, 1, I*KH*KW)
    return wm.reshape(O, I * KH * KW).T                     # (I*KH*KW, O)


def _pool_offset_stack(p):
    """(B, 2Ph, 2Pw, K) patches -> (4 * B*Ph*Pw, K): the four 2x2 pool-offset
    sets stacked along M; rows within each set ordered (b, ph, pw)."""
    B, H, W, K = p.shape
    ph, pw = H // 2, W // 2
    t = p.reshape(B, ph, 2, pw, 2, K).transpose(2, 4, 0, 1, 3, 5)
    return t.reshape(4 * B * ph * pw, K)


def prepare_params(params):
    """One-time layout + dtype prep (hoisted out of the per-call forward)."""
    w1, b1, w2, b2, wf1, bf1, wf2, bf2 = params
    w1m = _conv_weight_matrix(w1)                           # (25, 32)
    w2m = _conv_weight_matrix(w2)                           # (800, 64)
    # fc1: transpose to (in, out) and permute rows from PyTorch's NCHW flatten
    # order (c*16 + h*4 + w) into our NHWC feature order (h*256 + w*64 + c).
    hh, ww, cc = jnp.meshgrid(jnp.arange(4), jnp.arange(4), jnp.arange(64),
                              indexing='ij')
    perm = (cc * 16 + hh * 4 + ww).reshape(-1)
    wf1t = wf1.T[perm, :]                                   # (1024, 1024)
    wf2t = jnp.pad(wf2.T, ((0, 0), (0, 128 - 10)))          # (1024, 128)
    bf2p = jnp.pad(bf2, (0, 128 - 10))                      # (128,)
    row = lambda t: t.reshape(1, -1).astype(jnp.float32)
    bf16 = lambda t: t.astype(jnp.bfloat16)
    return dict(w1=bf16(w1m), b1=row(b1), w2=bf16(w2m), b2=row(b2),
                wf1=bf16(wf1t), bf1=row(bf1), wf2=bf16(wf2t), bf2=row(bf2p))


# ------------------------------ full forward ----------------------------------

def cnn_forward(x_nchw, pp):
    B = x_nchw.shape[0]
    x = jnp.transpose(x_nchw, (0, 2, 3, 1)).astype(jnp.bfloat16)  # (B,28,28,1)

    # conv1 + relu + pool  (single fused pallas_call, single matmul)
    p1 = _patches(x, 5)                                     # (B,24,24,25) bf16
    m1 = B * 12 * 12
    y1 = conv_relu_pool(_pool_offset_stack(p1), pp['w1'], pp['b1'], m1)

    # conv2 + relu + pool  (single fused pallas_call, single matmul, M=4*B*16)
    x2 = y1.reshape(B, 12, 12, 32)                          # bf16
    p2 = _patches(x2, 5)                                    # (B,8,8,800) bf16
    m2 = B * 4 * 4
    y2 = conv_relu_pool(_pool_offset_stack(p2), pp['w2'], pp['b2'], m2)

    # fc1 + relu + (dropout = identity at eval) + fc2  (single fused kernel)
    feat = y2.reshape(B, 4 * 4 * 64)                        # (B,1024) NHWC order
    out = fc_fused(feat, pp['wf1'], pp['bf1'], pp['wf2'], pp['bf2'])  # (B,128)
    return out[:, :10]                                      # (B, 10)


# ------------------------------ pure-JAX reference ----------------------------

def ref_forward(x_nchw, params):
    w1, b1, w2, b2, wf1, bf1, wf2, bf2 = params
    B = x_nchw.shape[0]
    dn = ('NCHW', 'OIHW', 'NCHW')
    neg_inf = jnp.float32(-jnp.inf)
    y = lax.conv_general_dilated(x_nchw, w1, (1, 1), 'VALID',
                                 dimension_numbers=dn)
    y = jnp.maximum(y + b1[None, :, None, None], 0.0)
    y = lax.reduce_window(y, neg_inf, lax.max, (1, 1, 2, 2), (1, 1, 2, 2), 'VALID')
    y = lax.conv_general_dilated(y, w2, (1, 1), 'VALID',
                                 dimension_numbers=dn)
    y = jnp.maximum(y + b2[None, :, None, None], 0.0)
    y = lax.reduce_window(y, neg_inf, lax.max, (1, 1, 2, 2), (1, 1, 2, 2), 'VALID')
    y = y.reshape(B, -1)
    y = jnp.maximum(y @ wf1.T + bf1, 0.0)
    y = y @ wf2.T + bf2
    return y


# ---------------------------------- main --------------------------------------

if __name__ == "__main__":
    key = jax.random.PRNGKey(0)
    ks = jax.random.split(key, 9)
    B = 2
    # Module implies MNIST-style input: (B, 1, 28, 28) -> 1024 flat features.
    x = jax.random.normal(ks[0], (B, 1, 28, 28), jnp.float32)

    # Weights are deployed in bf16; round once so the Pallas path (bf16-stored
    # weights) and the f32 reference use identical effective parameters.
    q = lambda t: t.astype(jnp.bfloat16).astype(jnp.float32)
    w1 = q(0.10 * jax.random.normal(ks[1], (32, 1, 5, 5), jnp.float32))
    b1 = 0.10 * jax.random.normal(ks[2], (32,), jnp.float32)
    w2 = q(0.05 * jax.random.normal(ks[3], (64, 32, 5, 5), jnp.float32))
    b2 = 0.10 * jax.random.normal(ks[4], (64,), jnp.float32)
    wf1 = q(0.03 * jax.random.normal(ks[5], (1024, 1024), jnp.float32))
    bf1 = 0.10 * jax.random.normal(ks[6], (1024,), jnp.float32)
    wf2 = q(0.03 * jax.random.normal(ks[7], (10, 1024), jnp.float32))
    bf2 = 0.10 * jax.random.normal(ks[8], (10,), jnp.float32)
    params = (w1, b1, w2, b2, wf1, bf1, wf2, bf2)

    pp = prepare_params(params)          # one-time layout/dtype prep
    fwd = jax.jit(cnn_forward)
    out = jax.block_until_ready(fwd(x, pp))
    ref = ref_forward(x, params)

    assert out.shape == (B, 10), out.shape
    # bf16 activations (per perf review) contribute ~1% relative error vs the
    # f32-activation reference; tolerance set accordingly.
    err = float(jnp.max(jnp.abs(out - ref)))
    assert jnp.allclose(out, ref, atol=2e-2, rtol=2e-2), err
    print("KERNEL_OK")
</pallas_src>

<mosaic_0001>
module attributes {stable_mosaic.version = 11 : i64} {
  func.func @conv_relu_pool_kernel(%arg0: memref<1152x25xbf16, #tpu.memory_space<vmem>>, %arg1: memref<25x32xbf16, #tpu.memory_space<vmem>>, %arg2: memref<1x32xf32, #tpu.memory_space<vmem>>, %arg3: memref<288x32xbf16, #tpu.memory_space<vmem>>) attributes {dimension_semantics = [], scalar_prefetch = 0 : i64, scratch_operands = 0 : i64, tpu.core_type = #tpu.core_type<tc>} {
    %c0 = arith.constant 0 : index
    %c0_0 = arith.constant 0 : index
    %0 = vector.load %arg0[%c0, %c0_0] : memref<1152x25xbf16, #tpu.memory_space<vmem>>, vector<1152x25xbf16>
    %c0_1 = arith.constant 0 : index
    %c0_2 = arith.constant 0 : index
    %1 = vector.load %arg1[%c0_1, %c0_2] : memref<25x32xbf16, #tpu.memory_space<vmem>>, vector<25x32xbf16>
    %cst = arith.constant dense<0.000000e+00> : vector<1152x32xf32>
    %2 = tpu.matmul %0, %1, %cst {dimension_numbers = #tpu.dot_dimension_numbers<[1], [0], [0], [1], [0, 0, 1, 1], [], []>} : vector<1152x25xbf16>, vector<25x32xbf16>, vector<1152x32xf32> -> vector<1152x32xf32>
    %c0_3 = arith.constant 0 : index
    %c0_4 = arith.constant 0 : index
    %3 = vector.load %arg2[%c0_3, %c0_4] : memref<1x32xf32, #tpu.memory_space<vmem>>, vector<1x32xf32>
    %4 = vector.broadcast %3 : vector<1x32xf32> to vector<1152x32xf32>
    %5 = arith.addf %2, %4 : vector<1152x32xf32>
    %cst_5 = arith.constant 0.000000e+00 : f32
    %6 = vector.broadcast %cst_5 : f32 to vector<1152x32xf32>
    %7 = arith.maximumf %5, %6 : vector<1152x32xf32>
    %8 = vector.extract_strided_slice %7 {offsets = [0, 0], sizes = [288, 32], strides = [1, 1]} : vector<1152x32xf32> to vector<288x32xf32>
    %9 = vector.extract_strided_slice %7 {offsets = [288, 0], sizes = [288, 32], strides = [1, 1]} : vector<1152x32xf32> to vector<288x32xf32>
    %10 = arith.maximumf %8, %9 : vector<288x32xf32>
    %11 = vector.extract_strided_slice %7 {offsets = [576, 0], sizes = [288, 32], strides = [1, 1]} : vector<1152x32xf32> to vector<288x32xf32>
    %12 = vector.extract_strided_slice %7 {offsets = [864, 0], sizes = [288, 32], strides = [1, 1]} : vector<1152x32xf32> to vector<288x32xf32>
    %13 = arith.maximumf %11, %12 : vector<288x32xf32>
    %14 = arith.maximumf %10, %13 : vector<288x32xf32>
    %15 = arith.truncf %14 : vector<288x32xf32> to vector<288x32xbf16>
    %c0_6 = arith.constant 0 : index
    %c0_7 = arith.constant 0 : index
    %16 = vector.load %arg3[%c0_6, %c0_7] : memref<288x32xbf16, #tpu.memory_space<vmem>>, vector<288x32xbf16>
    tpu.vector_store %arg3[%c0_6, %c0_7], %15 {strides = array<i32>} : memref<288x32xbf16, #tpu.memory_space<vmem>>, vector<288x32xbf16>,
    return
  }
}

module attributes {stable_mosaic.version = 11 : i64} {
  func.func @conv_relu_pool_kernel(%arg0: memref<128x800xbf16, #tpu.memory_space<vmem>>, %arg1: memref<800x64xbf16, #tpu.memory_space<vmem>>, %arg2: memref<1x64xf32, #tpu.memory_space<vmem>>, %arg3: memref<32x64xbf16, #tpu.memory_space<vmem>>) attributes {dimension_semantics = [], scalar_prefetch = 0 : i64, scratch_operands = 0 : i64, tpu.core_type = #tpu.core_type<tc>} {
    %c0 = arith.constant 0 : index
    %c0_0 = arith.constant 0 : index
    %0 = vector.load %arg0[%c0, %c0_0] : memref<128x800xbf16, #tpu.memory_space<vmem>>, vector<128x800xbf16>
    %c0_1 = arith.constant 0 : index
    %c0_2 = arith.constant 0 : index
    %1 = vector.load %arg1[%c0_1, %c0_2] : memref<800x64xbf16, #tpu.memory_space<vmem>>, vector<800x64xbf16>
    %cst = arith.constant dense<0.000000e+00> : vector<128x64xf32>
    %2 = tpu.matmul %0, %1, %cst {dimension_numbers = #tpu.dot_dimension_numbers<[1], [0], [0], [1], [0, 0, 1, 1], [], []>} : vector<128x800xbf16>, vector<800x64xbf16>, vector<128x64xf32> -> vector<128x64xf32>
    %c0_3 = arith.constant 0 : index
    %c0_4 = arith.constant 0 : index
    %3 = vector.load %arg2[%c0_3, %c0_4] : memref<1x64xf32, #tpu.memory_space<vmem>>, vector<1x64xf32>
    %4 = vector.broadcast %3 : vector<1x64xf32> to vector<128x64xf32>
    %5 = arith.addf %2, %4 : vector<128x64xf32>
    %cst_5 = arith.constant 0.000000e+00 : f32
    %6 = vector.broadcast %cst_5 : f32 to vector<128x64xf32>
    %7 = arith.maximumf %5, %6 : vector<128x64xf32>
    %8 = vector.extract_strided_slice %7 {offsets = [0, 0], sizes = [32, 64], strides = [1, 1]} : vector<128x64xf32> to vector<32x64xf32>
    %9 = vector.extract_strided_slice %7 {offsets = [32, 0], sizes = [32, 64], strides = [1, 1]} : vector<128x64xf32> to vector<32x64xf32>
    %10 = arith.maximumf %8, %9 : vector<32x64xf32>
    %11 = vector.extract_strided_slice %7 {offsets = [64, 0], sizes = [32, 64], strides = [1, 1]} : vector<128x64xf32> to vector<32x64xf32>
    %12 = vector.extract_strided_slice %7 {offsets = [96, 0], sizes = [32, 64], strides = [1, 1]} : vector<128x64xf32> to vector<32x64xf32>
    %13 = arith.maximumf %11, %12 : vector<32x64xf32>
    %14 = arith.maximumf %10, %13 : vector<32x64xf32>
    %15 = arith.truncf %14 : vector<32x64xf32> to vector<32x64xbf16>
    %c0_6 = arith.constant 0 : index
    %c0_7 = arith.constant 0 : index
    %16 = vector.load %arg3[%c0_6, %c0_7] : memref<32x64xbf16, #tpu.memory_space<vmem>>, vector<32x64xbf16>
    tpu.vector_store %arg3[%c0_6, %c0_7], %15 {strides = array<i32>} : memref<32x64xbf16, #tpu.memory_space<vmem>>, vector<32x64xbf16>,
    return
  }
}

module attributes {stable_mosaic.version = 11 : i64} {
  func.func @fc_fused_kernel(%arg0: memref<2x1024xbf16, #tpu.memory_space<vmem>>, %arg1: memref<1024x1024xbf16, #tpu.memory_space<vmem>>, %arg2: memref<1x1024xf32, #tpu.memory_space<vmem>>, %arg3: memref<1024x128xbf16, #tpu.memory_space<vmem>>, %arg4: memref<1x128xf32, #tpu.memory_space<vmem>>, %arg5: memref<2x128xf32, #tpu.memory_space<vmem>>) attributes {dimension_semantics = [], scalar_prefetch = 0 : i64, scratch_operands = 0 : i64, tpu.core_type = #tpu.core_type<tc>} {
    %c0 = arith.constant 0 : index
    %c0_0 = arith.constant 0 : index
    %0 = vector.load %arg0[%c0, %c0_0] : memref<2x1024xbf16, #tpu.memory_space<vmem>>, vector<2x1024xbf16>
    %c0_1 = arith.constant 0 : index
    %c0_2 = arith.constant 0 : index
    %1 = vector.load %arg1[%c0_1, %c0_2] : memref<1024x1024xbf16, #tpu.memory_space<vmem>>, vector<1024x1024xbf16>
    %cst = arith.constant dense<0.000000e+00> : vector<2x1024xf32>
    %2 = tpu.matmul %0, %1, %cst {dimension_numbers = #tpu.dot_dimension_numbers<[1], [0], [0], [1], [0, 0, 1, 1], [], []>} : vector<2x1024xbf16>, vector<1024x1024xbf16>, vector<2x1024xf32> -> vector<2x1024xf32>
    %c0_3 = arith.constant 0 : index
    %c0_4 = arith.constant 0 : index
    %3 = vector.load %arg2[%c0_3, %c0_4] : memref<1x1024xf32, #tpu.memory_space<vmem>>, vector<1x1024xf32>
    %4 = vector.broadcast %3 : vector<1x1024xf32> to vector<2x1024xf32>
    %5 = arith.addf %2, %4 : vector<2x1024xf32>
    %cst_5 = arith.constant 0.000000e+00 : f32
    %6 = vector.broadcast %cst_5 : f32 to vector<2x1024xf32>
    %7 = arith.maximumf %5, %6 : vector<2x1024xf32>
    %8 = arith.truncf %7 : vector<2x1024xf32> to vector<2x1024xbf16>
    %c0_6 = arith.constant 0 : index
    %c0_7 = arith.constant 0 : index
    %9 = vector.load %arg3[%c0_6, %c0_7] : memref<1024x128xbf16, #tpu.memory_space<vmem>>, vector<1024x128xbf16>
    %cst_8 = arith.constant dense<0.000000e+00> : vector<2x128xf32>
    %10 = tpu.matmul %8, %9, %cst_8 {dimension_numbers = #tpu.dot_dimension_numbers<[1], [0], [0], [1], [0, 0, 1, 1], [], []>} : vector<2x1024xbf16>, vector<1024x128xbf16>, vector<2x128xf32> -> vector<2x128xf32>
    %c0_9 = arith.constant 0 : index
    %c0_10 = arith.constant 0 : index
    %11 = vector.load %arg4[%c0_9, %c0_10] : memref<1x128xf32, #tpu.memory_space<vmem>>, vector<1x128xf32>
    %12 = vector.broadcast %11 : vector<1x128xf32> to vector<2x128xf32>
    %13 = arith.addf %10, %12 : vector<2x128xf32>
    %c0_11 = arith.constant 0 : index
    %c0_12 = arith.constant 0 : index
    %14 = vector.load %arg5[%c0_11, %c0_12] : memref<2x128xf32, #tpu.memory_space<vmem>>, vector<2x128xf32>
    tpu.vector_store %arg5[%c0_11, %c0_12], %13 {strides = array<i32>} : memref<2x128xf32, #tpu.memory_space<vmem>>, vector<2x128xf32>,
    return
  }
}

</mosaic_0001>

<bundles_post_ra>
// kernel: cnn_forward.3
= control target key start
LH: loop header
LB: loop body
LE: loop exit
PB: predicated region body
PF: predicated region fallthrough
CT: control target
= control target key end

     0   :  { %vm758_vm0 = vcmask 1043456   ;;  %vm759_vm1 = vcmask 1044480   ;;  %v2332_v1 = vmov 65535   ;;  %vm541_vm2 = vcmask 203776   ;;  %s3387_s1 = inlined_call_operand.vmem [shape: bf16[25,32], index: 1, kind: input, shape index: {}]   ;;  %s3388_s0 = inlined_call_operand.vmem [shape: bf16[1152,25], index: 0, kind: input, shape index: {}]   ;;  %s3389_s2 = inlined_call_operand.vmem [shape: f32[1,32], index: 2, kind: input, shape index: {}]   ;;  %s3390_s3 = inlined_call_operand.vmem [shape: bf16[288,32], index: 3, kind: output, shape index: {}]  }
   0x1   :  { %v2257_v0 = vld [vmem:[%s3387_s1 + $0x8] sm:$0x1f]   ;;  %v760_v2 = vsel %vm758_vm0, 4294967295, %v2332_v1  ;;  %v2259_v4 = vld [vmem:[%s3388_s0] sm:$0xff]   ;;  %v2263_v10 = vld [vmem:[%s3388_s0 + $0x10] sm:$0xff]   ;;  %vm1770_vm3 = vcmask 257024  }
   0x2   :  { %v761_v3 = vsel %vm759_vm1, %v760_v2, 0  ;;  %v2258_v6 = vld [vmem:[%s3387_s1] sm:$0xff]   ;;  %2108 = vmatprep.mubr.msk.bf16.mxu0 %vm541_vm2, %v2259_v4  ;;  %v2261_v8 = vld [vmem:[%s3388_s0 + $0x8] sm:$0xff]   ;;  %v2264_v11 = vld [vmem:[%s3388_s0 + $0x130] sm:$0xff]  }
   0x3   :  { %v763_v5 = vand.u32 %v2257_v0, %v761_v3  ;;  %v2260_v7 = vld [vmem:[%s3388_s0 + $0x120] sm:$0xff]   ;;  %v2262_v9 = vld [vmem:[%s3388_s0 + $0x128] sm:$0xff]   ;;  %v2265_v12 = vld [vmem:[%s3388_s0 + $0x18] sm:$0xff]  }
   0x4   :  { %2180 = vmatprep.mubr.msk.bf16.mxu1 %vm541_vm2, %v2260_v7  ;;  %v2266_v13 = vld [vmem:[%s3388_s0 + $0x138] sm:$0xff]   ;;  %v2267_v14 = vld [vmem:[%s3388_s0 + $0x20] sm:$0xff]   ;;  %v2269_v16 = vld [vmem:[%s3388_s0 + $0x28] sm:$0xff]  }
   0x5   :  { %2104 = vmatprep.subr.bf16.mxu0 %v763_v5  ;;  %2252 = vmatprep.subr.bf16.mxu1 %v763_v5  ;;  %v2268_v15 = vld [vmem:[%s3388_s0 + $0x140] sm:$0xff]   ;;  %v2270_v17 = vld [vmem:[%s3388_s0 + $0x148] sm:$0xff]   ;;  %v2271_v18 = vld [vmem:[%s3388_s0 + $0x30] sm:$0xff]  }
   0x6   :  { %2105 = vmatpush3.bf16.msra.mxu0 %v763_v5  ;;  %2254 = vmatpush3.bf16.msra.mxu1 %v763_v5  ;;  %v2272_v19 = vld [vmem:[%s3388_s0 + $0x150] sm:$0xff]   ;;  %v2273_v20 = vld [vmem:[%s3388_s0 + $0x38] sm:$0xff]   ;;  %v2275_v22 = vld [vmem:[%s3388_s0 + $0x40] sm:$0xff]  }
   0x7   :  { %2106 = vmatprep.subr.bf16.mxu0 %v2258_v6  ;;  %2253 = vmatprep.subr.bf16.mxu1 %v2258_v6  ;;  %v2274_v21 = vld [vmem:[%s3388_s0 + $0x158] sm:$0xff]   ;;  %v2276_v23 = vld [vmem:[%s3388_s0 + $0x160] sm:$0xff]   ;;  %v2277_v24 = vld [vmem:[%s3388_s0 + $0x48] sm:$0xff]  }
   0x8   :  { %v2278_v25 = vld [vmem:[%s3388_s0 + $0x168] sm:$0xff]   ;;  %v2279_v26 = vld [vmem:[%s3388_s0 + $0x50] sm:$0xff]   ;;  %v2281_v28 = vld [vmem:[%s3388_s0 + $0x58] sm:$0xff]  }
   0x9   :  { %v2280_v27 = vld [vmem:[%s3388_s0 + $0x170] sm:$0xff]   ;;  %v2282_v29 = vld [vmem:[%s3388_s0 + $0x178] sm:$0xff]   ;;  %v2283_v30 = vld [vmem:[%s3388_s0 + $0x60] sm:$0xff]  }
   0xa   :  { %2107 = vmatpush3.bf16.msra.mxu0 %v2258_v6  ;;  %2255 = vmatpush3.bf16.msra.mxu1 %v2258_v6  ;;  %v2284_v31 = vld [vmem:[%s3388_s0 + $0x180] sm:$0xff]   ;;  %v2285_v32 = vld [vmem:[%s3388_s0 + $0x68] sm:$0xff]   ;;  %v2287_v34 = vld [vmem:[%s3388_s0 + $0x70] sm:$0xff]  }
   0xb   :  { %v2286_v33 = vld [vmem:[%s3388_s0 + $0x188] sm:$0xff]   ;;  %v2288_v35 = vld [vmem:[%s3388_s0 + $0x190] sm:$0xff]   ;;  %v2289_v36 = vld [vmem:[%s3388_s0 + $0x78] sm:$0xff]  }
   0xc   :  { %v2290_v37 = vld [vmem:[%s3388_s0 + $0x198] sm:$0xff]   ;;  %v2291_v38 = vld [vmem:[%s3388_s0 + $0x80] sm:$0xff]   ;;  %v2293_v40 = vld [vmem:[%s3388_s0 + $0x88] sm:$0xff]  }
   0xd   :  { %2109 = vmatmul.mubr.msk.bf16.vlgmr.msra.gmra.mxu0 %vm541_vm2, %v2261_v8  ;;  %2181 = vmatmul.mubr.msk.bf16.vlgmr.msra.gmra.mxu1 %vm541_vm2, %v2262_v9  ;;  %v2292_v39 = vld [vmem:[%s3388_s0 + $0x1a0] sm:$0xff]   ;;  %v2294_v41 = vld [vmem:[%s3388_s0 + $0x1a8] sm:$0xff]   ;;  %v2295_v42 = vld [vmem:[%s3388_s0 + $0x90] sm:$0xff]  }
   0xe   :  { %2112 = vmatprep.mubr.msk.bf16.mxu0 %vm541_vm2, %v2263_v10  ;;  %2184 = vmatprep.mubr.msk.bf16.mxu1 %vm541_vm2, %v2264_v11  ;;  %v2296_v43 = vld [vmem:[%s3388_s0 + $0x1b0] sm:$0xff]   ;;  %v2297_v44 = vld [vmem:[%s3388_s0 + $0x98] sm:$0xff]   ;;  %v2299_v46 = vld [vmem:[%s3388_s0 + $0xa0] sm:$0xff]  }
   0xf   :  { %v2298_v45 = vld [vmem:[%s3388_s0 + $0x1b8] sm:$0xff]   ;;  %v2300_v47 = vld [vmem:[%s3388_s0 + $0x1c0] sm:$0xff]   ;;  %v2301_v48 = vld [vmem:[%s3388_s0 + $0xa8] sm:$0xff]  }
  0x10   :  { %v2302_v49 = vld [vmem:[%s3388_s0 + $0x1c8] sm:$0xff]   ;;  %v2303_v50 = vld [vmem:[%s3388_s0 + $0xb0] sm:$0xff]   ;;  %v2305_v52 = vld [vmem:[%s3388_s0 + $0xb8] sm:$0xff]  }
  0x11   :  { %v2304_v51 = vld [vmem:[%s3388_s0 + $0x1d0] sm:$0xff]   ;;  %v2306_v53 = vld [vmem:[%s3388_s0 + $0x1d8] sm:$0xff]   ;;  %v2307_v54 = vld [vmem:[%s3388_s0 + $0xc0] sm:$0xff]  }
  0x12   :  { %v2308_v55 = vld [vmem:[%s3388_s0 + $0x1e0] sm:$0xff]   ;;  %v2309_v56 = vld [vmem:[%s3388_s0 + $0xc8] sm:$0xff]   ;;  %v2311_v58 = vld [vmem:[%s3388_s0 + $0xd0] sm:$0xff]  }
  0x13   :  { %v2310_v57 = vld [vmem:[%s3388_s0 + $0x1e8] sm:$0xff]   ;;  %v2312_v59 = vld [vmem:[%s3388_s0 + $0x1f0] sm:$0xff]   ;;  %v2313_v60 = vld [vmem:[%s3388_s0 + $0xd8] sm:$0xff]  }
  0x14   :  { %v2314_v61 = vld [vmem:[%s3388_s0 + $0x1f8] sm:$0xff]   ;;  %v2315_v62 = vld [vmem:[%s3388_s0 + $0xe0] sm:$0xff]   ;;  %v2317_v0 = vld [vmem:[%s3388_s0 + $0xe8] sm:$0xff]  }
  0x15   :  { %2113 = vmatmul.mubr.msk.bf16.gmra.mxu0 %vm541_vm2, %v2265_v12  ;;  %2185 = vmatmul.mubr.msk.bf16.gmra.mxu1 %vm541_vm2, %v2266_v13  ;;  %v2316_v63 = vld [vmem:[%s3388_s0 + $0x200] sm:$0xff]   ;;  %v2318_v1 = vld [vmem:[%s3388_s0 + $0x208] sm:$0xff]   ;;  %v2319_v2 = vld [vmem:[%s3388_s0 + $0xf0] sm:$0xff]  }
  0x16   :  { %2116 = vmatprep.mubr.msk.bf16.mxu0 %vm541_vm2, %v2267_v14  ;;  %2188 = vmatprep.mubr.msk.bf16.mxu1 %vm541_vm2, %v2268_v15  ;;  %v2320_v3 = vld [vmem:[%s3388_s0 + $0x210] sm:$0xff]   ;;  %v2321_v4 = vld [vmem:[%s3388_s0 + $0xf8] sm:$0xff]   ;;  %v2323_v6 = vld [vmem:[%s3388_s0 + $0x100] sm:$0xff]  }
  0x17   :  { %v2322_v5 = vld [vmem:[%s3388_s0 + $0x218] sm:$0xff]   ;;  %v2324_v7 = vld [vmem:[%s3388_s0 + $0x220] sm:$0xff]   ;;  %v2325_v8 = vld [vmem:[%s3388_s0 + $0x108] sm:$0xff]  }
  0x18   :  { %v2326_v9 = vld [vmem:[%s3388_s0 + $0x228] sm:$0xff]   ;;  %v2327_v10 = vld [vmem:[%s3388_s0 + $0x110] sm:$0xff]   ;;  %v2329_v12 = vld [vmem:[%s3388_s0 + $0x118] sm:$0xff]  }
  0x19   :  { %v2328_v11 = vld [vmem:[%s3388_s0 + $0x230] sm:$0xff]   ;;  %v2330_v13 = vld [vmem:[%s3388_s0 + $0x238] sm:$0xff]  }
  0x1d   :  { %2117 = vmatmul.mubr.msk.bf16.gmra.mxu0 %vm541_vm2, %v2269_v16  ;;  %2189 = vmatmul.mubr.msk.bf16.gmra.mxu1 %vm541_vm2, %v2270_v17 }
  0x1e   :  { %2120 = vmatprep.mubr.msk.bf16.mxu0 %vm541_vm2, %v2271_v18  ;;  %2192 = vmatprep.mubr.msk.bf16.mxu1 %vm541_vm2, %v2272_v19 }
  0x25   :  { %2121 = vmatmul.mubr.msk.bf16.gmra.mxu0 %vm541_vm2, %v2273_v20  ;;  %2193 = vmatmul.mubr.msk.bf16.gmra.mxu1 %vm541_vm2, %v2274_v21 }
  0x26   :  { %2124 = vmatprep.mubr.msk.bf16.mxu0 %vm541_vm2, %v2275_v22  ;;  %2196 = vmatprep.mubr.msk.bf16.mxu1 %vm541_vm2, %v2276_v23 }
  0x2d   :  { %2125 = vmatmul.mubr.msk.bf16.gmra.mxu0 %vm541_vm2, %v2277_v24  ;;  %2197 = vmatmul.mubr.msk.bf16.gmra.mxu1 %vm541_vm2, %v2278_v25 }
  0x2e   :  { %2128 = vmatprep.mubr.msk.bf16.mxu0 %vm541_vm2, %v2279_v26  ;;  %2200 = vmatprep.mubr.msk.bf16.mxu1 %vm541_vm2, %v2280_v27 }
  0x35   :  { %2129 = vmatmul.mubr.msk.bf16.gmra.mxu0 %vm541_vm2, %v2281_v28  ;;  %2201 = vmatmul.mubr.msk.bf16.gmra.mxu1 %vm541_vm2, %v2282_v29 }
  0x36   :  { %2132 = vmatprep.mubr.msk.bf16.mxu0 %vm541_vm2, %v2283_v30  ;;  %2204 = vmatprep.mubr.msk.bf16.mxu1 %vm541_vm2, %v2284_v31 }
  0x3d   :  { %2133 = vmatmul.mubr.msk.bf16.gmra.mxu0 %vm541_vm2, %v2285_v32  ;;  %2205 = vmatmul.mubr.msk.bf16.gmra.mxu1 %vm541_vm2, %v2286_v33 }
  0x3e   :  { %2136 = vmatprep.mubr.msk.bf16.mxu0 %vm541_vm2, %v2287_v34  ;;  %2208 = vmatprep.mubr.msk.bf16.mxu1 %vm541_vm2, %v2288_v35 }
  0x45   :  { %2137 = vmatmul.mubr.msk.bf16.gmra.mxu0 %vm541_vm2, %v2289_v36  ;;  %2209 = vmatmul.mubr.msk.bf16.gmra.mxu1 %vm541_vm2, %v2290_v37 }
  0x46   :  { %2140 = vmatprep.mubr.msk.bf16.mxu0 %vm541_vm2, %v2291_v38  ;;  %2212 = vmatprep.mubr.msk.bf16.mxu1 %vm541_vm2, %v2292_v39 }
  0x4d   :  { %2141 = vmatmul.mubr.msk.bf16.gmra.mxu0 %vm541_vm2, %v2293_v40  ;;  %2213 = vmatmul.mubr.msk.bf16.gmra.mxu1 %vm541_vm2, %v2294_v41 }
  0x4e   :  { %2144 = vmatprep.mubr.msk.bf16.mxu0 %vm541_vm2, %v2295_v42  ;;  %2216 = vmatprep.mubr.msk.bf16.mxu1 %vm541_vm2, %v2296_v43 }
  0x55   :  { %2145 = vmatmul.mubr.msk.bf16.gmra.mxu0 %vm541_vm2, %v2297_v44  ;;  %2217 = vmatmul.mubr.msk.bf16.gmra.mxu1 %vm541_vm2, %v2298_v45 }
  0x56   :  { %2148 = vmatprep.mubr.msk.bf16.mxu0 %vm541_vm2, %v2299_v46  ;;  %2220 = vmatprep.mubr.msk.bf16.mxu1 %vm541_vm2, %v2300_v47 }
  0x5d   :  { %2149 = vmatmul.mubr.msk.bf16.gmra.mxu0 %vm541_vm2, %v2301_v48  ;;  %2221 = vmatmul.mubr.msk.bf16.gmra.mxu1 %vm541_vm2, %v2302_v49 }
  0x5e   :  { %2152 = vmatprep.mubr.msk.bf16.mxu0 %vm541_vm2, %v2303_v50  ;;  %2224 = vmatprep.mubr.msk.bf16.mxu1 %vm541_vm2, %v2304_v51  ;;  %v2680_v50 = vld [vmem:[%s3389_s2] ss:$0 sm:$0xff] }
  0x65   :  { %2153 = vmatmul.mubr.msk.bf16.gmra.mxu0 %vm541_vm2, %v2305_v52  ;;  %2225 = vmatmul.mubr.msk.bf16.gmra.mxu1 %vm541_vm2, %v2306_v53 }
  0x66   :  { %2156 = vmatprep.mubr.msk.bf16.mxu0 %vm541_vm2, %v2307_v54  ;;  %2228 = vmatprep.mubr.msk.bf16.mxu1 %vm541_vm2, %v2308_v55 }
  0x6d   :  { %2157 = vmatmul.mubr.msk.bf16.gmra.mxu0 %vm541_vm2, %v2309_v56  ;;  %2229 = vmatmul.mubr.msk.bf16.gmra.mxu1 %vm541_vm2, %v2310_v57 }
  0x6e   :  { %2160 = vmatprep.mubr.msk.bf16.mxu0 %vm541_vm2, %v2311_v58  ;;  %2232 = vmatprep.mubr.msk.bf16.mxu1 %vm541_vm2, %v2312_v59 }
  0x75   :  { %2161 = vmatmul.mubr.msk.bf16.gmra.mxu0 %vm541_vm2, %v2313_v60  ;;  %2233 = vmatmul.mubr.msk.bf16.gmra.mxu1 %vm541_vm2, %v2314_v61 }
  0x76   :  { %2164 = vmatprep.mubr.msk.bf16.mxu0 %vm541_vm2, %v2315_v62  ;;  %2236 = vmatprep.mubr.msk.bf16.mxu1 %vm541_vm2, %v2316_v63 }
  0x7d   :  { %2165 = vmatmul.mubr.msk.bf16.gmra.mxu0 %vm541_vm2, %v2317_v0  ;;  %2237 = vmatmul.mubr.msk.bf16.gmra.mxu1 %vm541_vm2, %v2318_v1 }
  0x7e   :  { %2168 = vmatprep.mubr.msk.bf16.mxu0 %vm541_vm2, %v2319_v2  ;;  %2240 = vmatprep.mubr.msk.bf16.mxu1 %vm541_vm2, %v2320_v3 }
  0x85   :  { %2169 = vmatmul.mubr.msk.bf16.gmra.mxu0 %vm541_vm2, %v2321_v4  ;;  %2241 = vmatmul.mubr.msk.bf16.gmra.mxu1 %vm541_vm2, %v2322_v5 }
  0x86   :  { %2172 = vmatprep.mubr.msk.bf16.mxu0 %vm541_vm2, %v2323_v6  ;;  %2244 = vmatprep.mubr.msk.bf16.mxu1 %vm541_vm2, %v2324_v7 }
  0x8d   :  { %2173 = vmatmul.mubr.msk.bf16.gmra.mxu0 %vm541_vm2, %v2325_v8  ;;  %2245 = vmatmul.mubr.msk.bf16.gmra.mxu1 %vm541_vm2, %v2326_v9 }
  0x8e   :  { %2176 = vmatprep.mubr.msk.bf16.mxu0 %vm541_vm2, %v2327_v10  ;;  %2248 = vmatprep.mubr.msk.bf16.mxu1 %vm541_vm2, %v2328_v11 }
  0x95   :  { %2177 = vmatmul.mubr.msk.bf16.gmra.mxu0 %vm541_vm2, %v2329_v12  ;;  %2249 = vmatmul.mubr.msk.bf16.gmra.mxu1 %vm541_vm2, %v2330_v13 }
  0xcd   :  { %v2110_v14 = vpop.f32.mrf.mxu0  ;;  %v2182_v15 = vpop.f32.mrf.mxu1 }
  0xce   :  { %v2687_v53 = vadd.f32 %v2110_v14, %v2680_v50  ;;  %v2694_v56 = vadd.f32 %v2182_v15, %v2680_v50 }
  0xcf   :  { %v799_v16 = vpop.f32.mrf.mxu0  ;;  %v1087_v17 = vpop.f32.mrf.mxu1 }
  0xd0   :  { %v2697_v57 = vadd.f32 %v2680_v50, %v799_v16  ;;  %v2700_v58 = vadd.f32 %v2680_v50, %v1087_v17 }
  0xd1   :  { %v2111_v18 = vpop.f32.mrf.mxu0  ;;  %v2183_v19 = vpop.f32.mrf.mxu1 }
  0xd2   :  { %v2703_v59 = vadd.f32 %v2111_v18, %v2680_v50  ;;  %v2710_v62 = vadd.f32 %v2183_v19, %v2680_v50 }
  0xd3   :  { %v802_v20 = vpop.f32.mrf.mxu0  ;;  %v1090_v21 = vpop.f32.mrf.mxu1 }
  0xd4   :  { %v2713_v63 = vadd.f32 %v2680_v50, %v802_v20  ;;  %v2717_v1 = vadd.f32 %v2680_v50, %v1090_v21 }
  0xd5   :  { %v2114_v22 = vpop.f32.mrf.mxu0  ;;  %v2186_v23 = vpop.f32.mrf.mxu1 }
  0xd6   :  { %v2724_v4 = vadd.f32 %v2114_v22, %v2680_v50  ;;  %v2727_v5 = vadd.f32 %v2186_v23, %v2680_v50 }
  0xd7   :  { %v815_v24 = vpop.f32.mrf.mxu0  ;;  %v1103_v25 = vpop.f32.mrf.mxu1 }
  0xd8   :  { %v2730_v6 = vadd.f32 %v2680_v50, %v815_v24  ;;  %v2733_v7 = vadd.f32 %v2680_v50, %v1103_v25 }
  0xd9   :  { %v2115_v26 = vpop.f32.mrf.mxu0  ;;  %v2187_v27 = vpop.f32.mrf.mxu1 }
  0xda   :  { %v2746_v16 = vadd.f32 %v2115_v26, %v2680_v50  ;;  %v2749_v17 = vadd.f32 %v2187_v27, %v2680_v50 }
  0xdb   :  { %v818_v28 = vpop.f32.mrf.mxu0  ;;  %v1106_v29 = vpop.f32.mrf.mxu1 }
  0xdc   :  { %v2753_v19 = vadd.f32 %v2680_v50, %v818_v28  ;;  %v2756_v20 = vadd.f32 %v2680_v50, %v1106_v29 }
  0xdd   :  { %v2118_v30 = vpop.f32.mrf.mxu0  ;;  %v2190_v31 = vpop.f32.mrf.mxu1 }
  0xde   :  { %v2759_v21 = vadd.f32 %v2118_v30, %v2680_v50  ;;  %v2770_v28 = vadd.f32 %v2190_v31, %v2680_v50 }
  0xdf   :  { %v831_v32 = vpop.f32.mrf.mxu0  ;;  %v1119_v33 = vpop.f32.mrf.mxu1 }
  0xe0   :  { %v2773_v29 = vadd.f32 %v2680_v50, %v831_v32  ;;  %v2776_v30 = vadd.f32 %v2680_v50, %v1119_v33 }
  0xe1   :  { %v2119_v34 = vpop.f32.mrf.mxu0  ;;  %v2647_v35 = vpop.f32.mrf.mxu1 }
  0xe2   :  { %v2779_v18 = vadd.f32 %v2119_v34, %v2680_v50  ;;  %v2789_v31 = vadd.f32 %v2647_v35, %v2680_v50 }
  0xe3   :  { %v2649_v36 = vpop.f32.mrf.mxu0  ;;  %v2651_v37 = vpop.f32.mrf.mxu1 }
  0xe4   :  { %v2793_v32 = vadd.f32 %v2680_v50, %v2649_v36  ;;  %v2800_v14 = vadd.f32 %v2680_v50, %v2651_v37 }
  0xe5   :  { %v2653_v38 = vpop.f32.mrf.mxu0  ;;  %v2655_v39 = vpop.f32.mrf.mxu1 }
  0xe6   :  { %v2808_v35 = vadd.f32 %v2653_v38, %v2680_v50  ;;  %v2812_v36 = vadd.f32 %v2655_v39, %v2680_v50 }
  0xe7   :  { %v2657_v40 = vpop.f32.mrf.mxu0  ;;  %v2659_v41 = vpop.f32.mrf.mxu1 }
  0xe8   :  { %3420 = vst [vmem:[#allocation2_spill] sm:$0xff] %v2812_v36  ;;  %v2816_v34 = vadd.f32 %v2680_v50, %v2657_v40  ;;  %v2820_v37 = vadd.f32 %v2680_v50, %v2659_v41 }
  0xe9   :  { %v2661_v42 = vpop.f32.mrf.mxu0  ;;  %v2663_v43 = vpop.f32.mrf.mxu1 }
  0xea   :  { %3421 = vst [vmem:[#allocation3_spill] sm:$0xff] %v2816_v34  ;;  %3422 = vst [vmem:[#allocation4_spill] sm:$0xff] %v2820_v37  ;;  %v2832_v8 = vadd.f32 %v2661_v42, %v2680_v50  ;;  %v2836_v41 = vadd.f32 %v2663_v43, %v2680_v50 }
  0xeb   :  { %v2665_v44 = vpop.f32.mrf.mxu0  ;;  %v2667_v45 = vpop.f32.mrf.mxu1 }
  0xec   :  { %3423 = vst [vmem:[#allocation5_spill] sm:$0xff] %v2836_v41  ;;  %v2841_v38 = vadd.f32 %v2680_v50, %v2665_v44  ;;  %v2845_v11 = vadd.f32 %v2680_v50, %v2667_v45 }
  0xed   :  { %v2669_v46 = vpop.f32.mrf.mxu0  ;;  %v2671_v47 = vpop.f32.mrf.mxu1 }
  0xee   :  { %3424 = vst [vmem:[#allocation6_spill] sm:$0xff] %v2841_v38  ;;  %3425 = vst [vmem:[#allocation7_spill] sm:$0xff] %v2845_v11  ;;  %v2849_v40 = vadd.f32 %v2669_v46, %v2680_v50  ;;  %v2857_v44 = vadd.f32 %v2671_v47, %v2680_v50 }
  0xef   :  { %v2673_v48 = vpop.f32.mrf.mxu0  ;;  %v2675_v49 = vpop.f32.mrf.mxu1 }
  0xf0   :  { %3426 = vst [vmem:[#allocation8_spill] sm:$0xff] %v2849_v40  ;;  %v2861_v45 = vadd.f32 %v2680_v50, %v2673_v48  ;;  %v2865_v46 = vadd.f32 %v2680_v50, %v2675_v49 }
  0xf1   :  { %v2682_v51 = vpop.f32.mrf.mxu0  ;;  %v2684_v52 = vpop.f32.mrf.mxu1 }
  0xf2   :  { %v2869_v25 = vadd.f32 %v2682_v51, %v2680_v50  ;;  %v2875_v47 = vadd.f32 %v2684_v52, %v2680_v50 }
  0xf3   :  { %v2689_v54 = vpop.f32.mrf.mxu0  ;;  %v2691_v55 = vpop.f32.mrf.mxu1 }
  0xf4   :  { %v2879_v48 = vadd.f32 %v2680_v50, %v2689_v54  ;;  %v2886_v36 = vadd.f32 %v2680_v50, %v2691_v55 }
  0xf5   :  { %v2705_v60 = vpop.f32.mrf.mxu0  ;;  %v2707_v61 = vpop.f32.mrf.mxu1 }
  0xf6   :  { %3427 = vst [vmem:[#allocation9_spill] sm:$0xff] %v2886_v36  ;;  %v2890_v52 = vadd.f32 %v2705_v60, %v2680_v50  ;;  %v2894_v54 = vadd.f32 %v2707_v61, %v2680_v50 }
  0xf7   :  { %v2719_v2 = vpop.f32.mrf.mxu0  ;;  %v2721_v3 = vpop.f32.mrf.mxu1 }
  0xf8   :  { %3428 = vst [vmem:[#allocation10_spill] sm:$0xff] %v2890_v52  ;;  %3429 = vst [vmem:[#allocation11_spill] sm:$0xff] %v2894_v54  ;;  %v2898_v49 = vadd.f32 %v2680_v50, %v2719_v2  ;;  %v2902_v51 = vadd.f32 %v2680_v50, %v2721_v3 }
  0xf9   :  { %v2739_v12 = vpop.f32.mrf.mxu0  ;;  %v2741_v13 = vpop.f32.mrf.mxu1 }
  0xfa   :  { %3430 = vst [vmem:[#allocation12_spill] sm:$0xff] %v2898_v49  ;;  %3431 = vst [vmem:[#allocation13_spill] sm:$0xff] %v2902_v51  ;;  %v2912_v2 = vadd.f32 %v2739_v12, %v2680_v50  ;;  %v2916_v3 = vadd.f32 %v2741_v13, %v2680_v50 }
  0xfb   :  { %v2761_v22 = vpop.f32.mrf.mxu0  ;;  %v2763_v23 = vpop.f32.mrf.mxu1 }
  0xfc   :  { %v2921_v40 = vadd.f32 %v2680_v50, %v2761_v22  ;;  %v2925_v60 = vadd.f32 %v2680_v50, %v2763_v23 }
  0xfd   :  { %v2781_v15 = vpop.f32.mrf.mxu0  ;;  %v2783_v24 = vpop.f32.mrf.mxu1 }
  0xfe   :  { %3432 = vst [vmem:[#allocation14_spill] sm:$0xff] %v2921_v40  ;;  %3433 = vst [vmem:[#allocation15_spill] sm:$0xff] %v2925_v60  ;;  %v2929_v41 = vadd.f32 %v2781_v15, %v2680_v50  ;;  %v2937_v22 = vadd.f32 %v2783_v24, %v2680_v50 }
  0xff   :  { %v2802_v26 = vpop.f32.mrf.mxu0  ;;  %v2804_v27 = vpop.f32.mrf.mxu1 }
 0x100   :  { %3434 = vst [vmem:[#allocation16_spill] sm:$0xff] %v2929_v41  ;;  %v2941_v23 = vadd.f32 %v2680_v50, %v2802_v26  ;;  %v2945_v15 = vadd.f32 %v2680_v50, %v2804_v27 }
 0x101   :  { %v2135_v10 = vpop.f32.mrf.mxu0  ;;  %v2826_v9 = vpop.f32.mrf.mxu1 }
 0x102   :  { %v2948_v55 = vadd.f32 %v2135_v10, %v2680_v50  ;;  %v2954_v24 = vadd.f32 %v2826_v9, %v2680_v50 }
 0x103   :  { %v898_v42 = vpop.f32.mrf.mxu0  ;;  %v1186_v39 = vpop.f32.mrf.mxu1 }
 0x104   :  { %3435 = vst [vmem:[#allocation17_spill] sm:$0xff] %v2948_v55  ;;  %3436 = vst [vmem:[#allocation18_spill] sm:$0xff] %v2954_v24  ;;  %v2957_v26 = vadd.f32 %v2680_v50, %v898_v42  ;;  %v2963_v49 = vadd.f32 %v2680_v50, %v1186_v39 }
 0x105   :  { %v2138_v43 = vpop.f32.mrf.mxu0  ;;  %v2210_v33 = vpop.f32.mrf.mxu1 }
 0x106   :  { %3437 = vst [vmem:[#allocation19_spill] sm:$0xff] %v2957_v26  ;;  %3438 = vst [vmem:[#allocation20_spill] sm:$0xff] %v2963_v49  ;;  %v2966_v36 = vadd.f32 %v2138_v43, %v2680_v50  ;;  %v2969_v9 = vadd.f32 %v2210_v33, %v2680_v50 }
 0x107   :  { %v911_v0 = vpop.f32.mrf.mxu0  ;;  %v1199_v37 = vpop.f32.mrf.mxu1 }
 0x108   :  { %3439 = vst [vmem:[#allocation21_spill] sm:$0xff] %v2966_v36  ;;  %3440 = vst [vmem:[#allocation22_spill] sm:$0xff] %v2969_v9  ;;  %v2972_v42 = vadd.f32 %v2680_v50, %v911_v0  ;;  %v2975_v51 = vadd.f32 %v2680_v50, %v1199_v37 }
 0x109   :  { %v2139_v11 = vpop.f32.mrf.mxu0  ;;  %v2211_v38 = vpop.f32.mrf.mxu1 }
 0x10a   :  { %3441 = vst [vmem:[#allocation23_spill] sm:$0xff] %v2972_v42  ;;  %3442 = vst [vmem:[#allocation24_spill] sm:$0xff] %v2975_v51  ;;  %v2984_v0 = vadd.f32 %v2139_v11, %v2680_v50  ;;  %v2987_v37 = vadd.f32 %v2211_v38, %v2680_v50 }
 0x10b   :  { %v914_v12 = vpop.f32.mrf.mxu0  ;;  %v1202_v61 = vpop.f32.mrf.mxu1 }
 0x10c   :  { %v2991_v10 = vadd.f32 %v2680_v50, %v914_v12  ;;  %v2994_v39 = vadd.f32 %v2680_v50, %v1202_v61 }
 0x10d   :  { %v2142_v13 = vpop.f32.mrf.mxu0  ;;  %v2214_v54 = vpop.f32.mrf.mxu1 }
 0x10e   :  { %3443 = vst [vmem:[#allocation25_spill] sm:$0xff] %v2991_v10  ;;  %3444 = vst [vmem:[#allocation26_spill] sm:$0xff] %v2994_v39  ;;  %v2997_v41 = vadd.f32 %v2142_v13, %v2680_v50  ;;  %v3004_v27 = vadd.f32 %v2214_v54, %v2680_v50 }
 0x10f   :  { %v927_v52 = vpop.f32.mrf.mxu0  ;;  %v1215_v34 = vpop.f32.mrf.mxu1 }
 0x110   :  { %3445 = vst [vmem:[#allocation27_spill] sm:$0xff] %v2997_v41  ;;  %v3007_v12 = vadd.f32 %v2680_v50, %v927_v52  ;;  %v3010_v61 = vadd.f32 %v2680_v50, %v1215_v34 }
 0x111   :  { %v2143_v60 = vpop.f32.mrf.mxu0  ;;  %v2215_v43 = vpop.f32.mrf.mxu1 }
 0x112   :  { %3446 = vst [vmem:[#allocation28_spill] sm:$0xff] %v3010_v61  ;;  %v3013_v13 = vadd.f32 %v2143_v60, %v2680_v50  ;;  %v3023_v60 = vadd.f32 %v2215_v43, %v2680_v50  ;;  %v3449_v43 = vmax.f32 %v2687_v53, 0.0  ;;  %v3451_v53 = vmax.f32 %v2697_v57, 0.0 }
 0x113   :  { %v930_v40 = vpop.f32.mrf.mxu0  ;;  %v1218_v24 = vpop.f32.mrf.mxu1 }
 0x114   :  { %3447 = vst [vmem:[#allocation29_spill] sm:$0xff] %v3013_v13  ;;  %3448 = vst [vmem:[#allocation30_spill] sm:$0xff] %v3023_v60 }
 0x115   :  { %v2146_v49 = vpop.f32.mrf.mxu0  ;;  %v2218_v33 = vpop.f32.mrf.mxu1 }
 0x116   :  { %v952_v26 = vadd.f32 %v2146_v49, %v2680_v50  ;;  %v1240_v54 = vadd.f32 %v2218_v33, %v2680_v50  ;;  %v3037_v49 = vadd.f32 %v2680_v50, %v930_v40 }
 0x117   :  { %v943_v42 = vpop.f32.mrf.mxu0  ;;  %v1231_v9 = vpop.f32.mrf.mxu1 }
 0x118   :  { %v1412_v36 = vmax.f32 %v952_v26, 0.0  ;;  %v1484_v55 = vmax.f32 %v1240_v54, 0.0  ;;  %v944_v11 = vadd.f32 %v2680_v50, %v943_v42  ;;  %v1232_v38 = vadd.f32 %v2680_v50, %v1231_v9 }
 0x119   :  { %v2147_v34 = vpop.f32.mrf.mxu0  ;;  %v2219_v41 = vpop.f32.mrf.mxu1  ;;  %v3450_v26 = vmax.f32 %v2694_v56, 0.0  ;;  %v3452_v56 = vmax.f32 %v2700_v58, 0.0 }
 0x11a   :  { %v1520_v39 = vmax.f32 %v3449_v43, %v1412_v36  ;;  %v1410_v10 = vmax.f32 %v944_v11, 0.0  ;;  %v1482_v42 = vmax.f32 %v1232_v38, 0.0  ;;  %v955_v33 = vadd.f32 %v2147_v34, %v2680_v50 }
 0x11b   :  { %v1556_v54 = vmax.f32 %v3450_v26, %v1484_v55  ;;  %v1243_v52 = vadd.f32 %v2219_v41, %v2680_v50  ;;  %v946_v51 = vpop.f32.mrf.mxu0  ;;  %v1234_v13 = vpop.f32.mrf.mxu1  ;;  %v3047_v38 = vadd.f32 %v2680_v50, %v1218_v24 }
 0x11c   :  { %v1518_v36 = vmax.f32 %v3451_v53, %v1410_v10  ;;  %v1554_v55 = vmax.f32 %v3452_v56, %v1482_v42  ;;  %v947_v11 = vadd.f32 %v2680_v50, %v946_v51  ;;  %v1413_v40 = vmax.f32 %v955_v33, 0.0 }
 0x11d   :  { %v1592_v61 = vmax.f32 %v1520_v39, %v1556_v54  ;;  %v1485_v43 = vmax.f32 %v1243_v52, 0.0  ;;  %v1235_v34 = vadd.f32 %v2680_v50, %v1234_v13  ;;  %v2150_v26 = vpop.f32.mrf.mxu0  ;;  %v2222_v41 = vpop.f32.mrf.mxu1  ;;  %v3453_v10 = vmax.f32 %v2703_v59, 0.0 }
 0x11e   :  { %v1590_v60 = vmax.f32 %v1518_v36, %v1554_v55  ;;  %v1411_v39 = vmax.f32 %v947_v11, 0.0  ;;  %v968_v57 = vadd.f32 %v2150_v26, %v2680_v50  ;;  %v3454_v54 = vmax.f32 %v2710_v62, 0.0 }
 0x11f   :  { %v1996_v9 = vpack.c.bf16 %v1592_v61, %v1592_v61  ;;  %v1521_v58 = vmax.f32 %v3453_v10, %v1413_v40  ;;  %v1483_v42 = vmax.f32 %v1235_v34, 0.0  ;;  %v1256_v24 = vadd.f32 %v2222_v41, %v2680_v50  ;;  %v959_v33 = vpop.f32.mrf.mxu0  ;;  %v1247_v52 = vpop.f32.mrf.mxu1 }
 0x120   :  { %v1557_v51 = vmax.f32 %v3454_v54, %v1485_v43  ;;  %v1994_v61 = vpack.c.bf16 %v1590_v60, %v1590_v60  ;;  %v3455_v13 = vmax.f32 %v2713_v63, 0.0  ;;  %v1416_v36 = vmax.f32 %v968_v57, 0.0 }
 0x121   :  { %1773 = vst.msk [vmem:[%s3390_s3 + $0x8] sm:$0xf] %vm1770_vm3, %v1996_v9  ;;  %v960_v59 = vadd.f32 %v2680_v50, %v959_v33  ;;  %v3456_v62 = vmax.f32 %v2717_v1, 0.0  ;;  %v1488_v11 = vmax.f32 %v1256_v24, 0.0  ;;  %v1248_v40 = vadd.f32 %v2680_v50, %v1247_v52  ;;  %v2151_v43 = vpop.f32.mrf.mxu0  ;;  %v2223_v34 = vpop.f32.mrf.mxu1 }
 0x122   :  { %v1519_v53 = vmax.f32 %v3455_v13, %v1411_v39  ;;  %v1593_v56 = vmax.f32 %v1521_v58, %v1557_v51  ;;  %1771 = vst.msk [vmem:[%s3390_s3] sm:$0xf] %vm1770_vm3, %v1994_v61  ;;  %v3457_v63 = vmax.f32 %v2724_v4, 0.0  ;;  %v971_v26 = vadd.f32 %v2151_v43, %v2680_v50 }
 0x123   :  { %v1555_v55 = vmax.f32 %v3456_v62, %v1483_v42  ;;  %v1414_v9 = vmax.f32 %v960_v59, 0.0  ;;  %v1259_v41 = vadd.f32 %v2223_v34, %v2680_v50  ;;  %v3458_v57 = vmax.f32 %v2727_v5, 0.0  ;;  %v962_v54 = vpop.f32.mrf.mxu0  ;;  %v1250_v51 = vpop.f32.mrf.mxu1 }
 0x124   :  { %v1524_v60 = vmax.f32 %v3457_v63, %v1416_v36  ;;  %v1997_v1 = vpack.c.bf16 %v1593_v56, %v1593_v56  ;;  %v1486_v58 = vmax.f32 %v1248_v40, 0.0  ;;  %v3459_v42 = vmax.f32 %v2730_v6, 0.0 }
 0x125   :  { %v1591_v39 = vmax.f32 %v1519_v53, %v1555_v55  ;;  %v1560_v10 = vmax.f32 %v3458_v57, %v1488_v11  ;;  %v1417_v33 = vmax.f32 %v971_v26, 0.0  ;;  %v1489_v52 = vmax.f32 %v1259_v41, 0.0  ;;  %v2154_v59 = vpop.f32.mrf.mxu0  ;;  %v2226_v56 = vpop.f32.mrf.mxu1 }
 0x126   :  { %v1522_v24 = vmax.f32 %v3459_v42, %v1414_v9  ;;  %v963_v4 = vadd.f32 %v2680_v50, %v962_v54  ;;  %1774 = vst.msk [vmem:[%s3390_s3 + $0xc] sm:$0xf] %vm1770_vm3, %v1997_v1  ;;  %v3460_v5 = vmax.f32 %v2733_v7, 0.0  ;;  %v1251_v36 = vadd.f32 %v2680_v50, %v1250_v51 }
 0x127   :  { %v1995_v61 = vpack.c.bf16 %v1591_v39, %v1591_v39  ;;  %v1596_v13 = vmax.f32 %v1524_v60, %v1560_v10  ;;  %v3461_v6 = vmax.f32 %v2746_v16, 0.0  ;;  %v3462_v55 = vmax.f32 %v2749_v17, 0.0  ;;  %v975_v9 = vpop.f32.mrf.mxu0  ;;  %v1263_v26 = vpop.f32.mrf.mxu1 }
 0x128   :  { %v1558_v53 = vmax.f32 %v3460_v5, %v1486_v58  ;;  %v1415_v40 = vmax.f32 %v963_v4, 0.0  ;;  %v984_v43 = vadd.f32 %v2154_v59, %v2680_v50  ;;  %v1487_v63 = vmax.f32 %v1251_v36, 0.0 }
 0x129   :  { %v1525_v62 = vmax.f32 %v3461_v6, %v1417_v33  ;;  %v1561_v11 = vmax.f32 %v3462_v55, %v1489_v52  ;;  %1772 = vst.msk [vmem:[%s3390_s3 + $0x4] sm:$0xf] %vm1770_vm3, %v1995_v61  ;;  %v2000_v7 = vpack.c.bf16 %v1596_v13, %v1596_v13  ;;  %v1272_v60 = vadd.f32 %v2226_v56, %v2680_v50  ;;  %v2155_v42 = vpop.f32.mrf.mxu0 }
 0x12a   :  { %v1594_v34 = vmax.f32 %v1522_v24, %v1558_v53  ;;  %v3463_v41 = vmax.f32 %v2753_v19, 0.0  ;;  %v1420_v1 = vmax.f32 %v984_v43, 0.0  ;;  %v976_v39 = vadd.f32 %v2680_v50, %v975_v9  ;;  %v2227_v24 = vpop.f32.mrf.mxu1 }
 0x12b   :  { %v1597_v16 = vmax.f32 %v1525_v62, %v1561_v11  ;;  %1777 = vst.msk [vmem:[%s3390_s3 + $0x18] sm:$0xf] %vm1770_vm3, %v2000_v7  ;;  %v3464_v10 = vmax.f32 %v2756_v20, 0.0  ;;  %v1492_v54 = vmax.f32 %v1272_v60, 0.0  ;;  %v1264_v51 = vadd.f32 %v2680_v50, %v1263_v26  ;;  %v978_v59 = vpop.f32.mrf.mxu0 }
 0x12c   :  { %v1523_v17 = vmax.f32 %v3463_v41, %v1415_v40  ;;  %v1998_v57 = vpack.c.bf16 %v1594_v34, %v1594_v34  ;;  %v3465_v19 = vmax.f32 %v2759_v21, 0.0  ;;  %v1418_v4 = vmax.f32 %v976_v39, 0.0  ;;  %v1266_v56 = vpop.f32.mrf.mxu1 }
 0x12d   :  { %v1559_v58 = vmax.f32 %v3464_v10, %v1487_v63  ;;  %v2001_v33 = vpack.c.bf16 %v1597_v16, %v1597_v16  ;;  %v987_v61 = vadd.f32 %v2155_v42, %v2680_v50  ;;  %v3466_v20 = vmax.f32 %v2770_v28, 0.0  ;;  %v2158_v63 = vpop.f32.mrf.mxu0 }
 0x12e   :  { %v1528_v52 = vmax.f32 %v3465_v19, %v1420_v1  ;;  %1775 = vst.msk [vmem:[%s3390_s3 + $0x10] sm:$0xf] %vm1770_vm3, %v1998_v57  ;;  %v1490_v53 = vmax.f32 %v1264_v51, 0.0  ;;  %v1275_v36 = vadd.f32 %v2227_v24, %v2680_v50  ;;  %v3467_v21 = vmax.f32 %v2773_v29, 0.0  ;;  %v2230_v60 = vpop.f32.mrf.mxu1 }
 0x12f   :  { %v1595_v13 = vmax.f32 %v1523_v17, %v1559_v58  ;;  %v1564_v5 = vmax.f32 %v3466_v20, %v1492_v54  ;;  %1778 = vst.msk [vmem:[%s3390_s3 + $0x1c] sm:$0xf] %vm1770_vm3, %v2001_v33  ;;  %v1421_v62 = vmax.f32 %v987_v61, 0.0  ;;  %v979_v55 = vadd.f32 %v2680_v50, %v978_v59  ;;  %v991_v10 = vpop.f32.mrf.mxu0  ;;  %v3474_v59 = vld [vmem:[#allocation2_spill] sm:$0xff] }
 0x130   :  { %v1526_v6 = vmax.f32 %v3467_v21, %v1418_v4  ;;  %v1267_v11 = vadd.f32 %v2680_v50, %v1266_v56  ;;  %v3468_v43 = vmax.f32 %v2776_v30, 0.0  ;;  %v1493_v34 = vmax.f32 %v1275_v36, 0.0  ;;  %v1279_v58 = vpop.f32.mrf.mxu1 }
 0x131   :  { %v1999_v28 = vpack.c.bf16 %v1595_v13, %v1595_v13  ;;  %v1600_v40 = vmax.f32 %v1528_v52, %v1564_v5  ;;  %v3469_v9 = vmax.f32 %v2779_v18, 0.0  ;;  %v1419_v16 = vmax.f32 %v979_v55, 0.0  ;;  %v2159_v61 = vpop.f32.mrf.mxu0 }
 0x132   :  { %v1562_v7 = vmax.f32 %v3468_v43, %v1490_v53  ;;  %v1491_v41 = vmax.f32 %v1267_v11, 0.0  ;;  %v1000_v29 = vadd.f32 %v2158_v63, %v2680_v50  ;;  %v3470_v30 = vmax.f32 %v2789_v31, 0.0  ;;  %v2231_v13 = vpop.f32.mrf.mxu1 }
 0x133   :  { %v1529_v26 = vmax.f32 %v3469_v9, %v1421_v62  ;;  %1776 = vst.msk [vmem:[%s3390_s3 + $0x14] sm:$0xf] %vm1770_vm3, %v1999_v28  ;;  %v2004_v17 = vpack.c.bf16 %v1600_v40, %v1600_v40  ;;  %v1288_v57 = vadd.f32 %v2230_v60, %v2680_v50  ;;  %v3471_v18 = vmax.f32 %v2793_v32, 0.0  ;;  %v994_v55 = vpop.f32.mrf.mxu0  ;;  %v3478_v60 = vld [vmem:[#allocation4_spill] sm:$0xff] }
 0x134   :  { %v1598_v1 = vmax.f32 %v1526_v6, %v1562_v7  ;;  %v1565_v39 = vmax.f32 %v3470_v30, %v1493_v34  ;;  %v3472_v51 = vmax.f32 %v2800_v14, 0.0  ;;  %v1424_v24 = vmax.f32 %v1000_v29, 0.0  ;;  %v1282_v11 = vpop.f32.mrf.mxu1 }
 0x135   :  { %v1527_v54 = vmax.f32 %v3471_v18, %v1419_v16  ;;  %v992_v33 = vadd.f32 %v2680_v50, %v991_v10  ;;  %1781 = vst.msk [vmem:[%s3390_s3 + $0x28] sm:$0xf] %vm1770_vm3, %v2004_v17  ;;  %v1496_v52 = vmax.f32 %v1288_v57, 0.0  ;;  %v1280_v4 = vadd.f32 %v2680_v50, %v1279_v58  ;;  %v2162_v29 = vpop.f32.mrf.mxu0 }
 0x136   :  { %v1563_v42 = vmax.f32 %v3472_v51, %v1491_v41  ;;  %v2002_v31 = vpack.c.bf16 %v1598_v1, %v1598_v1  ;;  %v1601_v19 = vmax.f32 %v1529_v26, %v1565_v39  ;;  %v3473_v20 = vmax.f32 %v2808_v35, 0.0  ;;  %v3476_v35 = vld [vmem:[#allocation3_spill] sm:$0xff]  ;;  %v2234_v17 = vpop.f32.mrf.mxu1 }
 0x137   :  { %v1422_v5 = vmax.f32 %v992_v33, 0.0  ;;  %v1003_v53 = vadd.f32 %v2159_v61, %v2680_v50  ;;  %v3475_v56 = vmax.f32 %v3474_v59, 0.0  ;;  %v1494_v6 = vmax.f32 %v1280_v4, 0.0  ;;  %v1007_v33 = vpop.f32.mrf.mxu0 }
 0x138   :  { %v1599_v32 = vmax.f32 %v1527_v54, %v1563_v42  ;;  %v1532_v14 = vmax.f32 %v3473_v20, %v1424_v24  ;;  %1779 = vst.msk [vmem:[%s3390_s3 + $0x20] sm:$0xf] %vm1770_vm3, %v2002_v31  ;;  %v2005_v36 = vpack.c.bf16 %v1601_v19, %v1601_v19  ;;  %v1291_v62 = vadd.f32 %v2231_v13, %v2680_v50  ;;  %v3481_v54 = vld [vmem:[#allocation5_spill] sm:$0xff]  ;;  %v1295_v31 = vpop.f32.mrf.mxu1  ;;  %v3483_v19 = vld [vmem:[#allocation6_spill] sm:$0xff] }
 0x139   :  { %v1568_v21 = vmax.f32 %v3475_v56, %v1496_v52  ;;  %v3477_v40 = vmax.f32 %v3476_v35, 0.0  ;;  %v1425_v7 = vmax.f32 %v1003_v53, 0.0  ;;  %v995_v34 = vadd.f32 %v2680_v50, %v994_v55  ;;  %v2163_v59 = vpop.f32.mrf.mxu0 }
 0x13a   :  { %v2003_v28 = vpack.c.bf16 %v1599_v32, %v1599_v32  ;;  %1782 = vst.msk [vmem:[%s3390_s3 + $0x2c] sm:$0xf] %vm1770_vm3, %v2005_v36  ;;  %v3479_v9 = vmax.f32 %v3478_v60, 0.0  ;;  %v1497_v16 = vmax.f32 %v1291_v62, 0.0  ;;  %v1283_v41 = vadd.f32 %v2680_v50, %v1282_v11  ;;  %v2235_v56 = vpop.f32.mrf.mxu1 }
 0x13b   :  { %v1530_v43 = vmax.f32 %v3477_v40, %v1422_v5  ;;  %v1604_v63 = vmax.f32 %v1532_v14, %v1568_v21  ;;  %v3480_v1 = vmax.f32 %v2832_v8, 0.0  ;;  %v1423_v39 = vmax.f32 %v995_v34, 0.0  ;;  %v3485_v14 = vld [vmem:[#allocation7_spill] sm:$0xff]  ;;  %v3487_v21 = vld [vmem:[#allocation8_spill] sm:$0xff] }
 0x13c   :  { %v1566_v26 = vmax.f32 %v3479_v9, %v1494_v6  ;;  %1780 = vst.msk [vmem:[%s3390_s3 + $0x24] sm:$0xf] %vm1770_vm3, %v2003_v28  ;;  %v1016_v57 = vadd.f32 %v2162_v29, %v2680_v50  ;;  %v1304_v10 = vadd.f32 %v2234_v17, %v2680_v50  ;;  %v3482_v51 = vmax.f32 %v3481_v54, 0.0  ;;  %v1298_v60 = vpop.f32.mrf.mxu1 }
 0x13d   :  { %v1533_v30 = vmax.f32 %v3480_v1, %v1425_v7  ;;  %v2008_v58 = vpack.c.bf16 %v1604_v63, %v1604_v63  ;;  %v1495_v24 = vmax.f32 %v1283_v41, 0.0  ;;  %v3484_v52 = vmax.f32 %v3483_v19, 0.0  ;;  %v1010_v63 = vpop.f32.mrf.mxu0 }
 0x13e   :  { %v1602_v18 = vmax.f32 %v1530_v43, %v1566_v26  ;;  %v1569_v42 = vmax.f32 %v3482_v51, %v1497_v16  ;;  %v1428_v61 = vmax.f32 %v1016_v57, 0.0  ;;  %v1500_v13 = vmax.f32 %v1304_v10, 0.0  ;;  %v2238_v10 = vpop.f32.mrf.mxu1 }
 0x13f   :  { %v1531_v4 = vmax.f32 %v3484_v52, %v1423_v39  ;;  %v1008_v8 = vadd.f32 %v2680_v50, %v1007_v33  ;;  %1785 = vst.msk [vmem:[%s3390_s3 + $0x38] sm:$0xf] %vm1770_vm3, %v2008_v58  ;;  %v3486_v5 = vmax.f32 %v3485_v14, 0.0  ;;  %v1296_v36 = vadd.f32 %v2680_v50, %v1295_v31  ;;  %v2166_v57 = vpop.f32.mrf.mxu0 }
 0x140   :  { %v2006_v32 = vpack.c.bf16 %v1602_v18, %v1602_v18  ;;  %v1605_v20 = vmax.f32 %v1533_v30, %v1569_v42  ;;  %v3488_v6 = vmax.f32 %v3487_v21, 0.0  ;;  %v3489_v55 = vmax.f32 %v2857_v44, 0.0  ;;  %v1311_v52 = vpop.f32.mrf.mxu1 }
 0x141   :  { %v1567_v53 = vmax.f32 %v3486_v5, %v1495_v24  ;;  %v1426_v28 = vmax.f32 %v1008_v8, 0.0  ;;  %v1019_v35 = vadd.f32 %v2163_v59, %v2680_v50  ;;  %v1498_v7 = vmax.f32 %v1296_v36, 0.0  ;;  %v1023_v19 = vpop.f32.mrf.mxu0 }
 0x142   :  { %v1536_v62 = vmax.f32 %v3488_v6, %v1428_v61  ;;  %v1572_v11 = vmax.f32 %v3489_v55, %v1500_v13  ;;  %1783 = vst.msk [vmem:[%s3390_s3 + $0x30] sm:$0xf] %vm1770_vm3, %v2006_v32  ;;  %v2009_v40 = vpack.c.bf16 %v1605_v20, %v1605_v20  ;;  %v1307_v34 = vadd.f32 %v2235_v56, %v2680_v50  ;;  %v3495_v20 = vld [vmem:[#allocation9_spill] sm:$0xff]  ;;  %v2239_v59 = vpop.f32.mrf.mxu1  ;;  %v3497_v56 = vld [vmem:[#allocation10_spill] sm:$0xff] }
 0x143   :  { %v1603_v43 = vmax.f32 %v1531_v4, %v1567_v53  ;;  %v3490_v26 = vmax.f32 %v2861_v45, 0.0  ;;  %v1429_v16 = vmax.f32 %v1019_v35, 0.0  ;;  %v1011_v41 = vadd.f32 %v2680_v50, %v1010_v63  ;;  %v2167_v36 = vpop.f32.mrf.mxu0  ;;  %v3499_v35 = vld [vmem:[#allocation11_spill] sm:$0xff] }
 0x144   :  { %v1608_v9 = vmax.f32 %v1536_v62, %v1572_v11  ;;  %1786 = vst.msk [vmem:[%s3390_s3 + $0x3c] sm:$0xf] %vm1770_vm3, %v2009_v40  ;;  %v3491_v17 = vmax.f32 %v2865_v46, 0.0  ;;  %v1501_v30 = vmax.f32 %v1307_v34, 0.0  ;;  %v1299_v39 = vadd.f32 %v2680_v50, %v1298_v60  ;;  %v1314_v63 = vpop.f32.mrf.mxu1  ;;  %v3501_v60 = vld [vmem:[#allocation12_spill] sm:$0xff] }
 0x145   :  { %v1534_v44 = vmax.f32 %v3490_v26, %v1426_v28  ;;  %v2007_v29 = vpack.c.bf16 %v1603_v43, %v1603_v43  ;;  %v3492_v45 = vmax.f32 %v2869_v25, 0.0  ;;  %v1427_v54 = vmax.f32 %v1011_v41, 0.0  ;;  %v1026_v34 = vpop.f32.mrf.mxu0 }
 0x146   :  { %v1570_v1 = vmax.f32 %v3491_v17, %v1498_v7  ;;  %v2012_v58 = vpack.c.bf16 %v1608_v9, %v1608_v9  ;;  %v1032_v51 = vadd.f32 %v2166_v57, %v2680_v50  ;;  %v3493_v46 = vmax.f32 %v2875_v47, 0.0 }
 0x147   :  { %v1537_v18 = vmax.f32 %v3492_v45, %v1429_v16  ;;  %1784 = vst.msk [vmem:[%s3390_s3 + $0x34] sm:$0xf] %vm1770_vm3, %v2007_v29  ;;  %v1499_v33 = vmax.f32 %v1299_v39, 0.0  ;;  %v1320_v31 = vadd.f32 %v2238_v10, %v2680_v50  ;;  %v3494_v25 = vmax.f32 %v2879_v48, 0.0  ;;  %v2170_v10 = vpop.f32.mrf.mxu0 }
 0x148   :  { %v1606_v42 = vmax.f32 %v1534_v44, %v1570_v1  ;;  %v1573_v24 = vmax.f32 %v3493_v46, %v1501_v30  ;;  %1789 = vst.msk [vmem:[%s3390_s3 + $0x48] sm:$0xf] %vm1770_vm3, %v2012_v58  ;;  %v1432_v61 = vmax.f32 %v1032_v51, 0.0  ;;  %v1024_v13 = vadd.f32 %v2680_v50, %v1023_v19  ;;  %v3503_v44 = vld [vmem:[#allocation13_spill] sm:$0xff]  ;;  %v2242_v58 = vpop.f32.mrf.mxu1 }
 0x149   :  { %v1535_v4 = vmax.f32 %v3494_v25, %v1427_v54  ;;  %v1312_v8 = vadd.f32 %v2680_v50, %v1311_v52  ;;  %v3496_v14 = vmax.f32 %v3495_v20, 0.0  ;;  %v1504_v53 = vmax.f32 %v1320_v31, 0.0  ;;  %v1039_v52 = vpop.f32.mrf.mxu0 }
 0x14a   :  { %v2010_v47 = vpack.c.bf16 %v1606_v42, %v1606_v42  ;;  %v1609_v32 = vmax.f32 %v1537_v18, %v1573_v24  ;;  %v3498_v21 = vmax.f32 %v3497_v56, 0.0  ;;  %v1430_v62 = vmax.f32 %v1024_v13, 0.0  ;;  %v1327_v25 = vpop.f32.mrf.mxu1  ;;  %v3511_v56 = vld [vmem:[#allocation16_spill] sm:$0xff] }
 0x14b   :  { %v1571_v5 = vmax.f32 %v3496_v14, %v1499_v33  ;;  %v1502_v55 = vmax.f32 %v1312_v8, 0.0  ;;  %v1035_v48 = vadd.f32 %v2167_v36, %v2680_v50  ;;  %v3500_v40 = vmax.f32 %v3499_v35, 0.0  ;;  %v2171_v36 = vpop.f32.mrf.mxu0 }
 0x14c   :  { %v1540_v6 = vmax.f32 %v3498_v21, %v1432_v61  ;;  %1787 = vst.msk [vmem:[%s3390_s3 + $0x40] sm:$0xf] %vm1770_vm3, %v2010_v47  ;;  %v2013_v11 = vpack.c.bf16 %v1609_v32, %v1609_v32  ;;  %v1323_v7 = vadd.f32 %v2239_v59, %v2680_v50  ;;  %v3502_v9 = vmax.f32 %v3501_v60, 0.0  ;;  %v2243_v59 = vpop.f32.mrf.mxu1 }
 0x14d   :  { %v1607_v28 = vmax.f32 %v1535_v4, %v1571_v5  ;;  %v1576_v43 = vmax.f32 %v3500_v40, %v1504_v53  ;;  %v3504_v16 = vmax.f32 %v3503_v44, 0.0  ;;  %v1433_v29 = vmax.f32 %v1035_v48, 0.0 }
 0x14e   :  { %v1538_v26 = vmax.f32 %v3502_v9, %v1430_v62  ;;  %v1027_v17 = vadd.f32 %v2680_v50, %v1026_v34  ;;  %1790 = vst.msk [vmem:[%s3390_s3 + $0x4c] sm:$0xf] %vm1770_vm3, %v2013_v11  ;;  %v1505_v39 = vmax.f32 %v1323_v7, 0.0  ;;  %v1315_v57 = vadd.f32 %v2680_v50, %v1314_v63  ;;  %v1042_v7 = vpop.f32.mrf.mxu0  ;;  %v1330_v34 = vpop.f32.mrf.mxu1 }
 0x14f   :  { %v1574_v41 = vmax.f32 %v3504_v16, %v1502_v55  ;;  %v2011_v1 = vpack.c.bf16 %v1607_v28, %v1607_v28  ;;  %v1612_v30 = vmax.f32 %v1540_v6, %v1576_v43  ;;  %v3505_v18 = vmax.f32 %v2912_v2, 0.0  ;;  %v3507_v2 = vld [vmem:[#allocation14_spill] sm:$0xff] }
 0x150   :  { %v1431_v51 = vmax.f32 %v1027_v17, 0.0  ;;  %v1048_v42 = vadd.f32 %v2170_v10, %v2680_v50  ;;  %v3506_v24 = vmax.f32 %v2916_v3, 0.0  ;;  %v1503_v31 = vmax.f32 %v1315_v57, 0.0  ;;  %v3509_v3 = vld [vmem:[#allocation15_spill] sm:$0xff]  ;;  %v3518_v10 = vld [vmem:[#allocation18_spill] sm:$0xff] }
 0x151   :  { %v1610_v45 = vmax.f32 %v1538_v26, %v1574_v41  ;;  %v1541_v54 = vmax.f32 %v3505_v18, %v1433_v29  ;;  %1788 = vst.msk [vmem:[%s3390_s3 + $0x44] sm:$0xf] %vm1770_vm3, %v2011_v1  ;;  %v2016_v46 = vpack.c.bf16 %v1612_v30, %v1612_v30  ;;  %v1336_v19 = vadd.f32 %v2242_v58, %v2680_v50  ;;  %v2174_v1 = vpop.f32.mrf.mxu0  ;;  %v2246_v30 = vpop.f32.mrf.mxu1 }
 0x152   :  { %v1577_v33 = vmax.f32 %v3506_v24, %v1505_v39  ;;  %v3508_v61 = vmax.f32 %v3507_v2, 0.0  ;;  %v1436_v8 = vmax.f32 %v1048_v42, 0.0  ;;  %v1040_v47 = vadd.f32 %v2680_v50, %v1039_v52 }
 0x153   :  { %v2014_v4 = vpack.c.bf16 %v1610_v45, %v1610_v45  ;;  %1793 = vst.msk [vmem:[%s3390_s3 + $0x58] sm:$0xf] %vm1770_vm3, %v2016_v46  ;;  %v3510_v20 = vmax.f32 %v3509_v3, 0.0  ;;  %v1508_v5 = vmax.f32 %v1336_v19, 0.0  ;;  %v1328_v53 = vadd.f32 %v2680_v50, %v1327_v25  ;;  %v1055_v24 = vpop.f32.mrf.mxu0  ;;  %v3520_v19 = vld [vmem:[#allocation19_spill] sm:$0xff] }
 0x154   :  { %v1539_v13 = vmax.f32 %v3508_v61, %v1431_v51  ;;  %v1613_v32 = vmax.f32 %v1541_v54, %v1577_v33  ;;  %v3512_v21 = vmax.f32 %v3511_v56, 0.0  ;;  %v1434_v62 = vmax.f32 %v1040_v47, 0.0  ;;  %v1343_v33 = vpop.f32.mrf.mxu1 }
 0x155   :  { %v1575_v14 = vmax.f32 %v3510_v20, %v1503_v31  ;;  %1791 = vst.msk [vmem:[%s3390_s3 + $0x50] sm:$0xf] %vm1770_vm3, %v2014_v4  ;;  %v1051_v55 = vadd.f32 %v2171_v36, %v2680_v50  ;;  %v1339_v48 = vadd.f32 %v2243_v59, %v2680_v50  ;;  %v3513_v35 = vmax.f32 %v2937_v22, 0.0  ;;  %v2175_v20 = vpop.f32.mrf.mxu0 }
 0x156   :  { %v1544_v6 = vmax.f32 %v3512_v21, %v1436_v8  ;;  %v2017_v11 = vpack.c.bf16 %v1613_v32, %v1613_v32  ;;  %v1506_v43 = vmax.f32 %v1328_v53, 0.0  ;;  %v3514_v63 = vmax.f32 %v2941_v23, 0.0  ;;  %v3516_v23 = vld [vmem:[#allocation17_spill] sm:$0xff] }
 0x157   :  { %v1611_v28 = vmax.f32 %v1539_v13, %v1575_v14  ;;  %v1580_v40 = vmax.f32 %v3513_v35, %v1508_v5  ;;  %v1437_v9 = vmax.f32 %v1051_v55, 0.0  ;;  %v1509_v26 = vmax.f32 %v1339_v48, 0.0  ;;  %v3522_v13 = vld [vmem:[#allocation20_spill] sm:$0xff]  ;;  %v2247_v14 = vpop.f32.mrf.mxu1  ;;  %v3524_v53 = vld [vmem:[#allocation21_spill] sm:$0xff]  ;;  %v1058_v35 = vpop.f32.mrf.mxu0 }
 0x158   :  { %v1542_v60 = vmax.f32 %v3514_v63, %v1434_v62  ;;  %v1043_v44 = vadd.f32 %v2680_v50, %v1042_v7  ;;  %1794 = vst.msk [vmem:[%s3390_s3 + $0x5c] sm:$0xf] %vm1770_vm3, %v2017_v11  ;;  %v3515_v22 = vmax.f32 %v2945_v15, 0.0  ;;  %v1331_v17 = vadd.f32 %v2680_v50, %v1330_v34  ;;  %v3526_v62 = vld [vmem:[#allocation22_spill] sm:$0xff] }
 0x159   :  { %v2015_v16 = vpack.c.bf16 %v1611_v28, %v1611_v28  ;;  %v1616_v41 = vmax.f32 %v1544_v6, %v1580_v40  ;;  %v3517_v39 = vmax.f32 %v3516_v23, 0.0  ;;  %v3519_v58 = vmax.f32 %v3518_v10, 0.0  ;;  %v1346_v40 = vpop.f32.mrf.mxu1  ;;  %v2331_v10 = vld [vmem:[%s3389_s2] ss:$0 sm:$0xff] }
 0x15a   :  { %v1578_v29 = vmax.f32 %v3515_v22, %v1506_v43  ;;  %v1435_v18 = vmax.f32 %v1043_v44, 0.0  ;;  %v1064_v54 = vadd.f32 %v2174_v1, %v2680_v50  ;;  %v1507_v42 = vmax.f32 %v1331_v17, 0.0  ;;  %v3528_v43 = vld [vmem:[#allocation23_spill] sm:$0xff]  ;;  %v2178_v17 = vpop.f32.mrf.mxu0 }
 0x15b   :  { %v1545_v57 = vmax.f32 %v3517_v39, %v1437_v9  ;;  %v1581_v45 = vmax.f32 %v3519_v58, %v1509_v26  ;;  %1792 = vst.msk [vmem:[%s3390_s3 + $0x54] sm:$0xf] %vm1770_vm3, %v2015_v16  ;;  %v2020_v15 = vpack.c.bf16 %v1616_v41, %v1616_v41  ;;  %v1352_v46 = vadd.f32 %v2246_v30, %v2680_v50  ;;  %v3530_v16 = vld [vmem:[#allocation24_spill] sm:$0xff]  ;;  %v2250_v1 = vpop.f32.mrf.mxu1 }
 0x15c   :  { %v1614_v51 = vmax.f32 %v1542_v60, %v1578_v29  ;;  %v3521_v52 = vmax.f32 %v3520_v19, 0.0  ;;  %v1440_v4 = vmax.f32 %v1064_v54, 0.0  ;;  %v1056_v2 = vadd.f32 %v2680_v50, %v1055_v24 }
 0x15d   :  { %v1617_v31 = vmax.f32 %v1545_v57, %v1581_v45  ;;  %1797 = vst.msk [vmem:[%s3390_s3 + $0x68] sm:$0xf] %vm1770_vm3, %v2020_v15  ;;  %v3523_v8 = vmax.f32 %v3522_v13, 0.0  ;;  %v1512_v32 = vmax.f32 %v1352_v46, 0.0  ;;  %v1344_v3 = vadd.f32 %v2680_v50, %v1343_v33  ;;  %v3536_v33 = vld [vmem:[#allocation26_spill] sm:$0xff] }
 0x15e   :  { %v1543_v25 = vmax.f32 %v3521_v52, %v1435_v18  ;;  %v2018_v61 = vpack.c.bf16 %v1614_v51, %v1614_v51  ;;  %v3525_v36 = vmax.f32 %v3524_v53, 0.0  ;;  %v1438_v56 = vmax.f32 %v1056_v2, 0.0  ;;  %v1359_v51 = vpop.f32.mrf.mxu1 }
 0x15f   :  { %v1579_v47 = vmax.f32 %v3523_v8, %v1507_v42  ;;  %v2021_v5 = vpack.c.bf16 %v1617_v31, %v1617_v31  ;;  %v1067_v21 = vadd.f32 %v2175_v20, %v2680_v50  ;;  %v3527_v55 = vmax.f32 %v3526_v62, 0.0  ;;  %v3534_v42 = vld [vmem:[#allocation25_spill] sm:$0xff] }
 0x160   :  { %v1548_v59 = vmax.f32 %v3525_v36, %v1440_v4  ;;  %1795 = vst.msk [vmem:[%s3390_s3 + $0x60] sm:$0xf] %vm1770_vm3, %v2018_v61  ;;  %v1510_v11 = vmax.f32 %v1344_v3, 0.0  ;;  %v1355_v28 = vadd.f32 %v2247_v14, %v2680_v50  ;;  %v3529_v7 = vmax.f32 %v3528_v43, 0.0  ;;  %v2251_v8 = vpop.f32.mrf.mxu1  ;;  %v3542_v43 = vld [vmem:[#allocation28_spill] sm:$0xff] }
 0x161   :  { %v1615_v6 = vmax.f32 %v1543_v25, %v1579_v47  ;;  %v1584_v48 = vmax.f32 %v3527_v55, %v1512_v32  ;;  %1798 = vst.msk [vmem:[%s3390_s3 + $0x6c] sm:$0xf] %vm1770_vm3, %v2021_v5  ;;  %v1441_v63 = vmax.f32 %v1067_v21, 0.0  ;;  %v1059_v60 = vadd.f32 %v2680_v50, %v1058_v35  ;;  %v3538_v32 = vld [vmem:[#allocation27_spill] sm:$0xff] }
 0x162   :  { %v1546_v34 = vmax.f32 %v3529_v7, %v1438_v56  ;;  %v1347_v9 = vadd.f32 %v2680_v50, %v1346_v40  ;;  %v3531_v41 = vmax.f32 %v3530_v16, 0.0  ;;  %v1513_v29 = vmax.f32 %v1355_v28, 0.0  ;;  %v1362_v62 = vpop.f32.mrf.mxu1 }
 0x163   :  { %v2019_v26 = vpack.c.bf16 %v1615_v6, %v1615_v6  ;;  %v1620_v44 = vmax.f32 %v1548_v59, %v1584_v48  ;;  %v3532_v30 = vmax.f32 %v2984_v0, 0.0  ;;  %v1439_v39 = vmax.f32 %v1059_v60, 0.0  ;;  %v1071_v0 = vpop.f32.mrf.mxu0 }
 0x164   :  { %v1582_v22 = vmax.f32 %v3531_v41, %v1510_v11  ;;  %v1511_v57 = vmax.f32 %v1347_v9, 0.0  ;;  %v1080_v58 = vadd.f32 %v2331_v10, %v2178_v17  ;;  %v3533_v18 = vmax.f32 %v2987_v37, 0.0 }
 0x165   :  { %v1549_v23 = vmax.f32 %v3532_v30, %v1441_v63  ;;  %1796 = vst.msk [vmem:[%s3390_s3 + $0x64] sm:$0xf] %vm1770_vm3, %v2019_v26  ;;  %v2024_v50 = vpack.c.bf16 %v1620_v44, %v1620_v44  ;;  %v1368_v15 = vadd.f32 %v2331_v10, %v2250_v1  ;;  %v3535_v46 = vmax.f32 %v3534_v42, 0.0  ;;  %v2179_v13 = vpop.f32.mrf.mxu0 }
 0x166   :  { %v1618_v45 = vmax.f32 %v1546_v34, %v1582_v22  ;;  %v1585_v54 = vmax.f32 %v3533_v18, %v1513_v29  ;;  %v3537_v31 = vmax.f32 %v3536_v33, 0.0  ;;  %v1444_v52 = vmax.f32 %v1080_v58, 0.0  ;;  %v3546_v29 = vld [vmem:[#allocation30_spill] sm:$0xff] }
 0x167   :  { %v1547_v24 = vmax.f32 %v3535_v46, %v1439_v39  ;;  %v1072_v25 = vadd.f32 %v2331_v10, %v1071_v0  ;;  %1801 = vst.msk [vmem:[%s3390_s3 + $0x78] sm:$0xf] %vm1770_vm3, %v2024_v50  ;;  %v1516_v37 = vmax.f32 %v1368_v15, 0.0  ;;  %v1360_v61 = vadd.f32 %v2331_v10, %v1359_v51  ;;  %v1074_v6 = vpop.f32.mrf.mxu0 }
 0x168   :  { %v1583_v19 = vmax.f32 %v3537_v31, %v1511_v57  ;;  %v2022_v4 = vpack.c.bf16 %v1618_v45, %v1618_v45  ;;  %v1621_v2 = vmax.f32 %v1549_v23, %v1585_v54  ;;  %v3539_v3 = vmax.f32 %v3538_v32, 0.0 }
 0x169   :  { %v1442_v14 = vmax.f32 %v1072_v25, 0.0  ;;  %v1083_v5 = vadd.f32 %v2331_v10, %v2179_v13  ;;  %v3540_v36 = vmax.f32 %v3004_v27, 0.0  ;;  %v1514_v56 = vmax.f32 %v1360_v61, 0.0 }
 0x16a   :  { %v1619_v47 = vmax.f32 %v1547_v24, %v1583_v19  ;;  %v1552_v20 = vmax.f32 %v3539_v3, %v1444_v52  ;;  %1799 = vst.msk [vmem:[%s3390_s3 + $0x70] sm:$0xf] %vm1770_vm3, %v2022_v4  ;;  %v2025_v53 = vpack.c.bf16 %v1621_v2, %v1621_v2  ;;  %v1371_v21 = vadd.f32 %v2331_v10, %v2251_v8 }
 0x16b   :  { %v1588_v59 = vmax.f32 %v3540_v36, %v1516_v37  ;;  %v3541_v48 = vmax.f32 %v3007_v12, 0.0  ;;  %v1445_v28 = vmax.f32 %v1083_v5, 0.0  ;;  %v1075_v35 = vadd.f32 %v2331_v10, %v1074_v6  ;;  %v3544_v12 = vld [vmem:[#allocation29_spill] sm:$0xff] }
 0x16c   :  { %v2023_v55 = vpack.c.bf16 %v1619_v47, %v1619_v47  ;;  %1802 = vst.msk [vmem:[%s3390_s3 + $0x7c] sm:$0xf] %vm1770_vm3, %v2025_v53  ;;  %v3543_v7 = vmax.f32 %v3542_v43, 0.0  ;;  %v1517_v34 = vmax.f32 %v1371_v21, 0.0  ;;  %v1363_v63 = vadd.f32 %v2331_v10, %v1362_v62 }
 0x16d   :  { %v1550_v11 = vmax.f32 %v3541_v48, %v1442_v14  ;;  %v1624_v40 = vmax.f32 %v1552_v20, %v1588_v59  ;;  %v1407_v60 = vmax.f32 %v3037_v49, 0.0  ;;  %v1479_v9 = vmax.f32 %v3047_v38, 0.0 }
 0x16e   :  { %v1586_v27 = vmax.f32 %v3543_v7, %v1514_v56  ;;  %1800 = vst.msk [vmem:[%s3390_s3 + $0x74] sm:$0xf] %vm1770_vm3, %v2023_v55  ;;  %v3545_v26 = vmax.f32 %v3544_v12, 0.0  ;;  %v1443_v16 = vmax.f32 %v1075_v35, 0.0  ;;  %v3547_v17 = vmax.f32 %v3546_v29, 0.0 }
 0x16f   :  { %v2028_v41 = vpack.c.bf16 %v1624_v40, %v1624_v40  ;;  %v1515_v30 = vmax.f32 %v1363_v63, 0.0 }
 0x170   :  { %v1553_v44 = vmax.f32 %v3545_v26, %v1445_v28  ;;  %v1622_v22 = vmax.f32 %v1550_v11, %v1586_v27  ;;  %v1589_v1 = vmax.f32 %v3547_v17, %v1517_v34  ;;  %v1551_v23 = vmax.f32 %v1407_v60, %v1443_v16 }
 0x171   :  { %1805 = vst.msk [vmem:[%s3390_s3 + $0x88] sm:$0xf] %vm1770_vm3, %v2028_v41  ;;  %v1587_v39 = vmax.f32 %v1479_v9, %v1515_v30 }
 0x172   :  { %v2026_v49 = vpack.c.bf16 %v1622_v22, %v1622_v22  ;;  %v1625_v38 = vmax.f32 %v1553_v44, %v1589_v1 }
 0x173   :  { %v1623_v10 = vmax.f32 %v1551_v23, %v1587_v39 }
 0x174   :  { %1803 = vst.msk [vmem:[%s3390_s3 + $0x80] sm:$0xf] %vm1770_vm3, %v2026_v49  ;;  %v2029_v57 = vpack.c.bf16 %v1625_v38, %v1625_v38 }
 0x175   :  { %v2027_v58 = vpack.c.bf16 %v1623_v10, %v1623_v10 }
 0x176   :  { %1806 = vst.msk [vmem:[%s3390_s3 + $0x8c] sm:$0xf] %vm1770_vm3, %v2029_v57 }
 0x177   :  { %1804 = vst.msk [vmem:[%s3390_s3 + $0x84] sm:$0xf] %vm1770_vm3, %v2027_v58 }

// kernel: cnn_forward.4
= control target key start
LH: loop header
LB: loop body
LE: loop exit
PB: predicated region body
PF: predicated region fallthrough
CT: control target
= control target key end

     0   :  { %vm766_vm0 = vcmask 261120   ;;  %vm1223_vm1 = vcmask 519168   ;;  %s2244_s1 = inlined_call_operand.vmem [shape: bf16[800,64], index: 1, kind: input, shape index: {}]   ;;  %s2245_s0 = inlined_call_operand.vmem [shape: bf16[128,800], index: 0, kind: input, shape index: {}]   ;;  %s2246_s2 = inlined_call_operand.vmem [shape: f32[1,64], index: 2, kind: input, shape index: {}]   ;;  %s2247_s3 = inlined_call_operand.vmem [shape: bf16[32,64], index: 3, kind: output, shape index: {}]  }
   0x1   :  { %v1593_v0 = vld [vmem:[%s2244_s1 + $0x78] sm:$0xff]   ;;  %v1597_v4 = vld [vmem:[%s2244_s1 + $0x70] sm:$0xff]   ;;  %v1601_v8 = vld [vmem:[%s2244_s1 + $0x68] sm:$0xff]  }
   0x2   :  { %v1594_v1 = vld [vmem:[%s2244_s1 + $0xf8] sm:$0xff]   ;;  %1355 = vmatprep.subr.bf16.mxu0 %v1593_v0  ;;  %v1598_v5 = vld [vmem:[%s2244_s1 + $0xf0] sm:$0xff]   ;;  %v1602_v9 = vld [vmem:[%s2244_s1 + $0xe8] sm:$0xff]  }
   0x3   :  { %v1595_v2 = vld [vmem:[%s2244_s1 + $0x38] sm:$0xff]   ;;  %1419 = vmatprep.subr.bf16.mxu1 %v1594_v1  ;;  %v1599_v6 = vld [vmem:[%s2244_s1 + $0x30] sm:$0xff]   ;;  %v1603_v10 = vld [vmem:[%s2244_s1 + $0x28] sm:$0xff]  }
   0x4   :  { %v1596_v3 = vld [vmem:[%s2244_s1 + $0xb8] sm:$0xff]   ;;  %1356 = vmatpush3.bf16.msra.mxu0 %v1595_v2  ;;  %v1600_v7 = vld [vmem:[%s2244_s1 + $0xb0] sm:$0xff]   ;;  %v1604_v11 = vld [vmem:[%s2244_s1 + $0xa8] sm:$0xff]  }
   0x5   :  { %1420 = vmatpush3.bf16.msra.mxu1 %v1596_v3  ;;  %1357 = vmatprep.subr.bf16.mxu0 %v1597_v4  ;;  %v1605_v12 = vld [vmem:[%s2244_s1 + $0x60] sm:$0xff]   ;;  %v1609_v16 = vld [vmem:[%s2244_s1 + $0x58] sm:$0xff]   ;;  %v1613_v20 = vld [vmem:[%s2244_s1 + $0x50] sm:$0xff]  }
   0x6   :  { %1421 = vmatprep.subr.bf16.mxu1 %v1598_v5  ;;  %v1606_v13 = vld [vmem:[%s2244_s1 + $0xe0] sm:$0xff]   ;;  %v1610_v17 = vld [vmem:[%s2244_s1 + $0xd8] sm:$0xff]   ;;  %v1614_v21 = vld [vmem:[%s2244_s1 + $0xd0] sm:$0xff]  }
   0x7   :  { %v1607_v14 = vld [vmem:[%s2244_s1 + $0x20] sm:$0xff]   ;;  %v1611_v18 = vld [vmem:[%s2244_s1 + $0x18] sm:$0xff]   ;;  %v1615_v22 = vld [vmem:[%s2244_s1 + $0x10] sm:$0xff]  }
   0x8   :  { %1358 = vmatpush3.bf16.msra.mxu0 %v1599_v6  ;;  %v1608_v15 = vld [vmem:[%s2244_s1 + $0xa0] sm:$0xff]   ;;  %v1612_v19 = vld [vmem:[%s2244_s1 + $0x98] sm:$0xff]   ;;  %v1616_v23 = vld [vmem:[%s2244_s1 + $0x90] sm:$0xff]  }
   0x9   :  { %1422 = vmatpush3.bf16.msra.mxu1 %v1600_v7  ;;  %1359 = vmatprep.subr.bf16.mxu0 %v1601_v8  ;;  %v1617_v24 = vld [vmem:[%s2244_s1 + $0x48] sm:$0xff]   ;;  %v1621_v28 = vld [vmem:[%s2244_s1 + $0x40] sm:$0xff]   ;;  %v1631_v36 = vld [vmem:[%s2244_s1 + $0x178] sm:$0xff]  }
   0xa   :  { %1423 = vmatprep.subr.bf16.mxu1 %v1602_v9  ;;  %v1618_v25 = vld [vmem:[%s2244_s1 + $0xc8] sm:$0xff]   ;;  %v1622_v29 = vld [vmem:[%s2244_s1 + $0xc0] sm:$0xff]   ;;  %v1632_v37 = vld [vmem:[%s2244_s1 + $0x138] sm:$0xff]  }
   0xb   :  { %v1619_v26 = vld [vmem:[%s2244_s1 + $0x8] sm:$0xff]   ;;  %v1623_v30 = vld [vmem:[%s2244_s1] sm:$0xff]   ;;  %v1633_v38 = vld [vmem:[%s2245_s0 + $0x3c] ss:$28 sps:$4 sm:$0xff]  }
   0xc   :  { %1360 = vmatpush3.bf16.msra.mxu0 %v1603_v10  ;;  %v1620_v27 = vld [vmem:[%s2244_s1 + $0x88] sm:$0xff]   ;;  %v1624_v31 = vld [vmem:[%s2244_s1 + $0x80] sm:$0xff]   ;;  %v1637_v40 = vld [vmem:[%s2245_s0 + $0x38] ss:$28 sps:$4 sm:$0xff]  }
   0xd   :  { %1424 = vmatpush3.bf16.msra.mxu1 %v1604_v11  ;;  %1361 = vmatprep.subr.bf16.mxu0 %v1605_v12  ;;  %v1625_v32 = vld [vmem:[%s2245_s0] ss:$28 sps:$4 sm:$0xff]   ;;  %v1628_v34 = vld [vmem:[%s2245_s0 + $0x8] ss:$28 sps:$4 sm:$0xff]   ;;  %v1639_v42 = vld [vmem:[%s2244_s1 + $0x170] sm:$0xff]  }
   0xe   :  { %1425 = vmatprep.subr.bf16.mxu1 %v1606_v13  ;;  %v1627_v33 = vld [vmem:[%s2245_s0 + $0x4] ss:$28 sps:$4 sm:$0xff]   ;;  %v1630_v35 = vld [vmem:[%s2245_s0 + $0xc] ss:$28 sps:$4 sm:$0xff]   ;;  %v1640_v43 = vld [vmem:[%s2244_s1 + $0x130] sm:$0xff]  }
   0xf   :  { %823 = vmatprep.mubr.bf16.mxu0 %v1627_v33  ;;  %920 = vmatprep.mubr.bf16.mxu1 %v1630_v35  ;;  %v1635_v39 = vld [vmem:[%s2245_s0 + $0x44] ss:$28 sps:$4 sm:$0xff]   ;;  %v1641_v44 = vld [vmem:[%s2245_s0 + $0x74] ss:$28 sps:$4 sm:$0xff]   ;;  %v1643_v45 = vld [vmem:[%s2245_s0 + $0x7c] ss:$28 sps:$4 sm:$0xff]  }
  0x10   :  { %1362 = vmatpush3.bf16.msra.mxu0 %v1607_v14  ;;  %v1638_v41 = vld [vmem:[%s2245_s0 + $0x40] ss:$28 sps:$4 sm:$0xff]   ;;  %v1647_v46 = vld [vmem:[%s2244_s1 + $0x168] sm:$0xff]   ;;  %v1646_v49 = vld [vmem:[%s2245_s0 + $0x78] ss:$28 sps:$4 sm:$0xff]  }
  0x11   :  { %1426 = vmatpush3.bf16.msra.mxu1 %v1608_v15  ;;  %1363 = vmatprep.subr.bf16.mxu0 %v1609_v16  ;;  %v1648_v47 = vld [vmem:[%s2244_s1 + $0x128] sm:$0xff]   ;;  %v1651_v51 = vld [vmem:[%s2245_s0 + $0xb4] ss:$28 sps:$4 sm:$0xff]   ;;  %v1655_v52 = vld [vmem:[%s2244_s1 + $0x160] sm:$0xff]  }
  0x12   :  { %1427 = vmatprep.subr.bf16.mxu1 %v1610_v17  ;;  %v1645_v48 = vld [vmem:[%s2245_s0 + $0x70] ss:$28 sps:$4 sm:$0xff]   ;;  %v1656_v53 = vld [vmem:[%s2244_s1 + $0x120] sm:$0xff]   ;;  %v1663_v54 = vld [vmem:[%s2244_s1 + $0x158] sm:$0xff]  }
  0x13   :  { %v1649_v50 = vld [vmem:[%s2245_s0 + $0xac] ss:$28 sps:$4 sm:$0xff]   ;;  %v1664_v55 = vld [vmem:[%s2244_s1 + $0x118] sm:$0xff]   ;;  %v1657_v58 = vld [vmem:[%s2245_s0 + $0xe4] ss:$28 sps:$4 sm:$0xff]  }
  0x14   :  { %1364 = vmatpush3.bf16.msra.mxu0 %v1611_v18  ;;  %v1653_v56 = vld [vmem:[%s2245_s0 + $0xa8] ss:$28 sps:$4 sm:$0xff]   ;;  %v1654_v57 = vld [vmem:[%s2245_s0 + $0xb0] ss:$28 sps:$4 sm:$0xff]   ;;  %v1661_v62 = vld [vmem:[%s2245_s0 + $0xe0] ss:$28 sps:$4 sm:$0xff]  }
  0x15   :  { %1428 = vmatpush3.bf16.msra.mxu1 %v1612_v19  ;;  %1365 = vmatprep.subr.bf16.mxu0 %v1613_v20  ;;  %v1659_v59 = vld [vmem:[%s2245_s0 + $0xec] ss:$28 sps:$4 sm:$0xff]   ;;  %v1671_v60 = vld [vmem:[%s2244_s1 + $0x150] sm:$0xff]   ;;  %v1665_v2 = vld [vmem:[%s2245_s0 + $0x11c] ss:$28 sps:$4 sm:$0xff]  }
  0x16   :  { %1429 = vmatprep.subr.bf16.mxu1 %v1614_v21  ;;  %v1672_v61 = vld [vmem:[%s2244_s1 + $0x110] sm:$0xff]   ;;  %v1662_v63 = vld [vmem:[%s2245_s0 + $0xe8] ss:$28 sps:$4 sm:$0xff]   ;;  %v1670_v7 = vld [vmem:[%s2245_s0 + $0x120] ss:$28 sps:$4 sm:$0xff]  }
  0x17   :  { %v1679_v0 = vld [vmem:[%s2244_s1 + $0x148] sm:$0xff]   ;;  %v1667_v3 = vld [vmem:[%s2245_s0 + $0x124] ss:$28 sps:$4 sm:$0xff]   ;;  %v1669_v6 = vld [vmem:[%s2245_s0 + $0x118] ss:$28 sps:$4 sm:$0xff]  }
  0x18   :  { %1366 = vmatpush3.bf16.msra.mxu0 %v1615_v22  ;;  %v1680_v1 = vld [vmem:[%s2244_s1 + $0x108] sm:$0xff]   ;;  %v1687_v4 = vld [vmem:[%s2244_s1 + $0x140] sm:$0xff]   ;;  %v1673_v9 = vld [vmem:[%s2245_s0 + $0x154] ss:$28 sps:$4 sm:$0xff]  }
  0x19   :  { %1430 = vmatpush3.bf16.msra.mxu1 %v1616_v23  ;;  %1367 = vmatprep.subr.bf16.mxu0 %v1617_v24  ;;  %v1688_v5 = vld [vmem:[%s2244_s1 + $0x100] sm:$0xff]   ;;  %v1695_v8 = vld [vmem:[%s2244_s1 + $0x188] sm:$0xff]   ;;  %v1675_v10 = vld [vmem:[%s2245_s0 + $0x15c] ss:$28 sps:$4 sm:$0xff]  }
  0x1a   :  { %1431 = vmatprep.subr.bf16.mxu1 %v1618_v25  ;;  %v1677_v11 = vld [vmem:[%s2245_s0 + $0x150] ss:$28 sps:$4 sm:$0xff]   ;;  %v1678_v12 = vld [vmem:[%s2245_s0 + $0x158] ss:$28 sps:$4 sm:$0xff]   ;;  %v1685_v15 = vld [vmem:[%s2245_s0 + $0x188] ss:$28 sps:$4 sm:$0xff]  }
  0x1b   :  { %v1681_v13 = vld [vmem:[%s2245_s0 + $0x18c] ss:$28 sps:$4 sm:$0xff]   ;;  %v1683_v14 = vld [vmem:[%s2245_s0 + $0x194] ss:$28 sps:$4 sm:$0xff]   ;;  %v1694_v18 = vld [vmem:[%s2245_s0 + $0x164] ss:$28 sps:$4 sm:$0xff]  }
  0x1c   :  { %1368 = vmatpush3.bf16.msra.mxu0 %v1619_v26  ;;  %v1686_v16 = vld [vmem:[%s2245_s0 + $0x190] ss:$28 sps:$4 sm:$0xff]   ;;  %v1692_v20 = vld [vmem:[%s2245_s0 + $0x160] ss:$28 sps:$4 sm:$0xff]   ;;  %v1700_v24 = vld [vmem:[%s2245_s0 + $0x48] ss:$28 sps:$4 sm:$0xff]  }
  0x1d   :  { %1432 = vmatpush3.bf16.msra.mxu1 %v1620_v27  ;;  %1369 = vmatprep.subr.bf16.mxu0 %v1621_v28  ;;  %v1691_v17 = vld [vmem:[%s2245_s0 + $0x14] ss:$28 sps:$4 sm:$0xff]   ;;  %v1696_v21 = vld [vmem:[%s2245_s0 + $0x4c] ss:$28 sps:$4 sm:$0xff]   ;;  %v1698_v22 = vld [vmem:[%s2245_s0 + $0x19c] ss:$28 sps:$4 sm:$0xff]  }
  0x1e   :  { %1433 = vmatprep.subr.bf16.mxu1 %v1622_v29  ;;  %v1689_v19 = vld [vmem:[%s2245_s0 + $0x10] ss:$28 sps:$4 sm:$0xff]   ;;  %v1702_v23 = vld [vmem:[%s2244_s1 + $0x180] sm:$0xff]   ;;  %v1701_v25 = vld [vmem:[%s2245_s0 + $0x198] ss:$28 sps:$4 sm:$0xff]  }
  0x1f   :  { %v1703_v26 = vld [vmem:[%s2245_s0 + $0x84] ss:$28 sps:$4 sm:$0xff]   ;;  %v1705_v27 = vld [vmem:[%s2245_s0 + $0x18] ss:$28 sps:$4 sm:$0xff]   ;;  %v1707_v29 = vld [vmem:[%s2245_s0 + $0x50] ss:$28 sps:$4 sm:$0xff]  }
  0x20   :  { %1370 = vmatpush3.bf16.msra.mxu0 %v1623_v30  ;;  %v1706_v28 = vld [vmem:[%s2245_s0 + $0x80] ss:$28 sps:$4 sm:$0xff]   ;;  %v1715_v35 = vld [vmem:[%s2245_s0 + $0xf8] ss:$28 sps:$4 sm:$0xff]  }
  0x21   :  { %1434 = vmatpush3.bf16.msra.mxu1 %v1624_v31  ;;  %1483 = vmatprep.subr.bf16.mxu0 %v1631_v36  ;;  %v1708_v30 = vld [vmem:[%s2245_s0 + $0xbc] ss:$28 sps:$4 sm:$0xff]   ;;  %v1710_v31 = vld [vmem:[%s2245_s0 + $0x88] ss:$28 sps:$4 sm:$0xff]  }
  0x22   :  { %1577 = vmatprep.subr.bf16.mxu1 %v1631_v36  ;;  %v1712_v33 = vld [vmem:[%s2245_s0 + $0xc0] ss:$28 sps:$4 sm:$0xff]   ;;  %v1716_v36 = vld [vmem:[%s2245_s0 + $0xf0] ss:$28 sps:$4 sm:$0xff]  }
  0x23   :  { %824 = vmatmul.mubr.bf16.vlgmr.msra.gmra.mxu0 %v1625_v32  ;;  %v1711_v32 = vld [vmem:[%s2245_s0 + $0xb8] ss:$28 sps:$4 sm:$0xff]  }
  0x24   :  { %921 = vmatmul.mubr.bf16.vlgmr.msra.gmra.mxu1 %v1628_v34  ;;  %1484 = vmatpush3.bf16.msra.mxu0 %v1632_v37  ;;  %v1713_v34 = vld [vmem:[%s2245_s0 + $0xf4] ss:$28 sps:$4 sm:$0xff]  }
  0x25   :  { %1585 = vmatpush3.bf16.msra.mxu1 %v1632_v37  ;;  %831 = vmatprep.mubr.bf16.mxu0 %v1633_v38  ;;  %v1717_v37 = vld [vmem:[%s2245_s0 + $0x130] ss:$28 sps:$4 sm:$0xff]  }
  0x26   :  { %928 = vmatprep.mubr.bf16.mxu1 %v1635_v39  ;;  %1485 = vmatprep.subr.bf16.mxu0 %v1639_v42  ;;  %v1718_v38 = vld [vmem:[%s2245_s0 + $0x12c] ss:$28 sps:$4 sm:$0xff]  }
  0x27   :  { %1578 = vmatprep.subr.bf16.mxu1 %v1639_v42  ;;  %v1720_v39 = vld [vmem:[%s2245_s0 + $0x168] ss:$28 sps:$4 sm:$0xff]  }
  0x28   :  { %1486 = vmatpush3.bf16.msra.mxu0 %v1640_v43 }
  0x29   :  { %1586 = vmatpush3.bf16.msra.mxu1 %v1640_v43  ;;  %1487 = vmatprep.subr.bf16.mxu0 %v1647_v46 }
  0x2a   :  { %1579 = vmatprep.subr.bf16.mxu1 %v1647_v46 }
  0x2b   :  { %832 = vmatmul.mubr.bf16.gmra.mxu0 %v1637_v40  ;;  %v1721_v40 = vld [vmem:[%s2245_s0 + $0x128] ss:$28 sps:$4 sm:$0xff]  }
  0x2c   :  { %929 = vmatmul.mubr.bf16.gmra.mxu1 %v1638_v41  ;;  %839 = vmatprep.mubr.bf16.mxu0 %v1641_v44  ;;  %v1722_v41 = vld [vmem:[%s2245_s0 + $0x1a0] ss:$28 sps:$4 sm:$0xff]  }
  0x2d   :  { %936 = vmatprep.mubr.bf16.mxu1 %v1643_v45  ;;  %1488 = vmatpush3.bf16.msra.mxu0 %v1648_v47  ;;  %v2072_v44 = vld [vmem:[%s2246_s2] ss:$0 sm:$0xff] }
  0x2e   :  { %1587 = vmatpush3.bf16.msra.mxu1 %v1648_v47  ;;  %1489 = vmatprep.subr.bf16.mxu0 %v1655_v52 }
  0x2f   :  { %1580 = vmatprep.subr.bf16.mxu1 %v1655_v52 }
  0x31   :  { %1490 = vmatpush3.bf16.msra.mxu0 %v1656_v53 }
  0x32   :  { %1588 = vmatpush3.bf16.msra.mxu1 %v1656_v53  ;;  %1491 = vmatprep.subr.bf16.mxu0 %v1663_v54 }
  0x33   :  { %840 = vmatmul.mubr.bf16.gmra.mxu0 %v1645_v48  ;;  %1581 = vmatprep.subr.bf16.mxu1 %v1663_v54 }
  0x34   :  { %937 = vmatmul.mubr.bf16.gmra.mxu1 %v1646_v49  ;;  %847 = vmatprep.mubr.bf16.mxu0 %v1649_v50 }
  0x35   :  { %944 = vmatprep.mubr.bf16.mxu1 %v1651_v51  ;;  %1492 = vmatpush3.bf16.msra.mxu0 %v1664_v55 }
  0x36   :  { %1589 = vmatpush3.bf16.msra.mxu1 %v1664_v55  ;;  %1493 = vmatprep.subr.bf16.mxu0 %v1671_v60 }
  0x37   :  { %1582 = vmatprep.subr.bf16.mxu1 %v1671_v60 }
  0x39   :  { %1494 = vmatpush3.bf16.msra.mxu0 %v1672_v61 }
  0x3a   :  { %1590 = vmatpush3.bf16.msra.mxu1 %v1672_v61  ;;  %1495 = vmatprep.subr.bf16.mxu0 %v1679_v0 }
  0x3b   :  { %848 = vmatmul.mubr.bf16.gmra.mxu0 %v1653_v56  ;;  %1583 = vmatprep.subr.bf16.mxu1 %v1679_v0 }
  0x3c   :  { %945 = vmatmul.mubr.bf16.gmra.mxu1 %v1654_v57  ;;  %855 = vmatprep.mubr.bf16.mxu0 %v1657_v58 }
  0x3d   :  { %952 = vmatprep.mubr.bf16.mxu1 %v1659_v59  ;;  %1496 = vmatpush3.bf16.msra.mxu0 %v1680_v1 }
  0x3e   :  { %1591 = vmatpush3.bf16.msra.mxu1 %v1680_v1  ;;  %1497 = vmatprep.subr.bf16.mxu0 %v1687_v4 }
  0x3f   :  { %1584 = vmatprep.subr.bf16.mxu1 %v1687_v4 }
  0x41   :  { %1498 = vmatpush3.bf16.msra.mxu0 %v1688_v5 }
  0x42   :  { %1592 = vmatpush3.bf16.msra.mxu1 %v1688_v5 }
  0x43   :  { %856 = vmatmul.mubr.bf16.gmra.mxu0 %v1661_v62  ;;  %1557 = vmatprep.subr.bf16.mxu1 %v1695_v8 }
  0x44   :  { %953 = vmatmul.mubr.bf16.gmra.mxu1 %v1662_v63  ;;  %863 = vmatprep.mubr.bf16.mxu0 %v1665_v2 }
  0x45   :  { %960 = vmatprep.mubr.bf16.mxu1 %v1667_v3 }
  0x4b   :  { %864 = vmatmul.mubr.bf16.gmra.mxu0 %v1669_v6 }
  0x4c   :  { %961 = vmatmul.mubr.bf16.gmra.mxu1 %v1670_v7  ;;  %871 = vmatprep.mubr.bf16.mxu0 %v1673_v9 }
  0x4d   :  { %968 = vmatprep.mubr.bf16.mxu1 %v1675_v10 }
  0x53   :  { %872 = vmatmul.mubr.bf16.gmra.mxu0 %v1677_v11 }
  0x54   :  { %969 = vmatmul.mubr.bf16.gmra.mxu1 %v1678_v12  ;;  %879 = vmatprep.mubr.bf16.mxu0 %v1681_v13 }
  0x55   :  { %976 = vmatprep.mubr.bf16.mxu1 %v1683_v14 }
  0x5b   :  { %880 = vmatmul.mubr.bf16.gmra.mxu0 %v1685_v15 }
  0x5c   :  { %977 = vmatmul.mubr.bf16.gmra.mxu1 %v1686_v16  ;;  %1017 = vmatprep.mubr.bf16.mxu0 %v1691_v17 }
  0x5d   :  { %1065 = vmatprep.mubr.bf16.mxu1 %v1694_v18 }
  0x63   :  { %1018 = vmatmul.mubr.bf16.vlgmr.msra.gmra.mxu0 %v1689_v19 }
  0x64   :  { %1066 = vmatmul.mubr.bf16.vlgmr.msra.gmra.mxu1 %v1692_v20  ;;  %1025 = vmatprep.mubr.bf16.mxu0 %v1696_v21 }
  0x65   :  { %1558 = vmatpush3.bf16.msra.mxu1 %v1695_v8  ;;  %1073 = vmatprep.mubr.bf16.mxu1 %v1698_v22 }
  0x66   :  { %1559 = vmatprep.subr.bf16.mxu1 %v1702_v23 }
  0x69   :  { %1560 = vmatpush3.bf16.msra.mxu1 %v1702_v23 }
  0x6b   :  { %1026 = vmatmul.mubr.bf16.gmra.mxu0 %v1700_v24 }
  0x6c   :  { %1074 = vmatmul.mubr.bf16.gmra.mxu1 %v1701_v25  ;;  %1033 = vmatprep.mubr.bf16.mxu0 %v1703_v26 }
  0x6d   :  { %1561 = vmatprep.mubr.msk.bf16.mxu1 %vm766_vm0, %v1705_v27 }
  0x73   :  { %1034 = vmatmul.mubr.bf16.gmra.mxu0 %v1706_v28 }
  0x74   :  { %1562 = vmatmul.mubr.msk.bf16.vlgmr.msra.gmra.mxu1 %vm766_vm0, %v1707_v29  ;;  %1041 = vmatprep.mubr.bf16.mxu0 %v1708_v30 }
  0x75   :  { %1565 = vmatprep.mubr.msk.bf16.mxu1 %vm766_vm0, %v1710_v31 }
  0x7b   :  { %1042 = vmatmul.mubr.bf16.gmra.mxu0 %v1711_v32 }
  0x7c   :  { %1566 = vmatmul.mubr.msk.bf16.gmra.mxu1 %vm766_vm0, %v1712_v33  ;;  %1049 = vmatprep.mubr.bf16.mxu0 %v1713_v34 }
  0x7d   :  { %1569 = vmatprep.mubr.msk.bf16.mxu1 %vm766_vm0, %v1715_v35 }
  0x83   :  { %1050 = vmatmul.mubr.bf16.gmra.mxu0 %v1716_v36 }
  0x84   :  { %1570 = vmatmul.mubr.msk.bf16.gmra.mxu1 %vm766_vm0, %v1717_v37  ;;  %1057 = vmatprep.mubr.bf16.mxu0 %v1718_v38 }
  0x85   :  { %1573 = vmatprep.mubr.msk.bf16.mxu1 %vm766_vm0, %v1720_v39 }
  0x8b   :  { %1058 = vmatmul.mubr.bf16.gmra.mxu0 %v1721_v40 }
  0x8c   :  { %1574 = vmatmul.mubr.msk.bf16.gmra.mxu1 %vm766_vm0, %v1722_v41 }
  0xe3   :  { %v1371_v42 = vpop.f32.mrf.mxu0 }
  0xe4   :  { %v1435_v43 = vpop.f32.mrf.mxu1 }
  0xe5   :  { %v1372_v45 = vpop.f32.mrf.mxu0 }
  0xe6   :  { %v1373_v46 = vadd.f32 %v1372_v45, %v1371_v42  ;;  %v1436_v47 = vpop.f32.mrf.mxu1 }
  0xe7   :  { %v1437_v48 = vadd.f32 %v1436_v47, %v1435_v43  ;;  %v1374_v49 = vpop.f32.mrf.mxu0 }
  0xe8   :  { %v826_v50 = vadd.f32 %v1373_v46, %v2072_v44  ;;  %v1438_v51 = vpop.f32.mrf.mxu1 }
  0xe9   :  { %v1375_v52 = vpop.f32.mrf.mxu0 }
  0xea   :  { %v2075_v53 = vadd.f32 %v1437_v48, %v826_v50  ;;  %v1376_v54 = vadd.f32 %v1375_v52, %v1374_v49  ;;  %v1439_v55 = vpop.f32.mrf.mxu1 }
  0xeb   :  { %v1440_v56 = vadd.f32 %v1439_v55, %v1438_v51  ;;  %v1377_v57 = vpop.f32.mrf.mxu0 }
  0xec   :  { %v829_v58 = vadd.f32 %v1376_v54, %v2072_v44  ;;  %v1441_v59 = vpop.f32.mrf.mxu1 }
  0xed   :  { %v1378_v60 = vpop.f32.mrf.mxu0 }
  0xee   :  { %v2078_v61 = vadd.f32 %v1440_v56, %v829_v58  ;;  %v1379_v62 = vadd.f32 %v1378_v60, %v1377_v57  ;;  %v1442_v63 = vpop.f32.mrf.mxu1 }
  0xef   :  { %v1443_v0 = vadd.f32 %v1442_v63, %v1441_v59  ;;  %v1380_v1 = vpop.f32.mrf.mxu0 }
  0xf0   :  { %v834_v2 = vadd.f32 %v1379_v62, %v2072_v44  ;;  %v1444_v3 = vpop.f32.mrf.mxu1 }
  0xf1   :  { %v1381_v4 = vpop.f32.mrf.mxu0 }
  0xf2   :  { %v2081_v5 = vadd.f32 %v1443_v0, %v834_v2  ;;  %v1382_v6 = vadd.f32 %v1381_v4, %v1380_v1  ;;  %v1445_v7 = vpop.f32.mrf.mxu1 }
  0xf3   :  { %v1446_v8 = vadd.f32 %v1445_v7, %v1444_v3  ;;  %v1383_v9 = vpop.f32.mrf.mxu0 }
  0xf4   :  { %v837_v10 = vadd.f32 %v1382_v6, %v2072_v44  ;;  %v1447_v11 = vpop.f32.mrf.mxu1 }
  0xf5   :  { %v1384_v12 = vpop.f32.mrf.mxu0 }
  0xf6   :  { %v2084_v13 = vadd.f32 %v1446_v8, %v837_v10  ;;  %v1385_v14 = vadd.f32 %v1384_v12, %v1383_v9  ;;  %v1448_v15 = vpop.f32.mrf.mxu1 }
  0xf7   :  { %v1449_v16 = vadd.f32 %v1448_v15, %v1447_v11  ;;  %v1386_v17 = vpop.f32.mrf.mxu0 }
  0xf8   :  { %v842_v18 = vadd.f32 %v1385_v14, %v2072_v44  ;;  %v1450_v19 = vpop.f32.mrf.mxu1 }
  0xf9   :  { %v1387_v20 = vpop.f32.mrf.mxu0 }
  0xfa   :  { %v2087_v21 = vadd.f32 %v1449_v16, %v842_v18  ;;  %v1388_v22 = vadd.f32 %v1387_v20, %v1386_v17  ;;  %v1451_v23 = vpop.f32.mrf.mxu1 }
  0xfb   :  { %v1452_v24 = vadd.f32 %v1451_v23, %v1450_v19  ;;  %v1389_v25 = vpop.f32.mrf.mxu0 }
  0xfc   :  { %v845_v26 = vadd.f32 %v1388_v22, %v2072_v44  ;;  %v1453_v27 = vpop.f32.mrf.mxu1 }
  0xfd   :  { %v1390_v28 = vpop.f32.mrf.mxu0 }
  0xfe   :  { %v2090_v29 = vadd.f32 %v1452_v24, %v845_v26  ;;  %v1391_v30 = vadd.f32 %v1390_v28, %v1389_v25  ;;  %v1454_v31 = vpop.f32.mrf.mxu1 }
  0xff   :  { %v1455_v32 = vadd.f32 %v1454_v31, %v1453_v27  ;;  %v1392_v33 = vpop.f32.mrf.mxu0 }
 0x100   :  { %v850_v34 = vadd.f32 %v1391_v30, %v2072_v44  ;;  %v1456_v35 = vpop.f32.mrf.mxu1 }
 0x101   :  { %v1393_v36 = vpop.f32.mrf.mxu0 }
 0x102   :  { %v2093_v37 = vadd.f32 %v1455_v32, %v850_v34  ;;  %v1394_v38 = vadd.f32 %v1393_v36, %v1392_v33  ;;  %v1457_v39 = vpop.f32.mrf.mxu1 }
 0x103   :  { %v1458_v40 = vadd.f32 %v1457_v39, %v1456_v35  ;;  %v1395_v41 = vpop.f32.mrf.mxu0 }
 0x104   :  { %v853_v42 = vadd.f32 %v1394_v38, %v2072_v44  ;;  %v1459_v43 = vpop.f32.mrf.mxu1 }
 0x105   :  { %v1396_v45 = vpop.f32.mrf.mxu0 }
 0x106   :  { %v2096_v46 = vadd.f32 %v1458_v40, %v853_v42  ;;  %v1397_v47 = vadd.f32 %v1396_v45, %v1395_v41  ;;  %v1460_v48 = vpop.f32.mrf.mxu1 }
 0x107   :  { %v1461_v49 = vadd.f32 %v1460_v48, %v1459_v43  ;;  %v1398_v50 = vpop.f32.mrf.mxu0 }
 0x108   :  { %v858_v51 = vadd.f32 %v1397_v47, %v2072_v44  ;;  %v1462_v52 = vpop.f32.mrf.mxu1 }
 0x109   :  { %v1399_v54 = vpop.f32.mrf.mxu0 }
 0x10a   :  { %v2099_v55 = vadd.f32 %v1461_v49, %v858_v51  ;;  %v1400_v56 = vadd.f32 %v1399_v54, %v1398_v50  ;;  %v1463_v57 = vpop.f32.mrf.mxu1 }
 0x10b   :  { %v1464_v58 = vadd.f32 %v1463_v57, %v1462_v52  ;;  %v2101_v59 = vpop.f32.mrf.mxu0 }
 0x10c   :  { %v861_v60 = vadd.f32 %v1400_v56, %v2072_v44  ;;  %v2104_v62 = vpop.f32.mrf.mxu1 }
 0x10d   :  { %v2106_v63 = vpop.f32.mrf.mxu0 }
 0x10e   :  { %v2108_v0 = vadd.f32 %v1464_v58, %v861_v60  ;;  %v2110_v1 = vpop.f32.mrf.mxu1 }
 0x10f   :  { %v2112_v2 = vpop.f32.mrf.mxu0 }
 0x110   :  { %2248 = vst [vmem:[#allocation2_spill] sm:$0xff] %v2108_v0  ;;  %v2114_v3 = vpop.f32.mrf.mxu1 }
 0x111   :  { %2249 = vst [vmem:[#allocation3_spill] sm:$0xff] %v2114_v3  ;;  %v2116_v4 = vpop.f32.mrf.mxu0 }
 0x112   :  { %v2118_v6 = vpop.f32.mrf.mxu1 }
 0x113   :  { %2250 = vst [vmem:[#allocation4_spill] sm:$0xff] %v2118_v6  ;;  %v2120_v7 = vpop.f32.mrf.mxu0 }
 0x114   :  { %v2122_v8 = vpop.f32.mrf.mxu1 }
 0x115   :  { %v2124_v9 = vpop.f32.mrf.mxu0 }
 0x116   :  { %v2126_v10 = vpop.f32.mrf.mxu1 }
 0x117   :  { %v2128_v11 = vpop.f32.mrf.mxu0 }
 0x118   :  { %v2130_v12 = vpop.f32.mrf.mxu1 }
 0x119   :  { %v2132_v14 = vpop.f32.mrf.mxu0 }
 0x11a   :  { %v2134_v15 = vpop.f32.mrf.mxu1 }
 0x11b   :  { %v2136_v16 = vpop.f32.mrf.mxu0 }
 0x11c   :  { %v2138_v17 = vpop.f32.mrf.mxu1 }
 0x11d   :  { %v2140_v18 = vpop.f32.mrf.mxu0 }
 0x11e   :  { %v2142_v19 = vpop.f32.mrf.mxu1 }
 0x11f   :  { %v2144_v20 = vpop.f32.mrf.mxu0 }
 0x120   :  { %v2146_v22 = vpop.f32.mrf.mxu1 }
 0x121   :  { %2251 = vst [vmem:[#allocation5_spill] sm:$0xff] %v2146_v22  ;;  %v2148_v23 = vpop.f32.mrf.mxu0 }
 0x122   :  { %v2150_v24 = vpop.f32.mrf.mxu1 }
 0x123   :  { %2252 = vst [vmem:[#allocation6_spill] sm:$0xff] %v2150_v24  ;;  %v1499_v25 = vpop.f32.mrf.mxu0 }
 0x124   :  { %v2152_v26 = vpop.f32.mrf.mxu1 }
 0x125   :  { %v1500_v27 = vpop.f32.mrf.mxu0 }
 0x126   :  { %v2154_v28 = vpop.f32.mrf.mxu1  ;;  %v1501_v49 = vadd.f32 %v1500_v27, %v1499_v25 }
 0x127   :  { %v1502_v30 = vpop.f32.mrf.mxu0 }
 0x128   :  { %v2156_v31 = vpop.f32.mrf.mxu1  ;;  %v1020_v60 = vadd.f32 %v1501_v49, %v2075_v53 }
 0x129   :  { %v1503_v32 = vpop.f32.mrf.mxu0 }
 0x12a   :  { %v2158_v33 = vpop.f32.mrf.mxu1  ;;  %v1504_v58 = vadd.f32 %v1503_v32, %v1502_v30  ;;  %v1403_v30 = vadd.f32 %v2106_v63, %v2101_v59  ;;  %v1409_v59 = vadd.f32 %v2124_v9, %v2120_v7 }
 0x12b   :  { %2253 = vst [vmem:[#allocation7_spill] sm:$0xff] %v2158_v33  ;;  %v1505_v34 = vpop.f32.mrf.mxu0 }
 0x12c   :  { %v2160_v35 = vpop.f32.mrf.mxu1 }
 0x12d   :  { %v1506_v36 = vpop.f32.mrf.mxu0 }
 0x12e   :  { %v2162_v38 = vpop.f32.mrf.mxu1  ;;  %v1507_v56 = vadd.f32 %v1506_v36, %v1505_v34 }
 0x12f   :  { %v1508_v39 = vpop.f32.mrf.mxu0 }
 0x130   :  { %v2164_v40 = vpop.f32.mrf.mxu1  ;;  %v1028_v33 = vadd.f32 %v1507_v56, %v2081_v5  ;;  %v1467_v5 = vadd.f32 %v2110_v1, %v2104_v62  ;;  %v1479_v56 = vadd.f32 %v2142_v19, %v2138_v17 }
 0x131   :  { %2254 = vst [vmem:[#allocation8_spill] sm:$0xff] %v2164_v40  ;;  %v1509_v41 = vpop.f32.mrf.mxu0 }
 0x132   :  { %v2166_v42 = vpop.f32.mrf.mxu1  ;;  %v1510_v0 = vadd.f32 %v1509_v41, %v1508_v39 }
 0x133   :  { %2255 = vst [vmem:[#allocation9_spill] sm:$0xff] %v2166_v42  ;;  %v1511_v43 = vpop.f32.mrf.mxu0 }
 0x134   :  { %v1563_v45 = vpop.f32.mrf.mxu1 }
 0x135   :  { %v1512_v47 = vpop.f32.mrf.mxu0  ;;  %v1125_v53 = vadd.f32 %v1563_v45, %v1028_v33 }
 0x136   :  { %v1116_v48 = vpop.f32.mrf.mxu1  ;;  %v1513_v52 = vadd.f32 %v1512_v47, %v1511_v43  ;;  %v1023_v43 = vadd.f32 %v1504_v58, %v2078_v61  ;;  %v1031_v61 = vadd.f32 %v1510_v0, %v2084_v13  ;;  %v866_v13 = vadd.f32 %v1403_v30, %v2072_v44 }
 0x137   :  { %v1514_v50 = vpop.f32.mrf.mxu0  ;;  %v1117_v40 = vadd.f32 %v1116_v48, %v1020_v60  ;;  %v1406_v0 = vadd.f32 %v2116_v4, %v2112_v2 }
 0x138   :  { %v1564_v51 = vpop.f32.mrf.mxu1  ;;  %v1036_v42 = vadd.f32 %v1513_v52, %v2087_v21 }
 0x139   :  { %v1515_v54 = vpop.f32.mrf.mxu0  ;;  %v1179_v48 = vmax.f32 %v1117_v40, 0.0  ;;  %v869_v30 = vadd.f32 %v1406_v0, %v2072_v44 }
 0x13a   :  { %v1119_v57 = vpop.f32.mrf.mxu1  ;;  %v1516_v24 = vadd.f32 %v1515_v54, %v1514_v50  ;;  %v874_v54 = vadd.f32 %v1409_v59, %v2072_v44 }
 0x13b   :  { %v1517_v6 = vpop.f32.mrf.mxu0  ;;  %v1120_v49 = vadd.f32 %v1119_v57, %v1023_v43 }
 0x13c   :  { %v1567_v3 = vpop.f32.mrf.mxu1  ;;  %v1039_v39 = vadd.f32 %v1516_v24, %v2090_v29  ;;  %v1128_v29 = vadd.f32 %v1564_v51, %v1031_v61  ;;  %v2260_v61 = vld [vmem:[#allocation8_spill] sm:$0xff] }
 0x13d   :  { %v1518_v22 = vpop.f32.mrf.mxu0 }
 0x13e   :  { %v1519_v25 = vadd.f32 %v1518_v22, %v1517_v6  ;;  %v1132_v27 = vpop.f32.mrf.mxu1 }
 0x13f   :  { %v1133_v47 = vadd.f32 %v1132_v27, %v1036_v42  ;;  %v1520_v34 = vpop.f32.mrf.mxu0  ;;  %v1181_v42 = vmax.f32 %v1125_v53, 0.0 }
 0x140   :  { %v1044_v32 = vadd.f32 %v1519_v25, %v2093_v37  ;;  %v1568_v36 = vpop.f32.mrf.mxu1  ;;  %v1415_v37 = vadd.f32 %v2140_v18, %v2136_v16  ;;  %v1473_v16 = vadd.f32 %v2126_v10, %v2122_v8  ;;  %v1418_v8 = vadd.f32 %v2148_v23, %v2144_v20 }
 0x141   :  { %v1183_v50 = vmax.f32 %v1133_v47, 0.0  ;;  %v1521_v21 = vpop.f32.mrf.mxu0  ;;  %v1182_v10 = vmax.f32 %v1128_v29, 0.0  ;;  %v1537_v25 = vadd.f32 %v2154_v28, %v2152_v26  ;;  %v963_v47 = vadd.f32 %v1467_v5, %v866_v13 }
 0x142   :  { %v1141_v6 = vadd.f32 %v1567_v3, %v1044_v32  ;;  %v1522_v22 = vadd.f32 %v1521_v21, %v1520_v34  ;;  %v1135_v41 = vpop.f32.mrf.mxu1  ;;  %v1180_v3 = vmax.f32 %v1120_v49, 0.0  ;;  %v882_v57 = vadd.f32 %v1415_v37, %v2072_v44  ;;  %v2258_v21 = vld [vmem:[#allocation5_spill] sm:$0xff] }
 0x143   :  { %v2183_v63 = vmax.f32 %v1179_v48, %v1183_v50  ;;  %v1136_v33 = vadd.f32 %v1135_v41, %v1039_v39  ;;  %v1523_v40 = vpop.f32.mrf.mxu0  ;;  %v971_v34 = vadd.f32 %v1473_v16, %v874_v54  ;;  %v1476_v26 = vadd.f32 %v2134_v15, %v2130_v12  ;;  %v2259_v39 = vld [vmem:[#allocation6_spill] sm:$0xff] }
 0x144   :  { %v1185_v24 = vmax.f32 %v1141_v6, 0.0  ;;  %v1047_v62 = vadd.f32 %v1522_v22, %v2096_v46  ;;  %v1571_v1 = vpop.f32.mrf.mxu1  ;;  %v1412_v46 = vadd.f32 %v2132_v14, %v2128_v11  ;;  %v1543_v14 = vadd.f32 %v2162_v38, %v2160_v35  ;;  %v2256_v35 = vld [vmem:[#allocation7_spill] sm:$0xff]  ;;  %v2261_v6 = vld [vmem:[#allocation9_spill] sm:$0xff] }
 0x145   :  { %v1184_v7 = vmax.f32 %v1136_v33, 0.0  ;;  %v1524_v9 = vpop.f32.mrf.mxu0  ;;  %v979_v28 = vadd.f32 %v1479_v56, %v882_v57  ;;  %v1540_v38 = vadd.f32 %v2256_v35, %v2156_v31  ;;  %v1068_v50 = vadd.f32 %v1537_v25, %v971_v34  ;;  %v2262_v33 = vld [vmem:[#allocation3_spill] sm:$0xff] }
 0x146   :  { %v2191_v18 = vmax.f32 %v1181_v42, %v1185_v24  ;;  %v1144_v45 = vadd.f32 %v1568_v36, %v1047_v62  ;;  %v1525_v52 = vadd.f32 %v1524_v9, %v1523_v40  ;;  %v1148_v51 = vpop.f32.mrf.mxu1  ;;  %v877_v20 = vadd.f32 %v1412_v46, %v2072_v44  ;;  %v2257_v36 = vld [vmem:[#allocation2_spill] sm:$0xff]  ;;  %v2263_v40 = vld [vmem:[#allocation4_spill] sm:$0xff] }
 0x147   :  { %v2198_v2 = vmax.f32 %v1180_v3, %v1184_v7  ;;  %v1526_v4 = vpop.f32.mrf.mxu0  ;;  %v1482_v5 = vadd.f32 %v2259_v39, %v2258_v21  ;;  %v1546_v22 = vadd.f32 %v2261_v6, %v2260_v61  ;;  %v1076_v41 = vadd.f32 %v1543_v14, %v979_v28 }
 0x148   :  { %v1186_v58 = vmax.f32 %v1144_v45, 0.0  ;;  %v1572_v60 = vpop.f32.mrf.mxu1  ;;  %v1052_v27 = vadd.f32 %v1525_v52, %v2099_v55  ;;  %v885_v55 = vadd.f32 %v1418_v8, %v2072_v44  ;;  %v974_v59 = vadd.f32 %v1476_v26, %v877_v20 }
 0x149   :  { %v1527_v11 = vpop.f32.mrf.mxu0  ;;  %v1470_v31 = vadd.f32 %v2263_v40, %v2262_v33 }
 0x14a   :  { %v2208_v17 = vmax.f32 %v1182_v10, %v1186_v58  ;;  %v1528_v19 = vadd.f32 %v1527_v11, %v1526_v4  ;;  %v1151_v43 = vpop.f32.mrf.mxu1  ;;  %v1149_v32 = vadd.f32 %v1148_v51, %v1052_v27  ;;  %v982_v42 = vadd.f32 %v1482_v5, %v885_v55 }
 0x14b   :  { %v1529_v23 = vpop.f32.mrf.mxu0  ;;  %v1071_v9 = vadd.f32 %v1540_v38, %v974_v59  ;;  %v966_v16 = vadd.f32 %v1470_v31, %v869_v30 }
 0x14c   :  { %v1575_v53 = vpop.f32.mrf.mxu1  ;;  %v1055_v48 = vadd.f32 %v1528_v19, %v2257_v36  ;;  %v1187_v13 = vmax.f32 %v1149_v32, 0.0  ;;  %v1079_v52 = vadd.f32 %v1546_v22, %v982_v42 }
 0x14d   :  { %v1530_v49 = vpop.f32.mrf.mxu0  ;;  %v1173_v29 = vadd.f32 %v1575_v53, %v1076_v41 }
 0x14e   :  { %v1531_v12 = vadd.f32 %v1530_v49, %v1529_v23  ;;  %v1164_v15 = vpop.f32.mrf.mxu1  ;;  %v1152_v0 = vadd.f32 %v1151_v43, %v1055_v48 }
 0x14f   :  { %v1165_v44 = vadd.f32 %v1164_v15, %v1068_v50  ;;  %v1532_v37 = vpop.f32.mrf.mxu0  ;;  %v1193_v4 = vmax.f32 %v1173_v29, 0.0 }
 0x150   :  { %v1060_v24 = vadd.f32 %v1531_v12, %v963_v47  ;;  %v1576_v62 = vpop.f32.mrf.mxu1  ;;  %v1188_v58 = vmax.f32 %v1152_v0, 0.0 }
 0x151   :  { %v1191_v3 = vmax.f32 %v1165_v44, 0.0  ;;  %v1533_v7 = vpop.f32.mrf.mxu0  ;;  %v1176_v8 = vadd.f32 %v1576_v62, %v1079_v52 }
 0x152   :  { %v1157_v45 = vadd.f32 %v1571_v1, %v1060_v24  ;;  %v1534_v51 = vadd.f32 %v1533_v7, %v1532_v37  ;;  %v1167_v54 = vpop.f32.mrf.mxu1 }
 0x153   :  { %v1199_v46 = vmax.f32 %v1187_v13, %v1191_v3  ;;  %v1168_v56 = vadd.f32 %v1167_v54, %v1071_v9  ;;  %v1194_v47 = vmax.f32 %v1176_v8, 0.0 }
 0x154   :  { %v1189_v57 = vmax.f32 %v1157_v45, 0.0  ;;  %v1063_v10 = vadd.f32 %v1534_v51, %v966_v16 }
 0x155   :  { %v1203_v25 = vmax.f32 %v2183_v63, %v1199_v46  ;;  %v1192_v27 = vmax.f32 %v1168_v56, 0.0 }
 0x156   :  { %v1201_v11 = vmax.f32 %v1189_v57, %v1193_v4  ;;  %v1160_v14 = vadd.f32 %v1572_v60, %v1063_v10 }
 0x157   :  { %v1351_v19 = vpack.c.bf16 %v1203_v25, %v1203_v25  ;;  %v1200_v43 = vmax.f32 %v1188_v58, %v1192_v27 }
 0x158   :  { %v1205_v1 = vmax.f32 %v2191_v18, %v1201_v11  ;;  %v1190_v34 = vmax.f32 %v1160_v14, 0.0 }
 0x159   :  { %1224 = vst.msk [vmem:[%s2247_s3] sm:$0xf] %vm1223_vm1, %v1351_v19  ;;  %v1204_v20 = vmax.f32 %v2198_v2, %v1200_v43 }
 0x15a   :  { %v1353_v23 = vpack.c.bf16 %v1205_v1, %v1205_v1  ;;  %v1202_v30 = vmax.f32 %v1190_v34, %v1194_v47 }
 0x15b   :  { %v1352_v63 = vpack.c.bf16 %v1204_v20, %v1204_v20 }
 0x15c   :  { %1226 = vst.msk [vmem:[%s2247_s3 + $0x8] sm:$0xf] %vm1223_vm1, %v1353_v23  ;;  %v1206_v60 = vmax.f32 %v2208_v17, %v1202_v30 }
 0x15d   :  { %1225 = vst.msk [vmem:[%s2247_s3 + $0x4] sm:$0xf] %vm1223_vm1, %v1352_v63 }
 0x15e   :  { %v1354_v18 = vpack.c.bf16 %v1206_v60, %v1206_v60 }
 0x160   :  { %1227 = vst.msk [vmem:[%s2247_s3 + $0xc] sm:$0xf] %vm1223_vm1, %v1354_v18 }

// kernel: cnn_forward.5
= control target key start
LH: loop header
LB: loop body
LE: loop exit
PB: predicated region body
PF: predicated region fallthrough
CT: control target
= control target key end

     0   :  { %v537_v32 = vlaneseq  ;;  %v5316_v33 = vmov 1966171168   ;;  %s7221_s0 = inlined_call_operand.vmem [shape: bf16[2,1024], index: 0, kind: input, shape index: {}]   ;;  %s7222_s1 = inlined_call_operand.vmem [shape: bf16[1024,1024], index: 1, kind: input, shape index: {}]   ;;  %s7223_s2 = inlined_call_operand.vmem [shape: f32[1,1024], index: 2, kind: input, shape index: {}]   ;;  %s7224_s3 = inlined_call_operand.vmem [shape: bf16[1024,128], index: 3, kind: input, shape index: {}]   ;;  %s7225_s4 = inlined_call_operand.vmem [shape: f32[1,128], index: 4, kind: input, shape index: {}]   ;;  %s7226_s5 = inlined_call_operand.hbm [shape: f32[2,128], index: 5, kind: output, shape index: {}]  }
   0x1   :  { %v79_v0 = vld [vmem:[%s7222_s1 + $0x1c0] sm:$0xff]  ;;  %v580_v34 = vunpack.c.l.s4 %v5316_v33 }
   0x2   :  { %v83_v1 = vld [vmem:[%s7222_s1 + $0x1e0] sm:$0xff]  ;;  %v5414_v43 = vshrl.u32 %v537_v32, 7 }
   0x3   :  { %v207_v2 = vld [vmem:[%s7222_s1 + $0x5c0] sm:$0xff]  ;;  %v4618_v3 = vcombine.high %v79_v0, %v83_v1  ;;  %v4617_v5 = vcombine.low %v79_v0, %v83_v1  ;;  %v581_v44 = vunpack.c.0.s8 %v580_v34 }
   0x4   :  { %v211_v4 = vld [vmem:[%s7222_s1 + $0x5e0] sm:$0xff] }
   0x5   :  { %v71_v6 = vld [vmem:[%s7222_s1 + $0x180] sm:$0xff]  ;;  %v4746_v8 = vcombine.high %v207_v2, %v211_v4  ;;  %v4745_v9 = vcombine.low %v207_v2, %v211_v4  ;;  %3195 = vmatprep.subr.bf16.mxu0 %v4618_v3  ;;  %v5429_v53 = vsub.s32 %v581_v44, %v5414_v43 }
   0x6   :  { %v75_v7 = vld [vmem:[%s7222_s1 + $0x1a0] sm:$0xff]  ;;  %3196 = vmatpush1.bf16.msra.mxu0 %v4617_v5 }
   0x7   :  { %v4610_v10 = vcombine.high %v71_v6, %v75_v7  ;;  %v199_v11 = vld [vmem:[%s7222_s1 + $0x580] sm:$0xff]  ;;  %3236 = vmatprep.subr.bf16.mxu1 %v4746_v8  ;;  %v4609_v18 = vcombine.low %v71_v6, %v75_v7 }
   0x8   :  { %v203_v12 = vld [vmem:[%s7222_s1 + $0x5a0] sm:$0xff]  ;;  %3237 = vmatpush1.bf16.msra.mxu1 %v4745_v9 }
   0x9   :  { %v63_v13 = vld [vmem:[%s7222_s1 + $0x140] sm:$0xff]  ;;  %v4738_v14 = vcombine.high %v199_v11, %v203_v12  ;;  %3197 = vmatprep.subr.bf16.mxu0 %v4610_v10  ;;  %v4737_v19 = vcombine.low %v199_v11, %v203_v12 }
   0xa   :  { %v67_v15 = vld [vmem:[%s7222_s1 + $0x160] sm:$0xff]  ;;  %3198 = vmatpush1.bf16.msra.mxu0 %v4609_v18 }
   0xb   :  { %v191_v16 = vld [vmem:[%s7222_s1 + $0x540] sm:$0xff]  ;;  %v4602_v20 = vcombine.high %v63_v13, %v67_v15  ;;  %3238 = vmatprep.subr.bf16.mxu1 %v4738_v14  ;;  %v4601_v26 = vcombine.low %v63_v13, %v67_v15 }
   0xc   :  { %v195_v17 = vld [vmem:[%s7222_s1 + $0x560] sm:$0xff]  ;;  %3239 = vmatpush1.bf16.msra.mxu1 %v4737_v19 }
   0xd   :  { %v4730_v21 = vcombine.high %v191_v16, %v195_v17  ;;  %v55_v22 = vld [vmem:[%s7222_s1 + $0x100] sm:$0xff]  ;;  %3199 = vmatprep.subr.bf16.mxu0 %v4602_v20  ;;  %v4729_v27 = vcombine.low %v191_v16, %v195_v17 }
   0xe   :  { %v59_v23 = vld [vmem:[%s7222_s1 + $0x120] sm:$0xff]  ;;  %3200 = vmatpush1.bf16.msra.mxu0 %v4601_v26 }
   0xf   :  { %v183_v24 = vld [vmem:[%s7222_s1 + $0x500] sm:$0xff]  ;;  %v4594_v28 = vcombine.high %v55_v22, %v59_v23  ;;  %3240 = vmatprep.subr.bf16.mxu1 %v4730_v21  ;;  %v4593_v37 = vcombine.low %v55_v22, %v59_v23 }
  0x10   :  { %v187_v25 = vld [vmem:[%s7222_s1 + $0x520] sm:$0xff]  ;;  %3241 = vmatpush1.bf16.msra.mxu1 %v4729_v27 }
  0x11   :  { %v4722_v29 = vcombine.high %v183_v24, %v187_v25  ;;  %v47_v30 = vld [vmem:[%s7222_s1 + $0xc0] sm:$0xff]  ;;  %3201 = vmatprep.subr.bf16.mxu0 %v4594_v28  ;;  %v4721_v38 = vcombine.low %v183_v24, %v187_v25 }
  0x12   :  { %v51_v31 = vld [vmem:[%s7222_s1 + $0xe0] sm:$0xff]  ;;  %3202 = vmatpush1.bf16.msra.mxu0 %v4593_v37 }
  0x13   :  { %v175_v35 = vld [vmem:[%s7222_s1 + $0x4c0] sm:$0xff]  ;;  %v4586_v39 = vcombine.high %v47_v30, %v51_v31  ;;  %3242 = vmatprep.subr.bf16.mxu1 %v4722_v29  ;;  %v4585_v47 = vcombine.low %v47_v30, %v51_v31 }
  0x14   :  { %v179_v36 = vld [vmem:[%s7222_s1 + $0x4e0] sm:$0xff]  ;;  %3243 = vmatpush1.bf16.msra.mxu1 %v4721_v38 }
  0x15   :  { %v4714_v40 = vcombine.high %v175_v35, %v179_v36  ;;  %v39_v41 = vld [vmem:[%s7222_s1 + $0x80] sm:$0xff]  ;;  %3203 = vmatprep.subr.bf16.mxu0 %v4586_v39  ;;  %v4713_v48 = vcombine.low %v175_v35, %v179_v36 }
  0x16   :  { %v43_v42 = vld [vmem:[%s7222_s1 + $0xa0] sm:$0xff]  ;;  %3204 = vmatpush1.bf16.msra.mxu0 %v4585_v47 }
  0x17   :  { %v167_v45 = vld [vmem:[%s7222_s1 + $0x480] sm:$0xff]  ;;  %v4578_v49 = vcombine.high %v39_v41, %v43_v42  ;;  %3244 = vmatprep.subr.bf16.mxu1 %v4714_v40  ;;  %v4577_v56 = vcombine.low %v39_v41, %v43_v42 }
  0x18   :  { %v171_v46 = vld [vmem:[%s7222_s1 + $0x4a0] sm:$0xff]  ;;  %3245 = vmatpush1.bf16.msra.mxu1 %v4713_v48 }
  0x19   :  { %v4706_v50 = vcombine.high %v167_v45, %v171_v46  ;;  %v31_v51 = vld [vmem:[%s7222_s1 + $0x40] sm:$0xff]  ;;  %3205 = vmatprep.subr.bf16.mxu0 %v4578_v49  ;;  %v4705_v57 = vcombine.low %v167_v45, %v171_v46 }
  0x1a   :  { %v35_v52 = vld [vmem:[%s7222_s1 + $0x60] sm:$0xff]  ;;  %3206 = vmatpush1.bf16.msra.mxu0 %v4577_v56 }
  0x1b   :  { %v159_v54 = vld [vmem:[%s7222_s1 + $0x440] sm:$0xff]  ;;  %v4570_v58 = vcombine.high %v31_v51, %v35_v52  ;;  %3246 = vmatprep.subr.bf16.mxu1 %v4706_v50  ;;  %v4569_v2 = vcombine.low %v31_v51, %v35_v52 }
  0x1c   :  { %v163_v55 = vld [vmem:[%s7222_s1 + $0x460] sm:$0xff]  ;;  %3247 = vmatpush1.bf16.msra.mxu1 %v4705_v57 }
  0x1d   :  { %v22_v59 = vld [vmem:[%s7221_s0] sm:$0xff]  ;;  %v4698_v60 = vcombine.high %v159_v54, %v163_v55  ;;  %3207 = vmatprep.subr.bf16.mxu0 %v4570_v58  ;;  %v4697_v4 = vcombine.low %v159_v54, %v163_v55 }
  0x1e   :  { %v23_v61 = vld [vmem:[%s7222_s1] sm:$0xff]  ;;  %v5447_v63 = vrot.slane %v22_v59, %v5429_v53  ;;  %3208 = vmatpush1.bf16.msra.mxu0 %v4569_v2  ;;  %v578_v19 = vcombine.high %v22_v59, %v22_v59 }
  0x1f   :  { %v27_v62 = vld [vmem:[%s7222_s1 + $0x20] sm:$0xff]  ;;  %3248 = vmatprep.subr.bf16.mxu1 %v4698_v60 }
  0x20   :  { %v151_v0 = vld [vmem:[%s7222_s1 + $0x400] sm:$0xff]  ;;  %v593_v3 = vcombine.high %v5447_v63, %v5447_v63  ;;  %v4562_v5 = vcombine.high %v23_v61, %v27_v62  ;;  %v4561_v12 = vcombine.low %v23_v61, %v27_v62  ;;  %3249 = vmatpush1.bf16.msra.mxu1 %v4697_v4  ;;  %v5497_v28 = vrot.slane %v578_v19, %v5429_v53 }
  0x21   :  { %v155_v1 = vld [vmem:[%s7222_s1 + $0x420] sm:$0xff] }
  0x22   :  { %v4690_v6 = vcombine.high %v151_v0, %v155_v1  ;;  %v143_v7 = vld [vmem:[%s7222_s1 + $0x3c0] sm:$0xff]  ;;  %v5464_v9 = vrot.slane %v593_v3, %v5429_v53  ;;  %3209 = vmatprep.subr.bf16.mxu0 %v4562_v5  ;;  %v4689_v14 = vcombine.low %v151_v0, %v155_v1  ;;  %v5507_v32 = vrot.slane %v5497_v28, %v5429_v53 }
  0x23   :  { %v147_v8 = vld [vmem:[%s7222_s1 + $0x3e0] sm:$0xff]  ;;  %3210 = vmatpush1.bf16.msra.mxu0 %v4561_v12 }
  0x24   :  { %v271_v10 = vld [vmem:[%s7222_s1 + $0x7c0] sm:$0xff]  ;;  %3227 = vmatprep.mubr.bf16.mxu0 %v5464_v9  ;;  %v5475_v13 = vcombine.high %v5464_v9, %v5464_v9  ;;  %v4682_v15 = vcombine.high %v143_v7, %v147_v8  ;;  %3250 = vmatprep.subr.bf16.mxu1 %v4690_v6  ;;  %v4681_v22 = vcombine.low %v143_v7, %v147_v8 }
  0x25   :  { %v275_v11 = vld [vmem:[%s7222_s1 + $0x7e0] sm:$0xff]  ;;  %3251 = vmatpush1.bf16.msra.mxu1 %v4689_v14 }
  0x26   :  { %v4810_v16 = vcombine.high %v271_v10, %v275_v11  ;;  %v135_v17 = vld [vmem:[%s7222_s1 + $0x380] sm:$0xff]  ;;  %3268 = vmatprep.mubr.bf16.mxu1 %v5475_v13  ;;  %3211 = vmatprep.subr.bf16.mxu0 %v4682_v15  ;;  %v4809_v23 = vcombine.low %v271_v10, %v275_v11 }
  0x27   :  { %v139_v18 = vld [vmem:[%s7222_s1 + $0x3a0] sm:$0xff]  ;;  %3212 = vmatpush2.bf16.msra.mxu0 %v4681_v22 }
  0x28   :  { %v263_v20 = vld [vmem:[%s7222_s1 + $0x780] sm:$0xff]  ;;  %v4674_v24 = vcombine.high %v135_v17, %v139_v18  ;;  %3252 = vmatprep.subr.bf16.mxu1 %v4810_v16  ;;  %v4673_v31 = vcombine.low %v135_v17, %v139_v18 }
  0x29   :  { %v267_v21 = vld [vmem:[%s7222_s1 + $0x7a0] sm:$0xff]  ;;  %3253 = vmatpush2.bf16.msra.mxu1 %v4809_v23  ;;  %v5585_v23 = vrot.slane %v5447_v63, %v5429_v53 }
  0x2a   :  { %v4802_v25 = vcombine.high %v263_v20, %v267_v21  ;;  %v127_v26 = vld [vmem:[%s7222_s1 + $0x340] sm:$0xff]  ;;  %3213 = vmatprep.subr.bf16.mxu0 %v4674_v24  ;;  %v4801_v33 = vcombine.low %v263_v20, %v267_v21  ;;  %v594_v21 = vcombine.high %v5497_v28, %v5497_v28 }
  0x2b   :  { %v131_v27 = vld [vmem:[%s7222_s1 + $0x360] sm:$0xff]  ;;  %3214 = vmatpush2.bf16.msra.mxu0 %v4673_v31  ;;  %v5604_v31 = vcombine.high %v5585_v23, %v5585_v23 }
  0x2c   :  { %v255_v29 = vld [vmem:[%s7222_s1 + $0x740] sm:$0xff]  ;;  %v4666_v34 = vcombine.high %v127_v26, %v131_v27  ;;  %3254 = vmatprep.subr.bf16.mxu1 %v4802_v25  ;;  %v4665_v40 = vcombine.low %v127_v26, %v131_v27 }
  0x2d   :  { %v259_v30 = vld [vmem:[%s7222_s1 + $0x760] sm:$0xff]  ;;  %3255 = vmatpush2.bf16.msra.mxu1 %v4801_v33 }
  0x2e   :  { %v4794_v35 = vcombine.high %v255_v29, %v259_v30  ;;  %v119_v36 = vld [vmem:[%s7222_s1 + $0x300] sm:$0xff]  ;;  %3215 = vmatprep.subr.bf16.mxu0 %v4666_v34  ;;  %v4793_v41 = vcombine.low %v255_v29, %v259_v30  ;;  %v5600_v30 = vrot.slane %v594_v21, %v5429_v53 }
  0x2f   :  { %v123_v37 = vld [vmem:[%s7222_s1 + $0x320] sm:$0xff]  ;;  %3216 = vmatpush2.bf16.msra.mxu0 %v4665_v40 }
  0x30   :  { %v247_v38 = vld [vmem:[%s7222_s1 + $0x700] sm:$0xff]  ;;  %v4658_v42 = vcombine.high %v119_v36, %v123_v37  ;;  %3256 = vmatprep.subr.bf16.mxu1 %v4794_v35  ;;  %v4657_v49 = vcombine.low %v119_v36, %v123_v37  ;;  %v5621_v40 = vcombine.high %v5600_v30, %v5600_v30 }
  0x31   :  { %v251_v39 = vld [vmem:[%s7222_s1 + $0x720] sm:$0xff]  ;;  %3257 = vmatpush2.bf16.msra.mxu1 %v4793_v41 }
  0x32   :  { %v4786_v44 = vcombine.high %v247_v38, %v251_v39  ;;  %v111_v45 = vld [vmem:[%s7222_s1 + $0x2c0] sm:$0xff]  ;;  %3217 = vmatprep.subr.bf16.mxu0 %v4658_v42  ;;  %v4785_v50 = vcombine.low %v247_v38, %v251_v39 }
  0x33   :  { %v115_v46 = vld [vmem:[%s7222_s1 + $0x2e0] sm:$0xff]  ;;  %3218 = vmatpush2.bf16.msra.mxu0 %v4657_v49 }
  0x34   :  { %v239_v47 = vld [vmem:[%s7222_s1 + $0x6c0] sm:$0xff]  ;;  %v4650_v51 = vcombine.high %v111_v45, %v115_v46  ;;  %3258 = vmatprep.subr.bf16.mxu1 %v4786_v44  ;;  %v4649_v58 = vcombine.low %v111_v45, %v115_v46 }
  0x35   :  { %v243_v48 = vld [vmem:[%s7222_s1 + $0x6e0] sm:$0xff]  ;;  %3259 = vmatpush2.bf16.msra.mxu1 %v4785_v50 }
  0x36   :  { %v4778_v52 = vcombine.high %v239_v47, %v243_v48  ;;  %v103_v54 = vld [vmem:[%s7222_s1 + $0x280] sm:$0xff]  ;;  %3219 = vmatprep.subr.bf16.mxu0 %v4650_v51  ;;  %v4777_v59 = vcombine.low %v239_v47, %v243_v48 }
  0x37   :  { %v107_v55 = vld [vmem:[%s7222_s1 + $0x2a0] sm:$0xff]  ;;  %3220 = vmatpush2.bf16.msra.mxu0 %v4649_v58 }
  0x38   :  { %v231_v56 = vld [vmem:[%s7222_s1 + $0x680] sm:$0xff]  ;;  %v4642_v60 = vcombine.high %v103_v54, %v107_v55  ;;  %3260 = vmatprep.subr.bf16.mxu1 %v4778_v52  ;;  %v4641_v3 = vcombine.low %v103_v54, %v107_v55 }
  0x39   :  { %v235_v57 = vld [vmem:[%s7222_s1 + $0x6a0] sm:$0xff]  ;;  %3261 = vmatpush2.bf16.msra.mxu1 %v4777_v59 }
  0x3a   :  { %v4770_v61 = vcombine.high %v231_v56, %v235_v57  ;;  %v95_v62 = vld [vmem:[%s7222_s1 + $0x240] sm:$0xff]  ;;  %3221 = vmatprep.subr.bf16.mxu0 %v4642_v60  ;;  %v4769_v4 = vcombine.low %v231_v56, %v235_v57 }
  0x3b   :  { %v99_v0 = vld [vmem:[%s7222_s1 + $0x260] sm:$0xff]  ;;  %3222 = vmatpush2.bf16.msra.mxu0 %v4641_v3 }
  0x3c   :  { %v223_v1 = vld [vmem:[%s7222_s1 + $0x640] sm:$0xff]  ;;  %v4634_v5 = vcombine.high %v95_v62, %v99_v0  ;;  %3262 = vmatprep.subr.bf16.mxu1 %v4770_v61  ;;  %v4633_v12 = vcombine.low %v95_v62, %v99_v0 }
  0x3d   :  { %v227_v2 = vld [vmem:[%s7222_s1 + $0x660] sm:$0xff]  ;;  %3263 = vmatpush2.bf16.msra.mxu1 %v4769_v4 }
  0x3e   :  { %v4762_v6 = vcombine.high %v223_v1, %v227_v2  ;;  %v87_v7 = vld [vmem:[%s7222_s1 + $0x200] sm:$0xff]  ;;  %3223 = vmatprep.subr.bf16.mxu0 %v4634_v5  ;;  %v4761_v14 = vcombine.low %v223_v1, %v227_v2 }
  0x3f   :  { %v91_v8 = vld [vmem:[%s7222_s1 + $0x220] sm:$0xff]  ;;  %3224 = vmatpush2.bf16.msra.mxu0 %v4633_v12 }
  0x40   :  { %v215_v10 = vld [vmem:[%s7222_s1 + $0x600] sm:$0xff]  ;;  %v4626_v15 = vcombine.high %v87_v7, %v91_v8  ;;  %3264 = vmatprep.subr.bf16.mxu1 %v4762_v6  ;;  %v4625_v22 = vcombine.low %v87_v7, %v91_v8 }
  0x41   :  { %v219_v11 = vld [vmem:[%s7222_s1 + $0x620] sm:$0xff]  ;;  %3265 = vmatpush2.bf16.msra.mxu1 %v4761_v14 }
  0x42   :  { %v4754_v16 = vcombine.high %v215_v10, %v219_v11  ;;  %v335_v17 = vld [vmem:[%s7222_s1 + $0x9c0] sm:$0xff]  ;;  %3225 = vmatprep.subr.bf16.mxu0 %v4626_v15  ;;  %v4753_v24 = vcombine.low %v215_v10, %v219_v11 }
  0x43   :  { %v339_v18 = vld [vmem:[%s7222_s1 + $0x9e0] sm:$0xff]  ;;  %3226 = vmatpush2.bf16.msra.mxu0 %v4625_v22 }
  0x44   :  { %v463_v19 = vld [vmem:[%s7222_s1 + $0xdc0] sm:$0xff]  ;;  %v4874_v25 = vcombine.high %v335_v17, %v339_v18  ;;  %3266 = vmatprep.subr.bf16.mxu1 %v4754_v16  ;;  %v4873_v33 = vcombine.low %v335_v17, %v339_v18 }
  0x45   :  { %v467_v20 = vld [vmem:[%s7222_s1 + $0xde0] sm:$0xff]  ;;  %3267 = vmatpush2.bf16.msra.mxu1 %v4753_v24 }
  0x46   :  { %v5002_v26 = vcombine.high %v463_v19, %v467_v20  ;;  %v327_v27 = vld [vmem:[%s7222_s1 + $0x980] sm:$0xff]  ;;  %3277 = vmatprep.subr.bf16.mxu0 %v4874_v25  ;;  %v5001_v34 = vcombine.low %v463_v19, %v467_v20  ;;  %3228 = vmatmul.mubr.bf16.vlgmr.msra.gmra.mxu0 %v5585_v23 }
  0x47   :  { %v331_v28 = vld [vmem:[%s7222_s1 + $0x9a0] sm:$0xff]  ;;  %3278 = vmatpush1.bf16.msra.mxu0 %v4873_v33  ;;  %3309 = vmatprep.mubr.bf16.mxu0 %v5600_v30 }
  0x48   :  { %v455_v29 = vld [vmem:[%s7222_s1 + $0xd80] sm:$0xff]  ;;  %v4866_v35 = vcombine.high %v327_v27, %v331_v28  ;;  %3318 = vmatprep.subr.bf16.mxu1 %v5002_v26  ;;  %3269 = vmatmul.mubr.bf16.vlgmr.msra.gmra.mxu1 %v5604_v31  ;;  %v4865_v41 = vcombine.low %v327_v27, %v331_v28 }
  0x49   :  { %v459_v63 = vld [vmem:[%s7222_s1 + $0xda0] sm:$0xff]  ;;  %3319 = vmatpush1.bf16.msra.mxu1 %v5001_v34  ;;  %3350 = vmatprep.mubr.bf16.mxu1 %v5621_v40 }
  0x4a   :  { %v319_v36 = vld [vmem:[%s7222_s1 + $0x940] sm:$0xff]  ;;  %v4994_v38 = vcombine.high %v455_v29, %v459_v63  ;;  %3279 = vmatprep.subr.bf16.mxu0 %v4866_v35  ;;  %v4993_v42 = vcombine.low %v455_v29, %v459_v63 }
  0x4b   :  { %v323_v37 = vld [vmem:[%s7222_s1 + $0x960] sm:$0xff]  ;;  %3280 = vmatpush1.bf16.msra.mxu0 %v4865_v41 }
  0x4c   :  { %v447_v53 = vld [vmem:[%s7222_s1 + $0xd40] sm:$0xff]  ;;  %v4858_v44 = vcombine.high %v319_v36, %v323_v37  ;;  %3320 = vmatprep.subr.bf16.mxu1 %v4994_v38  ;;  %v4857_v50 = vcombine.low %v319_v36, %v323_v37 }
  0x4d   :  { %v451_v39 = vld [vmem:[%s7222_s1 + $0xd60] sm:$0xff]  ;;  %3321 = vmatpush1.bf16.msra.mxu1 %v4993_v42 }
  0x4e   :  { %v311_v45 = vld [vmem:[%s7222_s1 + $0x900] sm:$0xff]  ;;  %v4986_v48 = vcombine.high %v447_v53, %v451_v39  ;;  %3281 = vmatprep.subr.bf16.mxu0 %v4858_v44  ;;  %v4985_v51 = vcombine.low %v447_v53, %v451_v39 }
  0x4f   :  { %v315_v46 = vld [vmem:[%s7222_s1 + $0x920] sm:$0xff]  ;;  %3282 = vmatpush1.bf16.msra.mxu0 %v4857_v50 }
  0x50   :  { %v439_v47 = vld [vmem:[%s7222_s1 + $0xd00] sm:$0xff]  ;;  %v4850_v52 = vcombine.high %v311_v45, %v315_v46  ;;  %3322 = vmatprep.subr.bf16.mxu1 %v4986_v48  ;;  %v4849_v59 = vcombine.low %v311_v45, %v315_v46 }
  0x51   :  { %v443_v49 = vld [vmem:[%s7222_s1 + $0xd20] sm:$0xff]  ;;  %3323 = vmatpush1.bf16.msra.mxu1 %v4985_v51 }
  0x52   :  { %v303_v54 = vld [vmem:[%s7222_s1 + $0x8c0] sm:$0xff]  ;;  %v4978_v57 = vcombine.high %v439_v47, %v443_v49  ;;  %3283 = vmatprep.subr.bf16.mxu0 %v4850_v52  ;;  %v4977_v60 = vcombine.low %v439_v47, %v443_v49 }
  0x53   :  { %v307_v55 = vld [vmem:[%s7222_s1 + $0x8e0] sm:$0xff]  ;;  %3284 = vmatpush1.bf16.msra.mxu0 %v4849_v59 }
  0x54   :  { %v431_v56 = vld [vmem:[%s7222_s1 + $0xcc0] sm:$0xff]  ;;  %v4842_v61 = vcombine.high %v303_v54, %v307_v55  ;;  %3324 = vmatprep.subr.bf16.mxu1 %v4978_v57  ;;  %v4841_v4 = vcombine.low %v303_v54, %v307_v55 }
  0x55   :  { %v435_v58 = vld [vmem:[%s7222_s1 + $0xce0] sm:$0xff]  ;;  %3325 = vmatpush1.bf16.msra.mxu1 %v4977_v60 }
  0x56   :  { %v295_v62 = vld [vmem:[%s7222_s1 + $0x880] sm:$0xff]  ;;  %v4970_v2 = vcombine.high %v431_v56, %v435_v58  ;;  %3285 = vmatprep.subr.bf16.mxu0 %v4842_v61  ;;  %v4969_v5 = vcombine.low %v431_v56, %v435_v58 }
  0x57   :  { %v299_v0 = vld [vmem:[%s7222_s1 + $0x8a0] sm:$0xff]  ;;  %3286 = vmatpush1.bf16.msra.mxu0 %v4841_v4 }
  0x58   :  { %v423_v1 = vld [vmem:[%s7222_s1 + $0xc80] sm:$0xff]  ;;  %v4834_v6 = vcombine.high %v295_v62, %v299_v0  ;;  %3326 = vmatprep.subr.bf16.mxu1 %v4970_v2  ;;  %v4833_v14 = vcombine.low %v295_v62, %v299_v0 }
  0x59   :  { %v427_v3 = vld [vmem:[%s7222_s1 + $0xca0] sm:$0xff]  ;;  %3327 = vmatpush1.bf16.msra.mxu1 %v4969_v5 }
  0x5a   :  { %v287_v7 = vld [vmem:[%s7222_s1 + $0x840] sm:$0xff]  ;;  %v4962_v11 = vcombine.high %v423_v1, %v427_v3  ;;  %3287 = vmatprep.subr.bf16.mxu0 %v4834_v6  ;;  %v4961_v15 = vcombine.low %v423_v1, %v427_v3 }
  0x5b   :  { %v291_v8 = vld [vmem:[%s7222_s1 + $0x860] sm:$0xff]  ;;  %3288 = vmatpush1.bf16.msra.mxu0 %v4833_v14 }
  0x5c   :  { %v415_v10 = vld [vmem:[%s7222_s1 + $0xc40] sm:$0xff]  ;;  %v4826_v16 = vcombine.high %v287_v7, %v291_v8  ;;  %3328 = vmatprep.subr.bf16.mxu1 %v4962_v11  ;;  %v4825_v22 = vcombine.low %v287_v7, %v291_v8 }
  0x5d   :  { %v419_v12 = vld [vmem:[%s7222_s1 + $0xc60] sm:$0xff]  ;;  %3329 = vmatpush1.bf16.msra.mxu1 %v4961_v15 }
  0x5e   :  { %v279_v17 = vld [vmem:[%s7222_s1 + $0x800] sm:$0xff]  ;;  %v4954_v20 = vcombine.high %v415_v10, %v419_v12  ;;  %3289 = vmatprep.subr.bf16.mxu0 %v4826_v16  ;;  %v4953_v24 = vcombine.low %v415_v10, %v419_v12 }
  0x5f   :  { %v283_v18 = vld [vmem:[%s7222_s1 + $0x820] sm:$0xff]  ;;  %3290 = vmatpush1.bf16.msra.mxu0 %v4825_v22 }
  0x60   :  { %v407_v19 = vld [vmem:[%s7222_s1 + $0xc00] sm:$0xff]  ;;  %v4818_v25 = vcombine.high %v279_v17, %v283_v18  ;;  %3330 = vmatprep.subr.bf16.mxu1 %v4954_v20  ;;  %v4817_v33 = vcombine.low %v279_v17, %v283_v18 }
  0x61   :  { %v411_v21 = vld [vmem:[%s7222_s1 + $0xc20] sm:$0xff]  ;;  %3331 = vmatpush1.bf16.msra.mxu1 %v4953_v24 }
  0x62   :  { %v399_v26 = vld [vmem:[%s7222_s1 + $0xbc0] sm:$0xff]  ;;  %v4946_v29 = vcombine.high %v407_v19, %v411_v21  ;;  %3291 = vmatprep.subr.bf16.mxu0 %v4818_v25  ;;  %v4945_v34 = vcombine.low %v407_v19, %v411_v21 }
  0x63   :  { %v403_v27 = vld [vmem:[%s7222_s1 + $0xbe0] sm:$0xff]  ;;  %3292 = vmatpush1.bf16.msra.mxu0 %v4817_v33 }
  0x64   :  { %v527_v28 = vld [vmem:[%s7222_s1 + $0xfc0] sm:$0xff]  ;;  %v4938_v35 = vcombine.high %v399_v26, %v403_v27  ;;  %3332 = vmatprep.subr.bf16.mxu1 %v4946_v29  ;;  %v4937_v41 = vcombine.low %v399_v26, %v403_v27 }
  0x65   :  { %v531_v63 = vld [vmem:[%s7222_s1 + $0xfe0] sm:$0xff]  ;;  %3333 = vmatpush1.bf16.msra.mxu1 %v4945_v34 }
  0x66   :  { %v391_v36 = vld [vmem:[%s7222_s1 + $0xb80] sm:$0xff]  ;;  %v5066_v38 = vcombine.high %v527_v28, %v531_v63  ;;  %3293 = vmatprep.subr.bf16.mxu0 %v4938_v35  ;;  %v5065_v42 = vcombine.low %v527_v28, %v531_v63 }
  0x67   :  { %v395_v37 = vld [vmem:[%s7222_s1 + $0xba0] sm:$0xff]  ;;  %3294 = vmatpush2.bf16.msra.mxu0 %v4937_v41 }
  0x68   :  { %v519_v53 = vld [vmem:[%s7222_s1 + $0xf80] sm:$0xff]  ;;  %v4930_v44 = vcombine.high %v391_v36, %v395_v37  ;;  %3334 = vmatprep.subr.bf16.mxu1 %v5066_v38  ;;  %v4929_v50 = vcombine.low %v391_v36, %v395_v37  ;;  %v80_v36 = vld [vmem:[%s7222_s1 + $0x1c8] sm:$0xff] }
  0x69   :  { %v523_v39 = vld [vmem:[%s7222_s1 + $0xfa0] sm:$0xff]  ;;  %3335 = vmatpush2.bf16.msra.mxu1 %v5065_v42  ;;  %v84_v37 = vld [vmem:[%s7222_s1 + $0x1e8] sm:$0xff] }
  0x6a   :  { %v383_v45 = vld [vmem:[%s7222_s1 + $0xb40] sm:$0xff]  ;;  %v5058_v48 = vcombine.high %v519_v53, %v523_v39  ;;  %3295 = vmatprep.subr.bf16.mxu0 %v4930_v44  ;;  %v5057_v51 = vcombine.low %v519_v53, %v523_v39  ;;  %v208_v53 = vld [vmem:[%s7222_s1 + $0x5c8] sm:$0xff]  ;;  %v4620_v44 = vcombine.high %v80_v36, %v84_v37 }
  0x6b   :  { %v387_v46 = vld [vmem:[%s7222_s1 + $0xb60] sm:$0xff]  ;;  %3296 = vmatpush2.bf16.msra.mxu0 %v4929_v50  ;;  %v212_v39 = vld [vmem:[%s7222_s1 + $0x5e8] sm:$0xff]  ;;  %v5808_v50 = vcombine.high %v5507_v32, %v5507_v32 }
  0x6c   :  { %v511_v47 = vld [vmem:[%s7222_s1 + $0xf40] sm:$0xff]  ;;  %v4922_v52 = vcombine.high %v383_v45, %v387_v46  ;;  %3336 = vmatprep.subr.bf16.mxu1 %v5058_v48  ;;  %v4921_v59 = vcombine.low %v383_v45, %v387_v46  ;;  %v72_v45 = vld [vmem:[%s7222_s1 + $0x188] sm:$0xff]  ;;  %v4748_v48 = vcombine.high %v208_v53, %v212_v39 }
  0x6d   :  { %v515_v49 = vld [vmem:[%s7222_s1 + $0xf60] sm:$0xff]  ;;  %3337 = vmatpush2.bf16.msra.mxu1 %v5057_v51  ;;  %v76_v46 = vld [vmem:[%s7222_s1 + $0x1a8] sm:$0xff]  ;;  %v4619_v51 = vcombine.low %v80_v36, %v84_v37 }
  0x6e   :  { %v375_v54 = vld [vmem:[%s7222_s1 + $0xb00] sm:$0xff]  ;;  %v5050_v57 = vcombine.high %v511_v47, %v515_v49  ;;  %3297 = vmatprep.subr.bf16.mxu0 %v4922_v52  ;;  %v5049_v60 = vcombine.low %v511_v47, %v515_v49  ;;  %v200_v47 = vld [vmem:[%s7222_s1 + $0x588] sm:$0xff] }
  0x6f   :  { %v379_v55 = vld [vmem:[%s7222_s1 + $0xb20] sm:$0xff]  ;;  %3298 = vmatpush2.bf16.msra.mxu0 %v4921_v59  ;;  %v204_v49 = vld [vmem:[%s7222_s1 + $0x5a8] sm:$0xff] }
  0x70   :  { %v503_v56 = vld [vmem:[%s7222_s1 + $0xf00] sm:$0xff]  ;;  %v4914_v61 = vcombine.high %v375_v54, %v379_v55  ;;  %3338 = vmatprep.subr.bf16.mxu1 %v5050_v57  ;;  %v4913_v4 = vcombine.low %v375_v54, %v379_v55 }
  0x71   :  { %v507_v58 = vld [vmem:[%s7222_s1 + $0xf20] sm:$0xff]  ;;  %3339 = vmatpush2.bf16.msra.mxu1 %v5049_v60 }
  0x72   :  { %v367_v62 = vld [vmem:[%s7222_s1 + $0xac0] sm:$0xff]  ;;  %v5042_v2 = vcombine.high %v503_v56, %v507_v58  ;;  %3299 = vmatprep.subr.bf16.mxu0 %v4914_v61  ;;  %v5041_v5 = vcombine.low %v503_v56, %v507_v58 }
  0x73   :  { %v371_v0 = vld [vmem:[%s7222_s1 + $0xae0] sm:$0xff]  ;;  %3300 = vmatpush2.bf16.msra.mxu0 %v4913_v4 }
  0x74   :  { %v495_v1 = vld [vmem:[%s7222_s1 + $0xec0] sm:$0xff]  ;;  %v4906_v6 = vcombine.high %v367_v62, %v371_v0  ;;  %3340 = vmatprep.subr.bf16.mxu1 %v5042_v2  ;;  %v4905_v14 = vcombine.low %v367_v62, %v371_v0 }
  0x75   :  { %v499_v3 = vld [vmem:[%s7222_s1 + $0xee0] sm:$0xff]  ;;  %3341 = vmatpush2.bf16.msra.mxu1 %v5041_v5 }
  0x76   :  { %v359_v7 = vld [vmem:[%s7222_s1 + $0xa80] sm:$0xff]  ;;  %v5034_v11 = vcombine.high %v495_v1, %v499_v3  ;;  %3301 = vmatprep.subr.bf16.mxu0 %v4906_v6  ;;  %v5033_v15 = vcombine.low %v495_v1, %v499_v3 }
  0x77   :  { %v363_v8 = vld [vmem:[%s7222_s1 + $0xaa0] sm:$0xff]  ;;  %3302 = vmatpush2.bf16.msra.mxu0 %v4905_v14 }
  0x78   :  { %v487_v10 = vld [vmem:[%s7222_s1 + $0xe80] sm:$0xff]  ;;  %v4898_v16 = vcombine.high %v359_v7, %v363_v8  ;;  %3342 = vmatprep.subr.bf16.mxu1 %v5034_v11  ;;  %v4897_v22 = vcombine.low %v359_v7, %v363_v8 }
  0x79   :  { %v491_v12 = vld [vmem:[%s7222_s1 + $0xea0] sm:$0xff]  ;;  %3343 = vmatpush2.bf16.msra.mxu1 %v5033_v15 }
  0x7a   :  { %v351_v17 = vld [vmem:[%s7222_s1 + $0xa40] sm:$0xff]  ;;  %v5026_v20 = vcombine.high %v487_v10, %v491_v12  ;;  %3303 = vmatprep.subr.bf16.mxu0 %v4898_v16  ;;  %v5025_v24 = vcombine.low %v487_v10, %v491_v12 }
  0x7b   :  { %v355_v18 = vld [vmem:[%s7222_s1 + $0xa60] sm:$0xff]  ;;  %3304 = vmatpush2.bf16.msra.mxu0 %v4897_v22 }
  0x7c   :  { %v479_v19 = vld [vmem:[%s7222_s1 + $0xe40] sm:$0xff]  ;;  %v4890_v25 = vcombine.high %v351_v17, %v355_v18  ;;  %3344 = vmatprep.subr.bf16.mxu1 %v5026_v20  ;;  %v4889_v33 = vcombine.low %v351_v17, %v355_v18 }
  0x7d   :  { %v483_v21 = vld [vmem:[%s7222_s1 + $0xe60] sm:$0xff]  ;;  %3345 = vmatpush2.bf16.msra.mxu1 %v5025_v24 }
  0x7e   :  { %v343_v26 = vld [vmem:[%s7222_s1 + $0xa00] sm:$0xff]  ;;  %v5018_v29 = vcombine.high %v479_v19, %v483_v21  ;;  %3305 = vmatprep.subr.bf16.mxu0 %v4890_v25  ;;  %v5017_v34 = vcombine.low %v479_v19, %v483_v21 }
  0x7f   :  { %v347_v27 = vld [vmem:[%s7222_s1 + $0xa20] sm:$0xff]  ;;  %3306 = vmatpush2.bf16.msra.mxu0 %v4889_v33 }
  0x80   :  { %v471_v28 = vld [vmem:[%s7222_s1 + $0xe00] sm:$0xff]  ;;  %v4882_v35 = vcombine.high %v343_v26, %v347_v27  ;;  %3346 = vmatprep.subr.bf16.mxu1 %v5018_v29  ;;  %v4881_v41 = vcombine.low %v343_v26, %v347_v27 }
  0x81   :  { %v475_v63 = vld [vmem:[%s7222_s1 + $0xe20] sm:$0xff]  ;;  %3347 = vmatpush2.bf16.msra.mxu1 %v5017_v34 }
  0x82   :  { %v5010_v38 = vcombine.high %v471_v28, %v475_v63  ;;  %3307 = vmatprep.subr.bf16.mxu0 %v4882_v35  ;;  %v5009_v42 = vcombine.low %v471_v28, %v475_v63 }
  0x83   :  { %3308 = vmatpush2.bf16.msra.mxu0 %v4881_v41 }
  0x84   :  { %3348 = vmatprep.subr.bf16.mxu1 %v5010_v38 }
  0x85   :  { %10 = vsyncpa [#allocation3], 0  ;;  %3349 = vmatpush2.bf16.msra.mxu1 %v5009_v42  ;;  %3359 = vmatprep.subr.bf16.mxu0 %v4620_v44  ;;  %v4747_v52 = vcombine.low %v208_v53, %v212_v39  ;;  %v4612_v54 = vcombine.high %v72_v45, %v76_v46  ;;  %v4740_v55 = vcombine.high %v200_v47, %v204_v49  ;;  %v64_v56 = vld [vmem:[%s7222_s1 + $0x148] sm:$0xff]  ;;  %s5317_s29 = smov [#allocation2]  }
  0x86   :  { %3400 = vmatprep.subr.bf16.mxu1 %v4748_v48  ;;  %v68_v57 = vld [vmem:[%s7222_s1 + $0x168] sm:$0xff]  ;;  %3310 = vmatmul.mubr.bf16.vlgmr.msra.gmra.mxu0 %v5507_v32  ;;  %v4611_v60 = vcombine.low %v72_v45, %v76_v46  ;;  %v4739_v61 = vcombine.low %v200_v47, %v204_v49 }
  0x87   :  { %v192_v58 = vld [vmem:[%s7222_s1 + $0x548] sm:$0xff]  ;;  %3360 = vmatpush1.bf16.msra.mxu0 %v4619_v51  ;;  %v4604_v62 = vcombine.high %v64_v56, %v68_v57  ;;  %3391 = vmatprep.mubr.bf16.mxu0 %v5464_v9  ;;  %v4603_v5 = vcombine.low %v64_v56, %v68_v57 }
  0x88   :  { %v196_v59 = vld [vmem:[%s7222_s1 + $0x568] sm:$0xff]  ;;  %3351 = vmatmul.mubr.bf16.vlgmr.msra.gmra.mxu1 %v5808_v50  ;;  %3361 = vmatprep.subr.bf16.mxu0 %v4612_v54 }
  0x89   :  { %3401 = vmatpush1.bf16.msra.mxu1 %v4747_v52  ;;  %v4732_v0 = vcombine.high %v192_v58, %v196_v59  ;;  %v56_v1 = vld [vmem:[%s7222_s1 + $0x108] sm:$0xff]  ;;  %3432 = vmatprep.mubr.bf16.mxu1 %v5475_v13  ;;  %v4731_v6 = vcombine.low %v192_v58, %v196_v59 }
  0x8a   :  { %3402 = vmatprep.subr.bf16.mxu1 %v4740_v55  ;;  %v60_v2 = vld [vmem:[%s7222_s1 + $0x128] sm:$0xff] }
  0x8b   :  { %v184_v3 = vld [vmem:[%s7222_s1 + $0x508] sm:$0xff]  ;;  %3362 = vmatpush1.bf16.msra.mxu0 %v4611_v60  ;;  %v4596_v7 = vcombine.high %v56_v1, %v60_v2  ;;  %v4595_v15 = vcombine.low %v56_v1, %v60_v2 }
  0x8c   :  { %v188_v4 = vld [vmem:[%s7222_s1 + $0x528] sm:$0xff]  ;;  %3363 = vmatprep.subr.bf16.mxu0 %v4604_v62 }
  0x8d   :  { %3403 = vmatpush1.bf16.msra.mxu1 %v4739_v61  ;;  %v4724_v8 = vcombine.high %v184_v3, %v188_v4  ;;  %v48_v10 = vld [vmem:[%s7222_s1 + $0xc8] sm:$0xff]  ;;  %v4723_v16 = vcombine.low %v184_v3, %v188_v4 }
  0x8e   :  { %3404 = vmatprep.subr.bf16.mxu1 %v4732_v0  ;;  %v52_v11 = vld [vmem:[%s7222_s1 + $0xe8] sm:$0xff] }
  0x8f   :  { %v176_v12 = vld [vmem:[%s7222_s1 + $0x4c8] sm:$0xff]  ;;  %3364 = vmatpush1.bf16.msra.mxu0 %v4603_v5  ;;  %v4588_v17 = vcombine.high %v48_v10, %v52_v11  ;;  %v4587_v24 = vcombine.low %v48_v10, %v52_v11 }
  0x90   :  { %v180_v14 = vld [vmem:[%s7222_s1 + $0x4e8] sm:$0xff]  ;;  %3365 = vmatprep.subr.bf16.mxu0 %v4596_v7 }
  0x91   :  { %3405 = vmatpush1.bf16.msra.mxu1 %v4731_v6  ;;  %v4716_v18 = vcombine.high %v176_v12, %v180_v14  ;;  %v40_v19 = vld [vmem:[%s7222_s1 + $0x88] sm:$0xff]  ;;  %v4715_v25 = vcombine.low %v176_v12, %v180_v14 }
  0x92   :  { %3406 = vmatprep.subr.bf16.mxu1 %v4724_v8  ;;  %v44_v20 = vld [vmem:[%s7222_s1 + $0xa8] sm:$0xff] }
  0x93   :  { %v168_v21 = vld [vmem:[%s7222_s1 + $0x488] sm:$0xff]  ;;  %3366 = vmatpush1.bf16.msra.mxu0 %v4595_v15  ;;  %v4580_v26 = vcombine.high %v40_v19, %v44_v20  ;;  %v4579_v34 = vcombine.low %v40_v19, %v44_v20 }
  0x94   :  { %v172_v22 = vld [vmem:[%s7222_s1 + $0x4a8] sm:$0xff]  ;;  %3367 = vmatprep.subr.bf16.mxu0 %v4588_v17 }
  0x95   :  { %3407 = vmatpush1.bf16.msra.mxu1 %v4723_v16  ;;  %v4708_v27 = vcombine.high %v168_v21, %v172_v22  ;;  %v32_v28 = vld [vmem:[%s7222_s1 + $0x48] sm:$0xff]  ;;  %v4707_v35 = vcombine.low %v168_v21, %v172_v22 }
  0x96   :  { %3408 = vmatprep.subr.bf16.mxu1 %v4716_v18  ;;  %v36_v29 = vld [vmem:[%s7222_s1 + $0x68] sm:$0xff] }
  0x97   :  { %v160_v63 = vld [vmem:[%s7222_s1 + $0x448] sm:$0xff]  ;;  %3368 = vmatpush1.bf16.msra.mxu0 %v4587_v24  ;;  %v4572_v36 = vcombine.high %v32_v28, %v36_v29  ;;  %v4571_v42 = vcombine.low %v32_v28, %v36_v29 }
  0x98   :  { %v164_v33 = vld [vmem:[%s7222_s1 + $0x468] sm:$0xff]  ;;  %3369 = vmatprep.subr.bf16.mxu0 %v4580_v26 }
  0x99   :  { %3409 = vmatpush1.bf16.msra.mxu1 %v4715_v25  ;;  %v4700_v37 = vcombine.high %v160_v63, %v164_v33  ;;  %v24_v53 = vld [vmem:[%s7222_s1 + $0x8] sm:$0xff]  ;;  %v4699_v44 = vcombine.low %v160_v63, %v164_v33 }
  0x9a   :  { %3410 = vmatprep.subr.bf16.mxu1 %v4708_v27  ;;  %v28_v38 = vld [vmem:[%s7222_s1 + $0x28] sm:$0xff] }
  0x9b   :  { %v152_v39 = vld [vmem:[%s7222_s1 + $0x408] sm:$0xff]  ;;  %3370 = vmatpush1.bf16.msra.mxu0 %v4579_v34  ;;  %v4564_v45 = vcombine.high %v24_v53, %v28_v38  ;;  %v4563_v52 = vcombine.low %v24_v53, %v28_v38 }
  0x9c   :  { %v156_v41 = vld [vmem:[%s7222_s1 + $0x428] sm:$0xff]  ;;  %3371 = vmatprep.subr.bf16.mxu0 %v4572_v36 }
  0x9d   :  { %3411 = vmatpush1.bf16.msra.mxu1 %v4707_v35  ;;  %v4692_v46 = vcombine.high %v152_v39, %v156_v41  ;;  %v144_v47 = vld [vmem:[%s7222_s1 + $0x3c8] sm:$0xff]  ;;  %v4691_v54 = vcombine.low %v152_v39, %v156_v41 }
  0x9e   :  { %3412 = vmatprep.subr.bf16.mxu1 %v4700_v37  ;;  %v148_v48 = vld [vmem:[%s7222_s1 + $0x3e8] sm:$0xff] }
  0x9f   :  { %v272_v49 = vld [vmem:[%s7222_s1 + $0x7c8] sm:$0xff]  ;;  %3372 = vmatpush1.bf16.msra.mxu0 %v4571_v42  ;;  %v4684_v55 = vcombine.high %v144_v47, %v148_v48  ;;  %v4683_v61 = vcombine.low %v144_v47, %v148_v48 }
  0xa0   :  { %v276_v51 = vld [vmem:[%s7222_s1 + $0x7e8] sm:$0xff]  ;;  %3373 = vmatprep.subr.bf16.mxu0 %v4564_v45 }
  0xa1   :  { %3413 = vmatpush1.bf16.msra.mxu1 %v4699_v44  ;;  %v4812_v56 = vcombine.high %v272_v49, %v276_v51  ;;  %v136_v57 = vld [vmem:[%s7222_s1 + $0x388] sm:$0xff]  ;;  %v4811_v62 = vcombine.low %v272_v49, %v276_v51 }
  0xa2   :  { %3414 = vmatprep.subr.bf16.mxu1 %v4692_v46  ;;  %v140_v58 = vld [vmem:[%s7222_s1 + $0x3a8] sm:$0xff] }
  0xa3   :  { %v264_v59 = vld [vmem:[%s7222_s1 + $0x788] sm:$0xff]  ;;  %3374 = vmatpush1.bf16.msra.mxu0 %v4563_v52  ;;  %v4676_v0 = vcombine.high %v136_v57, %v140_v58  ;;  %v4675_v6 = vcombine.low %v136_v57, %v140_v58 }
  0xa4   :  { %v268_v60 = vld [vmem:[%s7222_s1 + $0x7a8] sm:$0xff]  ;;  %3375 = vmatprep.subr.bf16.mxu0 %v4684_v55 }
  0xa5   :  { %3415 = vmatpush1.bf16.msra.mxu1 %v4691_v54  ;;  %v4804_v1 = vcombine.high %v264_v59, %v268_v60  ;;  %v128_v2 = vld [vmem:[%s7222_s1 + $0x348] sm:$0xff]  ;;  %v4803_v7 = vcombine.low %v264_v59, %v268_v60 }
  0xa6   :  { %3416 = vmatprep.subr.bf16.mxu1 %v4812_v56  ;;  %v132_v3 = vld [vmem:[%s7222_s1 + $0x368] sm:$0xff] }
  0xa7   :  { %v256_v4 = vld [vmem:[%s7222_s1 + $0x748] sm:$0xff]  ;;  %3376 = vmatpush2.bf16.msra.mxu0 %v4683_v61  ;;  %v4668_v8 = vcombine.high %v128_v2, %v132_v3  ;;  %v4667_v16 = vcombine.low %v128_v2, %v132_v3 }
  0xa8   :  { %v260_v5 = vld [vmem:[%s7222_s1 + $0x768] sm:$0xff]  ;;  %3377 = vmatprep.subr.bf16.mxu0 %v4676_v0 }
  0xa9   :  { %3417 = vmatpush2.bf16.msra.mxu1 %v4811_v62  ;;  %v4796_v10 = vcombine.high %v256_v4, %v260_v5  ;;  %v120_v11 = vld [vmem:[%s7222_s1 + $0x308] sm:$0xff]  ;;  %v4795_v17 = vcombine.low %v256_v4, %v260_v5 }
  0xaa   :  { %3418 = vmatprep.subr.bf16.mxu1 %v4804_v1  ;;  %v124_v12 = vld [vmem:[%s7222_s1 + $0x328] sm:$0xff] }
  0xab   :  { %v248_v14 = vld [vmem:[%s7222_s1 + $0x708] sm:$0xff]  ;;  %3378 = vmatpush2.bf16.msra.mxu0 %v4675_v6  ;;  %v4660_v18 = vcombine.high %v120_v11, %v124_v12  ;;  %v4659_v25 = vcombine.low %v120_v11, %v124_v12 }
  0xac   :  { %v252_v15 = vld [vmem:[%s7222_s1 + $0x728] sm:$0xff]  ;;  %3379 = vmatprep.subr.bf16.mxu0 %v4668_v8 }
  0xad   :  { %3419 = vmatpush2.bf16.msra.mxu1 %v4803_v7  ;;  %v4788_v19 = vcombine.high %v248_v14, %v252_v15  ;;  %v112_v20 = vld [vmem:[%s7222_s1 + $0x2c8] sm:$0xff]  ;;  %v4787_v26 = vcombine.low %v248_v14, %v252_v15 }
  0xae   :  { %3420 = vmatprep.subr.bf16.mxu1 %v4796_v10  ;;  %v116_v21 = vld [vmem:[%s7222_s1 + $0x2e8] sm:$0xff] }
  0xaf   :  { %v240_v22 = vld [vmem:[%s7222_s1 + $0x6c8] sm:$0xff]  ;;  %3380 = vmatpush2.bf16.msra.mxu0 %v4667_v16  ;;  %v4652_v27 = vcombine.high %v112_v20, %v116_v21  ;;  %v4651_v35 = vcombine.low %v112_v20, %v116_v21 }
  0xb0   :  { %v244_v24 = vld [vmem:[%s7222_s1 + $0x6e8] sm:$0xff]  ;;  %3381 = vmatprep.subr.bf16.mxu0 %v4660_v18 }
  0xb1   :  { %3421 = vmatpush2.bf16.msra.mxu1 %v4795_v17  ;;  %v4780_v28 = vcombine.high %v240_v22, %v244_v24  ;;  %v104_v29 = vld [vmem:[%s7222_s1 + $0x288] sm:$0xff]  ;;  %v4779_v36 = vcombine.low %v240_v22, %v244_v24 }
  0xb2   :  { %3422 = vmatprep.subr.bf16.mxu1 %v4788_v19  ;;  %v108_v63 = vld [vmem:[%s7222_s1 + $0x2a8] sm:$0xff] }
  0xb3   :  { %v232_v33 = vld [vmem:[%s7222_s1 + $0x688] sm:$0xff]  ;;  %3382 = vmatpush2.bf16.msra.mxu0 %v4659_v25  ;;  %v4644_v37 = vcombine.high %v104_v29, %v108_v63  ;;  %v4643_v44 = vcombine.low %v104_v29, %v108_v63 }
  0xb4   :  { %v236_v34 = vld [vmem:[%s7222_s1 + $0x6a8] sm:$0xff]  ;;  %3383 = vmatprep.subr.bf16.mxu0 %v4652_v27 }
  0xb5   :  { %3423 = vmatpush2.bf16.msra.mxu1 %v4787_v26  ;;  %v4772_v53 = vcombine.high %v232_v33, %v236_v34  ;;  %v96_v38 = vld [vmem:[%s7222_s1 + $0x248] sm:$0xff]  ;;  %v4771_v45 = vcombine.low %v232_v33, %v236_v34 }
  0xb6   :  { %3424 = vmatprep.subr.bf16.mxu1 %v4780_v28  ;;  %v100_v39 = vld [vmem:[%s7222_s1 + $0x268] sm:$0xff] }
  0xb7   :  { %v224_v41 = vld [vmem:[%s7222_s1 + $0x648] sm:$0xff]  ;;  %3384 = vmatpush2.bf16.msra.mxu0 %v4651_v35  ;;  %v4636_v46 = vcombine.high %v96_v38, %v100_v39  ;;  %v4635_v54 = vcombine.low %v96_v38, %v100_v39 }
  0xb8   :  { %v228_v42 = vld [vmem:[%s7222_s1 + $0x668] sm:$0xff]  ;;  %3385 = vmatprep.subr.bf16.mxu0 %v4644_v37 }
  0xb9   :  { %3425 = vmatpush2.bf16.msra.mxu1 %v4779_v36  ;;  %v4764_v47 = vcombine.high %v224_v41, %v228_v42  ;;  %v88_v48 = vld [vmem:[%s7222_s1 + $0x208] sm:$0xff]  ;;  %v4763_v55 = vcombine.low %v224_v41, %v228_v42 }
  0xba   :  { %3426 = vmatprep.subr.bf16.mxu1 %v4772_v53  ;;  %v92_v49 = vld [vmem:[%s7222_s1 + $0x228] sm:$0xff] }
  0xbb   :  { %v216_v51 = vld [vmem:[%s7222_s1 + $0x608] sm:$0xff]  ;;  %3386 = vmatpush2.bf16.msra.mxu0 %v4643_v44  ;;  %v4628_v56 = vcombine.high %v88_v48, %v92_v49  ;;  %v4627_v62 = vcombine.low %v88_v48, %v92_v49 }
  0xbc   :  { %v220_v52 = vld [vmem:[%s7222_s1 + $0x628] sm:$0xff]  ;;  %3387 = vmatprep.subr.bf16.mxu0 %v4636_v46 }
  0xbd   :  { %3427 = vmatpush2.bf16.msra.mxu1 %v4771_v45  ;;  %v4756_v57 = vcombine.high %v216_v51, %v220_v52  ;;  %v336_v58 = vld [vmem:[%s7222_s1 + $0x9c8] sm:$0xff]  ;;  %v4755_v0 = vcombine.low %v216_v51, %v220_v52 }
  0xbe   :  { %3428 = vmatprep.subr.bf16.mxu1 %v4764_v47  ;;  %v340_v59 = vld [vmem:[%s7222_s1 + $0x9e8] sm:$0xff] }
  0xbf   :  { %v464_v60 = vld [vmem:[%s7222_s1 + $0xdc8] sm:$0xff]  ;;  %3388 = vmatpush2.bf16.msra.mxu0 %v4635_v54  ;;  %v4876_v1 = vcombine.high %v336_v58, %v340_v59  ;;  %v4875_v7 = vcombine.low %v336_v58, %v340_v59 }
  0xc0   :  { %v468_v61 = vld [vmem:[%s7222_s1 + $0xde8] sm:$0xff]  ;;  %3389 = vmatprep.subr.bf16.mxu0 %v4628_v56 }
  0xc1   :  { %3429 = vmatpush2.bf16.msra.mxu1 %v4763_v55  ;;  %v5004_v2 = vcombine.high %v464_v60, %v468_v61  ;;  %v328_v3 = vld [vmem:[%s7222_s1 + $0x988] sm:$0xff]  ;;  %v5003_v8 = vcombine.low %v464_v60, %v468_v61 }
  0xc2   :  { %3430 = vmatprep.subr.bf16.mxu1 %v4756_v57  ;;  %v332_v4 = vld [vmem:[%s7222_s1 + $0x9a8] sm:$0xff] }
  0xc3   :  { %v456_v5 = vld [vmem:[%s7222_s1 + $0xd88] sm:$0xff]  ;;  %3390 = vmatpush2.bf16.msra.mxu0 %v4627_v62  ;;  %v4868_v10 = vcombine.high %v328_v3, %v332_v4  ;;  %v4867_v17 = vcombine.low %v328_v3, %v332_v4 }
  0xc4   :  { %v460_v6 = vld [vmem:[%s7222_s1 + $0xda8] sm:$0xff]  ;;  %3441 = vmatprep.subr.bf16.mxu0 %v4876_v1 }
  0xc5   :  { %3431 = vmatpush2.bf16.msra.mxu1 %v4755_v0  ;;  %v4996_v11 = vcombine.high %v456_v5, %v460_v6  ;;  %v320_v12 = vld [vmem:[%s7222_s1 + $0x948] sm:$0xff]  ;;  %v4995_v18 = vcombine.low %v456_v5, %v460_v6 }
  0xc6   :  { %3482 = vmatprep.subr.bf16.mxu1 %v5004_v2  ;;  %v324_v14 = vld [vmem:[%s7222_s1 + $0x968] sm:$0xff]  ;;  %3392 = vmatmul.mubr.bf16.vlgmr.msra.gmra.mxu0 %v5585_v23 }
  0xc7   :  { %v448_v15 = vld [vmem:[%s7222_s1 + $0xd48] sm:$0xff]  ;;  %3442 = vmatpush1.bf16.msra.mxu0 %v4875_v7  ;;  %v4860_v19 = vcombine.high %v320_v12, %v324_v14  ;;  %3473 = vmatprep.mubr.bf16.mxu0 %v5600_v30  ;;  %v4859_v26 = vcombine.low %v320_v12, %v324_v14 }
  0xc8   :  { %v452_v16 = vld [vmem:[%s7222_s1 + $0xd68] sm:$0xff]  ;;  %3433 = vmatmul.mubr.bf16.vlgmr.msra.gmra.mxu1 %v5604_v31  ;;  %3443 = vmatprep.subr.bf16.mxu0 %v4868_v10 }
  0xc9   :  { %3483 = vmatpush1.bf16.msra.mxu1 %v5003_v8  ;;  %v4988_v20 = vcombine.high %v448_v15, %v452_v16  ;;  %v312_v21 = vld [vmem:[%s7222_s1 + $0x908] sm:$0xff]  ;;  %3514 = vmatprep.mubr.bf16.mxu1 %v5621_v40  ;;  %v4987_v27 = vcombine.low %v448_v15, %v452_v16 }
  0xca   :  { %3484 = vmatprep.subr.bf16.mxu1 %v4996_v11  ;;  %v316_v22 = vld [vmem:[%s7222_s1 + $0x928] sm:$0xff] }
  0xcb   :  { %v440_v24 = vld [vmem:[%s7222_s1 + $0xd08] sm:$0xff]  ;;  %3444 = vmatpush1.bf16.msra.mxu0 %v4867_v17  ;;  %v4852_v28 = vcombine.high %v312_v21, %v316_v22  ;;  %v4851_v36 = vcombine.low %v312_v21, %v316_v22 }
  0xcc   :  { %v444_v25 = vld [vmem:[%s7222_s1 + $0xd28] sm:$0xff]  ;;  %3445 = vmatprep.subr.bf16.mxu0 %v4860_v19 }
  0xcd   :  { %3485 = vmatpush1.bf16.msra.mxu1 %v4995_v18  ;;  %v4980_v29 = vcombine.high %v440_v24, %v444_v25  ;;  %v304_v63 = vld [vmem:[%s7222_s1 + $0x8c8] sm:$0xff]  ;;  %v4979_v37 = vcombine.low %v440_v24, %v444_v25 }
  0xce   :  { %3486 = vmatprep.subr.bf16.mxu1 %v4988_v20  ;;  %v308_v33 = vld [vmem:[%s7222_s1 + $0x8e8] sm:$0xff] }
  0xcf   :  { %v432_v34 = vld [vmem:[%s7222_s1 + $0xcc8] sm:$0xff]  ;;  %3446 = vmatpush1.bf16.msra.mxu0 %v4859_v26  ;;  %v4844_v53 = vcombine.high %v304_v63, %v308_v33  ;;  %v4843_v45 = vcombine.low %v304_v63, %v308_v33 }
  0xd0   :  { %v436_v35 = vld [vmem:[%s7222_s1 + $0xce8] sm:$0xff]  ;;  %3447 = vmatprep.subr.bf16.mxu0 %v4852_v28 }
  0xd1   :  { %3487 = vmatpush1.bf16.msra.mxu1 %v4987_v27  ;;  %v4972_v38 = vcombine.high %v432_v34, %v436_v35  ;;  %v296_v39 = vld [vmem:[%s7222_s1 + $0x888] sm:$0xff]  ;;  %v4971_v46 = vcombine.low %v432_v34, %v436_v35 }
  0xd2   :  { %3488 = vmatprep.subr.bf16.mxu1 %v4980_v29  ;;  %v300_v41 = vld [vmem:[%s7222_s1 + $0x8a8] sm:$0xff] }
  0xd3   :  { %v424_v42 = vld [vmem:[%s7222_s1 + $0xc88] sm:$0xff]  ;;  %3448 = vmatpush1.bf16.msra.mxu0 %v4851_v36  ;;  %v4836_v47 = vcombine.high %v296_v39, %v300_v41  ;;  %v4835_v55 = vcombine.low %v296_v39, %v300_v41 }
  0xd4   :  { %v428_v44 = vld [vmem:[%s7222_s1 + $0xca8] sm:$0xff]  ;;  %3449 = vmatprep.subr.bf16.mxu0 %v4844_v53 }
  0xd5   :  { %3489 = vmatpush1.bf16.msra.mxu1 %v4979_v37  ;;  %v4964_v48 = vcombine.high %v424_v42, %v428_v44  ;;  %v288_v49 = vld [vmem:[%s7222_s1 + $0x848] sm:$0xff]  ;;  %v4963_v56 = vcombine.low %v424_v42, %v428_v44 }
  0xd6   :  { %3490 = vmatprep.subr.bf16.mxu1 %v4972_v38  ;;  %v292_v51 = vld [vmem:[%s7222_s1 + $0x868] sm:$0xff] }
  0xd7   :  { %v416_v52 = vld [vmem:[%s7222_s1 + $0xc48] sm:$0xff]  ;;  %3450 = vmatpush1.bf16.msra.mxu0 %v4843_v45  ;;  %v4828_v57 = vcombine.high %v288_v49, %v292_v51  ;;  %v4827_v0 = vcombine.low %v288_v49, %v292_v51 }
  0xd8   :  { %v420_v54 = vld [vmem:[%s7222_s1 + $0xc68] sm:$0xff]  ;;  %3451 = vmatprep.subr.bf16.mxu0 %v4836_v47 }
  0xd9   :  { %3491 = vmatpush1.bf16.msra.mxu1 %v4971_v46  ;;  %v4956_v58 = vcombine.high %v416_v52, %v420_v54  ;;  %v280_v59 = vld [vmem:[%s7222_s1 + $0x808] sm:$0xff]  ;;  %v4955_v1 = vcombine.low %v416_v52, %v420_v54 }
  0xda   :  { %3492 = vmatprep.subr.bf16.mxu1 %v4964_v48  ;;  %v284_v60 = vld [vmem:[%s7222_s1 + $0x828] sm:$0xff] }
  0xdb   :  { %v408_v61 = vld [vmem:[%s7222_s1 + $0xc08] sm:$0xff]  ;;  %3452 = vmatpush1.bf16.msra.mxu0 %v4835_v55  ;;  %v4820_v2 = vcombine.high %v280_v59, %v284_v60  ;;  %v4819_v8 = vcombine.low %v280_v59, %v284_v60 }
  0xdc   :  { %v412_v62 = vld [vmem:[%s7222_s1 + $0xc28] sm:$0xff]  ;;  %3453 = vmatprep.subr.bf16.mxu0 %v4828_v57 }
  0xdd   :  { %3493 = vmatpush1.bf16.msra.mxu1 %v4963_v56  ;;  %v4948_v3 = vcombine.high %v408_v61, %v412_v62  ;;  %v400_v4 = vld [vmem:[%s7222_s1 + $0xbc8] sm:$0xff]  ;;  %v4947_v10 = vcombine.low %v408_v61, %v412_v62 }
  0xde   :  { %3494 = vmatprep.subr.bf16.mxu1 %v4956_v58  ;;  %v404_v5 = vld [vmem:[%s7222_s1 + $0xbe8] sm:$0xff] }
  0xdf   :  { %v528_v6 = vld [vmem:[%s7222_s1 + $0xfc8] sm:$0xff]  ;;  %3454 = vmatpush1.bf16.msra.mxu0 %v4827_v0  ;;  %v4940_v11 = vcombine.high %v400_v4, %v404_v5  ;;  %v4939_v18 = vcombine.low %v400_v4, %v404_v5 }
  0xe0   :  { %v532_v7 = vld [vmem:[%s7222_s1 + $0xfe8] sm:$0xff]  ;;  %3455 = vmatprep.subr.bf16.mxu0 %v4820_v2 }
  0xe1   :  { %3495 = vmatpush1.bf16.msra.mxu1 %v4955_v1  ;;  %v5068_v12 = vcombine.high %v528_v6, %v532_v7  ;;  %v392_v14 = vld [vmem:[%s7222_s1 + $0xb88] sm:$0xff]  ;;  %v5067_v19 = vcombine.low %v528_v6, %v532_v7 }
  0xe2   :  { %3496 = vmatprep.subr.bf16.mxu1 %v4948_v3  ;;  %v396_v15 = vld [vmem:[%s7222_s1 + $0xba8] sm:$0xff] }
  0xe3   :  { %v520_v16 = vld [vmem:[%s7222_s1 + $0xf88] sm:$0xff]  ;;  %3456 = vmatpush1.bf16.msra.mxu0 %v4819_v8  ;;  %v4932_v20 = vcombine.high %v392_v14, %v396_v15  ;;  %v4931_v27 = vcombine.low %v392_v14, %v396_v15  ;;  %v81_v15 = vld [vmem:[%s7222_s1 + $0x1d0] sm:$0xff] }
  0xe4   :  { %v524_v17 = vld [vmem:[%s7222_s1 + $0xfa8] sm:$0xff]  ;;  %3457 = vmatprep.subr.bf16.mxu0 %v4940_v11 }
  0xe5   :  { %3497 = vmatpush1.bf16.msra.mxu1 %v4947_v10  ;;  %v5060_v21 = vcombine.high %v520_v16, %v524_v17  ;;  %v384_v22 = vld [vmem:[%s7222_s1 + $0xb48] sm:$0xff]  ;;  %v5059_v28 = vcombine.low %v520_v16, %v524_v17  ;;  %v85_v16 = vld [vmem:[%s7222_s1 + $0x1f0] sm:$0xff] }
  0xe6   :  { %3498 = vmatprep.subr.bf16.mxu1 %v5068_v12  ;;  %v388_v24 = vld [vmem:[%s7222_s1 + $0xb68] sm:$0xff]  ;;  %v209_v17 = vld [vmem:[%s7222_s1 + $0x5d0] sm:$0xff] }
  0xe7   :  { %v512_v25 = vld [vmem:[%s7222_s1 + $0xf48] sm:$0xff]  ;;  %3458 = vmatpush2.bf16.msra.mxu0 %v4939_v18  ;;  %v4924_v29 = vcombine.high %v384_v22, %v388_v24  ;;  %v4923_v37 = vcombine.low %v384_v22, %v388_v24  ;;  %v213_v18 = vld [vmem:[%s7222_s1 + $0x5f0] sm:$0xff]  ;;  %v6194_v22 = vld [vmem:[%s7223_s2] sm:$0xff]  ;;  %v4622_v24 = vcombine.high %v81_v15, %v85_v16 }
  0xe8   :  { %v516_v26 = vld [vmem:[%s7222_s1 + $0xf68] sm:$0xff]  ;;  %3459 = vmatprep.subr.bf16.mxu0 %v4932_v20  ;;  %v539_v20 = vsub.s32 0, %v5414_v43 }
  0xe9   :  { %3499 = vmatpush2.bf16.msra.mxu1 %v5067_v19  ;;  %v5052_v63 = vcombine.high %v512_v25, %v516_v26  ;;  %v376_v33 = vld [vmem:[%s7222_s1 + $0xb08] sm:$0xff]  ;;  %v5051_v53 = vcombine.low %v512_v25, %v516_v26  ;;  %v4750_v25 = vcombine.high %v209_v17, %v213_v18  ;;  %v543_v26 = vsub.s32 1, %v5414_v43 }
  0xea   :  { %3500 = vmatprep.subr.bf16.mxu1 %v5060_v21  ;;  %v380_v34 = vld [vmem:[%s7222_s1 + $0xb28] sm:$0xff] }
  0xeb   :  { %v504_v35 = vld [vmem:[%s7222_s1 + $0xf08] sm:$0xff]  ;;  %3460 = vmatpush2.bf16.msra.mxu0 %v4931_v27  ;;  %v4916_v38 = vcombine.high %v376_v33, %v380_v34  ;;  %v4915_v46 = vcombine.low %v376_v33, %v380_v34  ;;  %v73_v27 = vld [vmem:[%s7222_s1 + $0x190] sm:$0xff]  ;;  %v540_v33 = vrot.slane %v6194_v22, %v539_v20  ;;  %v4621_v34 = vcombine.low %v81_v15, %v85_v16 }
  0xec   :  { %v508_v36 = vld [vmem:[%s7222_s1 + $0xf28] sm:$0xff]  ;;  %3461 = vmatprep.subr.bf16.mxu0 %v4924_v29  ;;  %v201_v29 = vld [vmem:[%s7222_s1 + $0x590] sm:$0xff] }
  0xed   :  { %3501 = vmatpush2.bf16.msra.mxu1 %v5059_v28  ;;  %v5044_v39 = vcombine.high %v504_v35, %v508_v36  ;;  %v368_v41 = vld [vmem:[%s7222_s1 + $0xac8] sm:$0xff]  ;;  %v5043_v47 = vcombine.low %v504_v35, %v508_v36  ;;  %v77_v28 = vld [vmem:[%s7222_s1 + $0x1b0] sm:$0xff]  ;;  %v4749_v35 = vcombine.low %v209_v17, %v213_v18 }
  0xee   :  { %3502 = vmatprep.subr.bf16.mxu1 %v5052_v63  ;;  %v372_v42 = vld [vmem:[%s7222_s1 + $0xae8] sm:$0xff]  ;;  %v205_v63 = vld [vmem:[%s7222_s1 + $0x5b0] sm:$0xff]  ;;  %v4614_v36 = vcombine.high %v73_v27, %v77_v28 }
  0xef   :  { %v496_v44 = vld [vmem:[%s7222_s1 + $0xec8] sm:$0xff]  ;;  %3462 = vmatpush2.bf16.msra.mxu0 %v4923_v37  ;;  %v4908_v48 = vcombine.high %v368_v41, %v372_v42  ;;  %v4907_v56 = vcombine.low %v368_v41, %v372_v42  ;;  %v544_v37 = vrot.slane %v6194_v22, %v543_v26  ;;  %v193_v42 = vld [vmem:[%s7222_s1 + $0x550] sm:$0xff] }
  0xf0   :  { %v500_v45 = vld [vmem:[%s7222_s1 + $0xee8] sm:$0xff]  ;;  %3463 = vmatprep.subr.bf16.mxu0 %v4916_v38  ;;  %v65_v38 = vld [vmem:[%s7222_s1 + $0x150] sm:$0xff] }
  0xf1   :  { %3503 = vmatpush2.bf16.msra.mxu1 %v5051_v53  ;;  %v5036_v49 = vcombine.high %v496_v44, %v500_v45  ;;  %v360_v51 = vld [vmem:[%s7222_s1 + $0xa88] sm:$0xff]  ;;  %v5035_v57 = vcombine.low %v496_v44, %v500_v45  ;;  %v4742_v53 = vcombine.high %v201_v29, %v205_v63  ;;  %v197_v44 = vld [vmem:[%s7222_s1 + $0x570] sm:$0xff] }
  0xf2   :  { %3504 = vmatprep.subr.bf16.mxu1 %v5044_v39  ;;  %v364_v52 = vld [vmem:[%s7222_s1 + $0xaa8] sm:$0xff]  ;;  %v69_v39 = vld [vmem:[%s7222_s1 + $0x170] sm:$0xff] }
  0xf3   :  { %v488_v54 = vld [vmem:[%s7222_s1 + $0xe88] sm:$0xff]  ;;  %3464 = vmatpush2.bf16.msra.mxu0 %v4915_v46  ;;  %v4900_v58 = vcombine.high %v360_v51, %v364_v52  ;;  %v4899_v1 = vcombine.low %v360_v51, %v364_v52  ;;  %v4606_v51 = vcombine.high %v65_v38, %v69_v39  ;;  %v41_v17 = vld [vmem:[%s7222_s1 + $0x90] sm:$0xff] }
  0xf4   :  { %v492_v55 = vld [vmem:[%s7222_s1 + $0xea8] sm:$0xff]  ;;  %3465 = vmatprep.subr.bf16.mxu0 %v4908_v48  ;;  %v45_v18 = vld [vmem:[%s7222_s1 + $0xb0] sm:$0xff] }
  0xf5   :  { %3505 = vmatpush2.bf16.msra.mxu1 %v5043_v47  ;;  %v5028_v59 = vcombine.high %v488_v54, %v492_v55  ;;  %v352_v60 = vld [vmem:[%s7222_s1 + $0xa48] sm:$0xff]  ;;  %v5027_v2 = vcombine.low %v488_v54, %v492_v55  ;;  %v4613_v47 = vcombine.low %v73_v27, %v77_v28  ;;  %v173_v20 = vld [vmem:[%s7222_s1 + $0x4b0] sm:$0xff] }
  0xf6   :  { %3506 = vmatprep.subr.bf16.mxu1 %v5036_v49  ;;  %v356_v61 = vld [vmem:[%s7222_s1 + $0xa68] sm:$0xff]  ;;  %v4741_v49 = vcombine.low %v201_v29, %v205_v63  ;;  %v33_v27 = vld [vmem:[%s7222_s1 + $0x50] sm:$0xff] }
  0xf7   :  { %v480_v62 = vld [vmem:[%s7222_s1 + $0xe48] sm:$0xff]  ;;  %3466 = vmatpush2.bf16.msra.mxu0 %v4907_v56  ;;  %v4892_v3 = vcombine.high %v352_v60, %v356_v61  ;;  %v4891_v10 = vcombine.low %v352_v60, %v356_v61  ;;  %v4734_v56 = vcombine.high %v193_v42, %v197_v44  ;;  %v185_v60 = vld [vmem:[%s7222_s1 + $0x510] sm:$0xff] }
  0xf8   :  { %v484_v0 = vld [vmem:[%s7222_s1 + $0xe68] sm:$0xff]  ;;  %3467 = vmatprep.subr.bf16.mxu0 %v4900_v58  ;;  %v61_v58 = vld [vmem:[%s7222_s1 + $0x130] sm:$0xff] }
  0xf9   :  { %3507 = vmatpush2.bf16.msra.mxu1 %v5035_v57  ;;  %v5020_v4 = vcombine.high %v480_v62, %v484_v0  ;;  %v344_v5 = vld [vmem:[%s7222_s1 + $0xa08] sm:$0xff]  ;;  %v5019_v11 = vcombine.low %v480_v62, %v484_v0  ;;  %v57_v57 = vld [vmem:[%s7222_s1 + $0x110] sm:$0xff] }
  0xfa   :  { %3508 = vmatprep.subr.bf16.mxu1 %v5028_v59  ;;  %v348_v6 = vld [vmem:[%s7222_s1 + $0xa28] sm:$0xff]  ;;  %v189_v61 = vld [vmem:[%s7222_s1 + $0x530] sm:$0xff] }
  0xfb   :  { %v472_v7 = vld [vmem:[%s7222_s1 + $0xe08] sm:$0xff]  ;;  %3468 = vmatpush2.bf16.msra.mxu0 %v4899_v1  ;;  %v4884_v12 = vcombine.high %v344_v5, %v348_v6  ;;  %v4883_v19 = vcombine.low %v344_v5, %v348_v6  ;;  %v4605_v1 = vcombine.low %v65_v38, %v69_v39  ;;  %v4726_v6 = vcombine.high %v185_v60, %v189_v61  ;;  %v37_v28 = vld [vmem:[%s7222_s1 + $0x70] sm:$0xff] }
  0xfc   :  { %v476_v8 = vld [vmem:[%s7222_s1 + $0xe28] sm:$0xff]  ;;  %3469 = vmatprep.subr.bf16.mxu0 %v4892_v3  ;;  %v4733_v3 = vcombine.low %v193_v42, %v197_v44  ;;  %v161_v29 = vld [vmem:[%s7222_s1 + $0x450] sm:$0xff] }
  0xfd   :  { %3509 = vmatpush2.bf16.msra.mxu1 %v5027_v2  ;;  %v5012_v14 = vcombine.high %v472_v7, %v476_v8  ;;  %v5011_v21 = vcombine.low %v472_v7, %v476_v8  ;;  %v49_v7 = vld [vmem:[%s7222_s1 + $0xd0] sm:$0xff] }
  0xfe   :  { %3510 = vmatprep.subr.bf16.mxu1 %v5020_v4  ;;  %v4598_v4 = vcombine.high %v57_v57, %v61_v58  ;;  %v53_v8 = vld [vmem:[%s7222_s1 + $0xf0] sm:$0xff] }
  0xff   :  { %3470 = vmatpush2.bf16.msra.mxu0 %v4891_v10  ;;  %v177_v10 = vld [vmem:[%s7222_s1 + $0x4d0] sm:$0xff]  ;;  %v4590_v15 = vcombine.high %v49_v7, %v53_v8 }
 0x100   :  { %3471 = vmatprep.subr.bf16.mxu0 %v4884_v12  ;;  %v4597_v12 = vcombine.low %v57_v57, %v61_v58  ;;  %v165_v63 = vld [vmem:[%s7222_s1 + $0x470] sm:$0xff] }
 0x101   :  { %3511 = vmatpush2.bf16.msra.mxu1 %v5019_v11  ;;  %v181_v11 = vld [vmem:[%s7222_s1 + $0x4f0] sm:$0xff]  ;;  %v4701_v42 = vcombine.low %v161_v29, %v165_v63 }
 0x102   :  { %3512 = vmatprep.subr.bf16.mxu1 %v5012_v14  ;;  %v4725_v14 = vcombine.low %v185_v60, %v189_v61  ;;  %v4718_v16 = vcombine.high %v177_v10, %v181_v11  ;;  %v153_v38 = vld [vmem:[%s7222_s1 + $0x410] sm:$0xff] }
 0x103   :  { %3472 = vmatpush2.bf16.msra.mxu0 %v4883_v19  ;;  %v169_v19 = vld [vmem:[%s7222_s1 + $0x490] sm:$0xff] }
 0x104   :  { %3523 = vmatprep.subr.bf16.mxu0 %v4622_v24  ;;  %v4717_v24 = vcombine.low %v177_v10, %v181_v11  ;;  %v4710_v26 = vcombine.high %v169_v19, %v173_v20  ;;  %v157_v39 = vld [vmem:[%s7222_s1 + $0x430] sm:$0xff] }
 0x105   :  { %3513 = vmatpush2.bf16.msra.mxu1 %v5011_v21  ;;  %v4589_v21 = vcombine.low %v49_v7, %v53_v8  ;;  %v137_v57 = vld [vmem:[%s7222_s1 + $0x390] sm:$0xff] }
 0x106   :  { %3564 = vmatprep.subr.bf16.mxu1 %v4750_v25  ;;  %v3229_v41 = vpop.f32.mrf.mxu0  ;;  %3474 = vmatmul.mubr.bf16.vlgmr.msra.gmra.mxu0 %v5507_v32  ;;  %v4582_v25 = vcombine.high %v41_v17, %v45_v18  ;;  %v141_v58 = vld [vmem:[%s7222_s1 + $0x3b0] sm:$0xff] }
 0x107   :  { %v3230_v45 = vadd.f32 %v3229_v41, %v540_v33  ;;  %3524 = vmatpush1.bf16.msra.mxu0 %v4621_v34  ;;  %3555 = vmatprep.mubr.bf16.mxu0 %v5464_v9  ;;  %v4581_v33 = vcombine.low %v41_v17, %v45_v18  ;;  %v4709_v34 = vcombine.low %v169_v19, %v173_v20  ;;  %v269_v60 = vld [vmem:[%s7222_s1 + $0x7b0] sm:$0xff] }
 0x108   :  { %v3270_v46 = vpop.f32.mrf.mxu1  ;;  %3515 = vmatmul.mubr.bf16.vlgmr.msra.gmra.mxu1 %v5808_v50  ;;  %v3231_v48 = vpop.f32.mrf.mxu0  ;;  %3525 = vmatprep.subr.bf16.mxu0 %v4614_v36  ;;  %v4702_v36 = vcombine.high %v161_v29, %v165_v63  ;;  %v4573_v41 = vcombine.low %v33_v27, %v37_v28  ;;  %v4677_v7 = vcombine.low %v137_v57, %v141_v58 }
 0x109   :  { %3565 = vmatpush1.bf16.msra.mxu1 %v4749_v35  ;;  %v6225_v52 = vadd.f32 %v3270_v46, %v3230_v45  ;;  %v3232_v54 = vadd.f32 %v3231_v48, %v544_v37  ;;  %3596 = vmatprep.mubr.bf16.mxu1 %v5475_v13  ;;  %v4574_v35 = vcombine.high %v33_v27, %v37_v28  ;;  %v25_v37 = vld [vmem:[%s7222_s1 + $0x10] sm:$0xff] }
 0x10a   :  { %v3272_v55 = vpop.f32.mrf.mxu1  ;;  %3566 = vmatprep.subr.bf16.mxu1 %v4742_v53  ;;  %v3233_v59 = vpop.f32.mrf.mxu0  ;;  %v29_v53 = vld [vmem:[%s7222_s1 + $0x30] sm:$0xff]  ;;  %v4694_v45 = vcombine.high %v153_v38, %v157_v39 }
 0x10b   :  { %v6241_v62 = vadd.f32 %v3272_v55, %v3232_v54  ;;  %3526 = vmatpush1.bf16.msra.mxu0 %v4613_v47  ;;  %v4566_v44 = vcombine.high %v25_v37, %v29_v53  ;;  %v145_v46 = vld [vmem:[%s7222_s1 + $0x3d0] sm:$0xff]  ;;  %v4693_v54 = vcombine.low %v153_v38, %v157_v39 }
 0x10c   :  { %v3274_v0 = vpop.f32.mrf.mxu1  ;;  %v3234_v2 = vpop.f32.mrf.mxu0  ;;  %3527 = vmatprep.subr.bf16.mxu0 %v4606_v51  ;;  %v149_v47 = vld [vmem:[%s7222_s1 + $0x3f0] sm:$0xff]  ;;  %v4565_v51 = vcombine.low %v25_v37, %v29_v53 }
 0x10d   :  { %3567 = vmatpush1.bf16.msra.mxu1 %v4741_v49  ;;  %v273_v48 = vld [vmem:[%s7222_s1 + $0x7d0] sm:$0xff]  ;;  %v4686_v55 = vcombine.high %v145_v46, %v149_v47  ;;  %v4685_v61 = vcombine.low %v145_v46, %v149_v47 }
 0x10e   :  { %v3275_v5 = vpop.f32.mrf.mxu1  ;;  %3568 = vmatprep.subr.bf16.mxu1 %v4734_v56  ;;  %v277_v49 = vld [vmem:[%s7222_s1 + $0x7f0] sm:$0xff] }
 0x10f   :  { %3528 = vmatpush1.bf16.msra.mxu0 %v4605_v1  ;;  %v4814_v56 = vcombine.high %v273_v48, %v277_v49  ;;  %v265_v59 = vld [vmem:[%s7222_s1 + $0x790] sm:$0xff]  ;;  %v4813_v0 = vcombine.low %v273_v48, %v277_v49  ;;  %v4678_v1 = vcombine.high %v137_v57, %v141_v58 }
 0x110   :  { %3529 = vmatprep.subr.bf16.mxu0 %v4598_v4  ;;  %v4806_v2 = vcombine.high %v265_v59, %v269_v60  ;;  %v133_v4 = vld [vmem:[%s7222_s1 + $0x370] sm:$0xff]  ;;  %v4805_v8 = vcombine.low %v265_v59, %v269_v60 }
 0x111   :  { %3569 = vmatpush1.bf16.msra.mxu1 %v4733_v3  ;;  %v129_v3 = vld [vmem:[%s7222_s1 + $0x350] sm:$0xff] }
 0x112   :  { %3570 = vmatprep.subr.bf16.mxu1 %v4726_v6  ;;  %v257_v5 = vld [vmem:[%s7222_s1 + $0x750] sm:$0xff]  ;;  %v4670_v10 = vcombine.high %v129_v3, %v133_v4  ;;  %v4669_v17 = vcombine.low %v129_v3, %v133_v4 }
 0x113   :  { %3530 = vmatpush1.bf16.msra.mxu0 %v4597_v12  ;;  %v261_v6 = vld [vmem:[%s7222_s1 + $0x770] sm:$0xff] }
 0x114   :  { %3531 = vmatprep.subr.bf16.mxu0 %v4590_v15  ;;  %v4798_v11 = vcombine.high %v257_v5, %v261_v6  ;;  %v121_v12 = vld [vmem:[%s7222_s1 + $0x310] sm:$0xff]  ;;  %v4797_v18 = vcombine.low %v257_v5, %v261_v6 }
 0x115   :  { %3571 = vmatpush1.bf16.msra.mxu1 %v4725_v14  ;;  %v125_v14 = vld [vmem:[%s7222_s1 + $0x330] sm:$0xff] }
 0x116   :  { %3572 = vmatprep.subr.bf16.mxu1 %v4718_v16  ;;  %v249_v15 = vld [vmem:[%s7222_s1 + $0x710] sm:$0xff]  ;;  %v4662_v19 = vcombine.high %v121_v12, %v125_v14  ;;  %v4661_v27 = vcombine.low %v121_v12, %v125_v14 }
 0x117   :  { %3532 = vmatpush1.bf16.msra.mxu0 %v4589_v21  ;;  %v253_v16 = vld [vmem:[%s7222_s1 + $0x730] sm:$0xff] }
 0x118   :  { %3533 = vmatprep.subr.bf16.mxu0 %v4582_v25  ;;  %v4790_v20 = vcombine.high %v249_v15, %v253_v16  ;;  %v113_v21 = vld [vmem:[%s7222_s1 + $0x2d0] sm:$0xff]  ;;  %v4789_v28 = vcombine.low %v249_v15, %v253_v16 }
 0x119   :  { %3573 = vmatpush1.bf16.msra.mxu1 %v4717_v24  ;;  %v117_v24 = vld [vmem:[%s7222_s1 + $0x2f0] sm:$0xff] }
 0x11a   :  { %3574 = vmatprep.subr.bf16.mxu1 %v4710_v26  ;;  %v241_v25 = vld [vmem:[%s7222_s1 + $0x6d0] sm:$0xff]  ;;  %v4654_v29 = vcombine.high %v113_v21, %v117_v24  ;;  %v4653_v37 = vcombine.low %v113_v21, %v117_v24 }
 0x11b   :  { %3534 = vmatpush1.bf16.msra.mxu0 %v4581_v33  ;;  %v245_v26 = vld [vmem:[%s7222_s1 + $0x6f0] sm:$0xff] }
 0x11c   :  { %3535 = vmatprep.subr.bf16.mxu0 %v4574_v35  ;;  %v4782_v63 = vcombine.high %v241_v25, %v245_v26  ;;  %v105_v33 = vld [vmem:[%s7222_s1 + $0x290] sm:$0xff]  ;;  %v4781_v53 = vcombine.low %v241_v25, %v245_v26 }
 0x11d   :  { %3575 = vmatpush1.bf16.msra.mxu1 %v4709_v34  ;;  %v109_v34 = vld [vmem:[%s7222_s1 + $0x2b0] sm:$0xff] }
 0x11e   :  { %3576 = vmatprep.subr.bf16.mxu1 %v4702_v36  ;;  %v233_v35 = vld [vmem:[%s7222_s1 + $0x690] sm:$0xff]  ;;  %v4646_v38 = vcombine.high %v105_v33, %v109_v34  ;;  %v4645_v46 = vcombine.low %v105_v33, %v109_v34 }
 0x11f   :  { %3536 = vmatpush1.bf16.msra.mxu0 %v4573_v41  ;;  %v237_v36 = vld [vmem:[%s7222_s1 + $0x6b0] sm:$0xff] }
 0x120   :  { %3537 = vmatprep.subr.bf16.mxu0 %v4566_v44  ;;  %v4774_v39 = vcombine.high %v233_v35, %v237_v36  ;;  %v97_v41 = vld [vmem:[%s7222_s1 + $0x250] sm:$0xff]  ;;  %v4773_v47 = vcombine.low %v233_v35, %v237_v36 }
 0x121   :  { %3577 = vmatpush1.bf16.msra.mxu1 %v4701_v42  ;;  %v101_v42 = vld [vmem:[%s7222_s1 + $0x270] sm:$0xff] }
 0x122   :  { %3578 = vmatprep.subr.bf16.mxu1 %v4694_v45  ;;  %v225_v44 = vld [vmem:[%s7222_s1 + $0x650] sm:$0xff]  ;;  %v4638_v48 = vcombine.high %v97_v41, %v101_v42  ;;  %v4637_v57 = vcombine.low %v97_v41, %v101_v42 }
 0x123   :  { %3538 = vmatpush1.bf16.msra.mxu0 %v4565_v51  ;;  %v229_v45 = vld [vmem:[%s7222_s1 + $0x670] sm:$0xff] }
 0x124   :  { %3539 = vmatprep.subr.bf16.mxu0 %v4686_v55  ;;  %v4766_v49 = vcombine.high %v225_v44, %v229_v45  ;;  %v89_v51 = vld [vmem:[%s7222_s1 + $0x210] sm:$0xff]  ;;  %v4765_v58 = vcombine.low %v225_v44, %v229_v45 }
 0x125   :  { %3579 = vmatpush1.bf16.msra.mxu1 %v4693_v54  ;;  %v93_v54 = vld [vmem:[%s7222_s1 + $0x230] sm:$0xff] }
 0x126   :  { %3580 = vmatprep.subr.bf16.mxu1 %v4814_v56  ;;  %v217_v55 = vld [vmem:[%s7222_s1 + $0x610] sm:$0xff]  ;;  %v4630_v59 = vcombine.high %v89_v51, %v93_v54  ;;  %v4629_v3 = vcombine.low %v89_v51, %v93_v54 }
 0x127   :  { %3540 = vmatpush2.bf16.msra.mxu0 %v4685_v61  ;;  %v221_v56 = vld [vmem:[%s7222_s1 + $0x630] sm:$0xff] }
 0x128   :  { %3541 = vmatprep.subr.bf16.mxu0 %v4678_v1  ;;  %v4758_v60 = vcombine.high %v217_v55, %v221_v56  ;;  %v337_v61 = vld [vmem:[%s7222_s1 + $0x9d0] sm:$0xff]  ;;  %v4757_v4 = vcombine.low %v217_v55, %v221_v56 }
 0x129   :  { %3581 = vmatpush2.bf16.msra.mxu1 %v4813_v0  ;;  %v341_v0 = vld [vmem:[%s7222_s1 + $0x9f0] sm:$0xff] }
 0x12a   :  { %3582 = vmatprep.subr.bf16.mxu1 %v4806_v2  ;;  %v465_v1 = vld [vmem:[%s7222_s1 + $0xdd0] sm:$0xff]  ;;  %v4878_v5 = vcombine.high %v337_v61, %v341_v0  ;;  %v4877_v12 = vcombine.low %v337_v61, %v341_v0 }
 0x12b   :  { %3542 = vmatpush2.bf16.msra.mxu0 %v4677_v7  ;;  %v469_v2 = vld [vmem:[%s7222_s1 + $0xdf0] sm:$0xff] }
 0x12c   :  { %3543 = vmatprep.subr.bf16.mxu0 %v4670_v10  ;;  %v5006_v6 = vcombine.high %v465_v1, %v469_v2  ;;  %v329_v7 = vld [vmem:[%s7222_s1 + $0x990] sm:$0xff]  ;;  %v5005_v14 = vcombine.low %v465_v1, %v469_v2 }
 0x12d   :  { %3583 = vmatpush2.bf16.msra.mxu1 %v4805_v8  ;;  %v333_v8 = vld [vmem:[%s7222_s1 + $0x9b0] sm:$0xff] }
 0x12e   :  { %3584 = vmatprep.subr.bf16.mxu1 %v4798_v11  ;;  %v457_v10 = vld [vmem:[%s7222_s1 + $0xd90] sm:$0xff]  ;;  %v4870_v15 = vcombine.high %v329_v7, %v333_v8  ;;  %v4869_v26 = vcombine.low %v329_v7, %v333_v8 }
 0x12f   :  { %3544 = vmatpush2.bf16.msra.mxu0 %v4669_v17  ;;  %v461_v11 = vld [vmem:[%s7222_s1 + $0xdb0] sm:$0xff] }
 0x130   :  { %3545 = vmatprep.subr.bf16.mxu0 %v4662_v19  ;;  %v4998_v16 = vcombine.high %v457_v10, %v461_v11  ;;  %v321_v17 = vld [vmem:[%s7222_s1 + $0x950] sm:$0xff] }
 0x131   :  { %3585 = vmatpush2.bf16.msra.mxu1 %v4797_v18  ;;  %v325_v18 = vld [vmem:[%s7222_s1 + $0x970] sm:$0xff] }
 0x132   :  { %3586 = vmatprep.subr.bf16.mxu1 %v4790_v20  ;;  %v449_v20 = vld [vmem:[%s7222_s1 + $0xd50] sm:$0xff]  ;;  %v4861_v41 = vcombine.low %v321_v17, %v325_v18 }
 0x133   :  { %3546 = vmatpush2.bf16.msra.mxu0 %v4661_v27  ;;  %v453_v21 = vld [vmem:[%s7222_s1 + $0xd70] sm:$0xff] }
 0x134   :  { %3547 = vmatprep.subr.bf16.mxu0 %v4654_v29  ;;  %v4862_v29 = vcombine.high %v321_v17, %v325_v18  ;;  %v4990_v35 = vcombine.high %v449_v20, %v453_v21  ;;  %v317_v36 = vld [vmem:[%s7222_s1 + $0x930] sm:$0xff]  ;;  %v4989_v44 = vcombine.low %v449_v20, %v453_v21 }
 0x135   :  { %3587 = vmatpush2.bf16.msra.mxu1 %v4789_v28  ;;  %v4997_v28 = vcombine.low %v457_v10, %v461_v11  ;;  %v433_v51 = vld [vmem:[%s7222_s1 + $0xcd0] sm:$0xff] }
 0x136   :  { %3588 = vmatprep.subr.bf16.mxu1 %v4782_v63  ;;  %v437_v54 = vld [vmem:[%s7222_s1 + $0xcf0] sm:$0xff] }
 0x137   :  { %3548 = vmatpush2.bf16.msra.mxu0 %v4653_v37  ;;  %v425_v61 = vld [vmem:[%s7222_s1 + $0xc90] sm:$0xff]  ;;  %v4973_v2 = vcombine.low %v433_v51, %v437_v54 }
 0x138   :  { %3549 = vmatprep.subr.bf16.mxu0 %v4646_v38  ;;  %v429_v0 = vld [vmem:[%s7222_s1 + $0xcb0] sm:$0xff] }
 0x139   :  { %3589 = vmatpush2.bf16.msra.mxu1 %v4781_v53  ;;  %v441_v53 = vld [vmem:[%s7222_s1 + $0xd10] sm:$0xff]  ;;  %v4965_v11 = vcombine.low %v425_v61, %v429_v0 }
 0x13a   :  { %3590 = vmatprep.subr.bf16.mxu1 %v4774_v39  ;;  %v417_v7 = vld [vmem:[%s7222_s1 + $0xc50] sm:$0xff] }
 0x13b   :  { %3550 = vmatpush2.bf16.msra.mxu0 %v4645_v46  ;;  %v421_v8 = vld [vmem:[%s7222_s1 + $0xc70] sm:$0xff] }
 0x13c   :  { %3551 = vmatprep.subr.bf16.mxu0 %v4638_v48  ;;  %v305_v48 = vld [vmem:[%s7222_s1 + $0x8d0] sm:$0xff]  ;;  %v4957_v20 = vcombine.low %v417_v7, %v421_v8 }
 0x13d   :  { %3591 = vmatpush2.bf16.msra.mxu1 %v4773_v47  ;;  %v409_v17 = vld [vmem:[%s7222_s1 + $0xc10] sm:$0xff] }
 0x13e   :  { %3592 = vmatprep.subr.bf16.mxu1 %v4766_v49  ;;  %v309_v49 = vld [vmem:[%s7222_s1 + $0x8f0] sm:$0xff] }
 0x13f   :  { %3552 = vmatpush2.bf16.msra.mxu0 %v4637_v57  ;;  %v4846_v57 = vcombine.high %v305_v48, %v309_v49  ;;  %v4845_v1 = vcombine.low %v305_v48, %v309_v49  ;;  %v413_v18 = vld [vmem:[%s7222_s1 + $0xc30] sm:$0xff] }
 0x140   :  { %3553 = vmatprep.subr.bf16.mxu0 %v4630_v59  ;;  %v297_v59 = vld [vmem:[%s7222_s1 + $0x890] sm:$0xff] }
 0x141   :  { %3593 = vmatpush2.bf16.msra.mxu1 %v4765_v58  ;;  %v4974_v58 = vcombine.high %v433_v51, %v437_v54 }
 0x142   :  { %3594 = vmatprep.subr.bf16.mxu1 %v4758_v60  ;;  %v301_v60 = vld [vmem:[%s7222_s1 + $0x8b0] sm:$0xff] }
 0x143   :  { %3554 = vmatpush2.bf16.msra.mxu0 %v4629_v3  ;;  %v4838_v3 = vcombine.high %v297_v59, %v301_v60  ;;  %v4837_v10 = vcombine.low %v297_v59, %v301_v60 }
 0x144   :  { %3605 = vmatprep.subr.bf16.mxu0 %v4878_v5  ;;  %v289_v5 = vld [vmem:[%s7222_s1 + $0x850] sm:$0xff] }
 0x145   :  { %3595 = vmatpush2.bf16.msra.mxu1 %v4757_v4  ;;  %v4966_v4 = vcombine.high %v425_v61, %v429_v0 }
 0x146   :  { %3646 = vmatprep.subr.bf16.mxu1 %v5006_v6  ;;  %v3311_v19 = vpop.f32.mrf.mxu0  ;;  %3556 = vmatmul.mubr.bf16.vlgmr.msra.gmra.mxu0 %v5585_v23  ;;  %v293_v6 = vld [vmem:[%s7222_s1 + $0x870] sm:$0xff] }
 0x147   :  { %v3312_v24 = vadd.f32 %v3311_v19, %v6225_v52  ;;  %3606 = vmatpush1.bf16.msra.mxu0 %v4877_v12  ;;  %v313_v52 = vld [vmem:[%s7222_s1 + $0x910] sm:$0xff]  ;;  %3637 = vmatprep.mubr.bf16.mxu0 %v5600_v30  ;;  %v4830_v12 = vcombine.high %v289_v5, %v293_v6  ;;  %v4829_v19 = vcombine.low %v289_v5, %v293_v6 }
 0x148   :  { %v3352_v25 = vpop.f32.mrf.mxu1  ;;  %3597 = vmatmul.mubr.bf16.vlgmr.msra.gmra.mxu1 %v5604_v31  ;;  %v3313_v27 = vpop.f32.mrf.mxu0  ;;  %3607 = vmatprep.subr.bf16.mxu0 %v4870_v15  ;;  %v4854_v45 = vcombine.high %v313_v52, %v317_v36  ;;  %v4853_v55 = vcombine.low %v313_v52, %v317_v36  ;;  %v281_v15 = vld [vmem:[%s7222_s1 + $0x810] sm:$0xff] }
 0x149   :  { %3647 = vmatpush1.bf16.msra.mxu1 %v5005_v14  ;;  %v6426_v63 = vadd.f32 %v3352_v25, %v3312_v24  ;;  %v3314_v33 = vadd.f32 %v3313_v27, %v6241_v62  ;;  %v445_v62 = vld [vmem:[%s7222_s1 + $0xd30] sm:$0xff]  ;;  %3678 = vmatprep.mubr.bf16.mxu1 %v5621_v40  ;;  %v4958_v14 = vcombine.high %v417_v7, %v421_v8 }
 0x14a   :  { %v3354_v34 = vpop.f32.mrf.mxu1  ;;  %3648 = vmatprep.subr.bf16.mxu1 %v4998_v16  ;;  %v3315_v37 = vpop.f32.mrf.mxu0  ;;  %v4982_v47 = vcombine.high %v441_v53, %v445_v62  ;;  %v4981_v56 = vcombine.low %v441_v53, %v445_v62  ;;  %v285_v16 = vld [vmem:[%s7222_s1 + $0x830] sm:$0xff]  ;;  %v4950_v24 = vcombine.high %v409_v17, %v413_v18 }
 0x14b   :  { %v6443_v38 = vadd.f32 %v3354_v34, %v3314_v33  ;;  %3608 = vmatpush1.bf16.msra.mxu0 %v4869_v26  ;;  %v4822_v21 = vcombine.high %v281_v15, %v285_v16  ;;  %v401_v25 = vld [vmem:[%s7222_s1 + $0xbd0] sm:$0xff]  ;;  %v4949_v33 = vcombine.low %v409_v17, %v413_v18 }
 0x14c   :  { %v3356_v39 = vpop.f32.mrf.mxu1  ;;  %v3316_v42 = vpop.f32.mrf.mxu0  ;;  %3609 = vmatprep.subr.bf16.mxu0 %v4862_v29  ;;  %v405_v26 = vld [vmem:[%s7222_s1 + $0xbf0] sm:$0xff]  ;;  %v4821_v29 = vcombine.low %v281_v15, %v285_v16 }
 0x14d   :  { %3649 = vmatpush1.bf16.msra.mxu1 %v4997_v28  ;;  %v529_v27 = vld [vmem:[%s7222_s1 + $0xfd0] sm:$0xff]  ;;  %v4942_v34 = vcombine.high %v401_v25, %v405_v26  ;;  %v4941_v62 = vcombine.low %v401_v25, %v405_v26 }
 0x14e   :  { %v3357_v46 = vpop.f32.mrf.mxu1  ;;  %3650 = vmatprep.subr.bf16.mxu1 %v4990_v35  ;;  %v533_v28 = vld [vmem:[%s7222_s1 + $0xff0] sm:$0xff] }
 0x14f   :  { %3610 = vmatpush1.bf16.msra.mxu0 %v4861_v41  ;;  %v5070_v35 = vcombine.high %v529_v27, %v533_v28  ;;  %v393_v52 = vld [vmem:[%s7222_s1 + $0xb90] sm:$0xff]  ;;  %v5069_v39 = vcombine.low %v529_v27, %v533_v28 }
 0x150   :  { %3611 = vmatprep.subr.bf16.mxu0 %v4854_v45  ;;  %v397_v36 = vld [vmem:[%s7222_s1 + $0xbb0] sm:$0xff] }
 0x151   :  { %3651 = vmatpush1.bf16.msra.mxu1 %v4989_v44  ;;  %v521_v37 = vld [vmem:[%s7222_s1 + $0xf90] sm:$0xff]  ;;  %v4934_v41 = vcombine.high %v393_v52, %v397_v36  ;;  %v4933_v48 = vcombine.low %v393_v52, %v397_v36 }
 0x152   :  { %3652 = vmatprep.subr.bf16.mxu1 %v4982_v47  ;;  %v525_v53 = vld [vmem:[%s7222_s1 + $0xfb0] sm:$0xff] }
 0x153   :  { %3612 = vmatpush1.bf16.msra.mxu0 %v4853_v55  ;;  %v5062_v42 = vcombine.high %v521_v37, %v525_v53  ;;  %v385_v44 = vld [vmem:[%s7222_s1 + $0xb50] sm:$0xff]  ;;  %v5061_v49 = vcombine.low %v521_v37, %v525_v53 }
 0x154   :  { %3613 = vmatprep.subr.bf16.mxu0 %v4846_v57  ;;  %v389_v45 = vld [vmem:[%s7222_s1 + $0xb70] sm:$0xff] }
 0x155   :  { %3653 = vmatpush1.bf16.msra.mxu1 %v4981_v56  ;;  %v513_v46 = vld [vmem:[%s7222_s1 + $0xf50] sm:$0xff]  ;;  %v4926_v51 = vcombine.high %v385_v44, %v389_v45  ;;  %v4925_v59 = vcombine.low %v385_v44, %v389_v45  ;;  %v547_v45 = vsub.s32 2, %v5414_v43 }
 0x156   :  { %3654 = vmatprep.subr.bf16.mxu1 %v4974_v58  ;;  %v517_v47 = vld [vmem:[%s7222_s1 + $0xf70] sm:$0xff] }
 0x157   :  { %3614 = vmatpush1.bf16.msra.mxu0 %v4845_v1  ;;  %v5054_v54 = vcombine.high %v513_v46, %v517_v47  ;;  %v377_v55 = vld [vmem:[%s7222_s1 + $0xb10] sm:$0xff]  ;;  %v5053_v60 = vcombine.low %v513_v46, %v517_v47 }
 0x158   :  { %3615 = vmatprep.subr.bf16.mxu0 %v4838_v3  ;;  %v381_v56 = vld [vmem:[%s7222_s1 + $0xb30] sm:$0xff] }
 0x159   :  { %3655 = vmatpush1.bf16.msra.mxu1 %v4973_v2  ;;  %v505_v57 = vld [vmem:[%s7222_s1 + $0xf10] sm:$0xff]  ;;  %v4918_v61 = vcombine.high %v377_v55, %v381_v56  ;;  %v4917_v5 = vcombine.low %v377_v55, %v381_v56  ;;  %v202_v55 = vld [vmem:[%s7222_s1 + $0x598] sm:$0xff] }
 0x15a   :  { %3656 = vmatprep.subr.bf16.mxu1 %v4966_v4  ;;  %v509_v58 = vld [vmem:[%s7222_s1 + $0xf30] sm:$0xff]  ;;  %v206_v56 = vld [vmem:[%s7222_s1 + $0x5b8] sm:$0xff] }
 0x15b   :  { %3616 = vmatpush1.bf16.msra.mxu0 %v4837_v10  ;;  %v5046_v0 = vcombine.high %v505_v57, %v509_v58  ;;  %v369_v1 = vld [vmem:[%s7222_s1 + $0xad0] sm:$0xff]  ;;  %v5045_v6 = vcombine.low %v505_v57, %v509_v58  ;;  %v548_v57 = vrot.slane %v6194_v22, %v547_v45 }
 0x15c   :  { %3617 = vmatprep.subr.bf16.mxu0 %v4830_v12  ;;  %v373_v2 = vld [vmem:[%s7222_s1 + $0xaf0] sm:$0xff] }
 0x15d   :  { %3657 = vmatpush1.bf16.msra.mxu1 %v4965_v11  ;;  %v497_v3 = vld [vmem:[%s7222_s1 + $0xed0] sm:$0xff]  ;;  %v4910_v7 = vcombine.high %v369_v1, %v373_v2  ;;  %v4909_v15 = vcombine.low %v369_v1, %v373_v2  ;;  %v66_v1 = vld [vmem:[%s7222_s1 + $0x158] sm:$0xff] }
 0x15e   :  { %3658 = vmatprep.subr.bf16.mxu1 %v4958_v14  ;;  %v501_v4 = vld [vmem:[%s7222_s1 + $0xef0] sm:$0xff]  ;;  %v70_v2 = vld [vmem:[%s7222_s1 + $0x178] sm:$0xff] }
 0x15f   :  { %3618 = vmatpush1.bf16.msra.mxu0 %v4829_v19  ;;  %v5038_v8 = vcombine.high %v497_v3, %v501_v4  ;;  %v361_v10 = vld [vmem:[%s7222_s1 + $0xa90] sm:$0xff]  ;;  %v5037_v16 = vcombine.low %v497_v3, %v501_v4  ;;  %v194_v4 = vld [vmem:[%s7222_s1 + $0x558] sm:$0xff] }
 0x160   :  { %3619 = vmatprep.subr.bf16.mxu0 %v4822_v21  ;;  %v365_v11 = vld [vmem:[%s7222_s1 + $0xab0] sm:$0xff] }
 0x161   :  { %3659 = vmatpush1.bf16.msra.mxu1 %v4957_v20  ;;  %v489_v12 = vld [vmem:[%s7222_s1 + $0xe90] sm:$0xff]  ;;  %v4902_v17 = vcombine.high %v361_v10, %v365_v11  ;;  %v4901_v25 = vcombine.low %v361_v10, %v365_v11  ;;  %v4743_v10 = vcombine.low %v202_v55, %v206_v56  ;;  %v4608_v11 = vcombine.high %v66_v1, %v70_v2 }
 0x162   :  { %3660 = vmatprep.subr.bf16.mxu1 %v4950_v24  ;;  %v493_v14 = vld [vmem:[%s7222_s1 + $0xeb0] sm:$0xff] }
 0x163   :  { %3620 = vmatpush1.bf16.msra.mxu0 %v4821_v29  ;;  %v5030_v18 = vcombine.high %v489_v12, %v493_v14  ;;  %v353_v19 = vld [vmem:[%s7222_s1 + $0xa50] sm:$0xff]  ;;  %v5029_v26 = vcombine.low %v489_v12, %v493_v14 }
 0x164   :  { %3621 = vmatprep.subr.bf16.mxu0 %v4942_v34  ;;  %v357_v20 = vld [vmem:[%s7222_s1 + $0xa70] sm:$0xff] }
 0x165   :  { %3661 = vmatpush1.bf16.msra.mxu1 %v4949_v33  ;;  %v481_v21 = vld [vmem:[%s7222_s1 + $0xe50] sm:$0xff]  ;;  %v4894_v27 = vcombine.high %v353_v19, %v357_v20  ;;  %v4893_v52 = vcombine.low %v353_v19, %v357_v20  ;;  %v186_v20 = vld [vmem:[%s7222_s1 + $0x518] sm:$0xff] }
 0x166   :  { %3662 = vmatprep.subr.bf16.mxu1 %v5070_v35  ;;  %v485_v24 = vld [vmem:[%s7222_s1 + $0xe70] sm:$0xff] }
 0x167   :  { %3622 = vmatpush2.bf16.msra.mxu0 %v4941_v62  ;;  %v5022_v28 = vcombine.high %v481_v21, %v485_v24  ;;  %v345_v29 = vld [vmem:[%s7222_s1 + $0xa10] sm:$0xff]  ;;  %v5021_v36 = vcombine.low %v481_v21, %v485_v24  ;;  %v82_v62 = vld [vmem:[%s7222_s1 + $0x1d8] sm:$0xff] }
 0x168   :  { %3623 = vmatprep.subr.bf16.mxu0 %v4934_v41  ;;  %v349_v33 = vld [vmem:[%s7222_s1 + $0xa30] sm:$0xff]  ;;  %v210_v41 = vld [vmem:[%s7222_s1 + $0x5d8] sm:$0xff] }
 0x169   :  { %3663 = vmatpush2.bf16.msra.mxu1 %v5069_v39  ;;  %v473_v34 = vld [vmem:[%s7222_s1 + $0xe10] sm:$0xff]  ;;  %v4886_v37 = vcombine.high %v345_v29, %v349_v33  ;;  %v86_v39 = vld [vmem:[%s7222_s1 + $0x1f8] sm:$0xff]  ;;  %v4885_v44 = vcombine.low %v345_v29, %v349_v33 }
 0x16a   :  { %3664 = vmatprep.subr.bf16.mxu1 %v5062_v42  ;;  %v477_v35 = vld [vmem:[%s7222_s1 + $0xe30] sm:$0xff]  ;;  %v214_v42 = vld [vmem:[%s7222_s1 + $0x5f8] sm:$0xff]  ;;  %v4624_v47 = vcombine.high %v82_v62, %v86_v39  ;;  %v4623_v58 = vcombine.low %v82_v62, %v86_v39 }
 0x16b   :  { %3624 = vmatpush2.bf16.msra.mxu0 %v4933_v48  ;;  %v5014_v53 = vcombine.high %v473_v34, %v477_v35  ;;  %v5013_v46 = vcombine.low %v473_v34, %v477_v35  ;;  %v4752_v48 = vcombine.high %v210_v41, %v214_v42  ;;  %v190_v21 = vld [vmem:[%s7222_s1 + $0x538] sm:$0xff] }
 0x16c   :  { %3625 = vmatprep.subr.bf16.mxu0 %v4926_v51  ;;  %v74_v51 = vld [vmem:[%s7222_s1 + $0x198] sm:$0xff]  ;;  %v4728_v33 = vcombine.high %v186_v20, %v190_v21 }
 0x16d   :  { %3665 = vmatpush2.bf16.msra.mxu1 %v5061_v49  ;;  %v551_v49 = vsub.s32 3, %v5414_v43  ;;  %v50_v34 = vld [vmem:[%s7222_s1 + $0xd8] sm:$0xff] }
 0x16e   :  { %3666 = vmatprep.subr.bf16.mxu1 %v5054_v54  ;;  %v78_v54 = vld [vmem:[%s7222_s1 + $0x1b8] sm:$0xff] }
 0x16f   :  { %3626 = vmatpush2.bf16.msra.mxu0 %v4925_v59  ;;  %v4751_v59 = vcombine.low %v210_v41, %v214_v42  ;;  %v178_v35 = vld [vmem:[%s7222_s1 + $0x4d8] sm:$0xff] }
 0x170   :  { %3627 = vmatprep.subr.bf16.mxu0 %v4918_v61  ;;  %v552_v61 = vrot.slane %v6194_v22, %v551_v49  ;;  %v198_v22 = vld [vmem:[%s7222_s1 + $0x578] sm:$0xff] }
 0x171   :  { %3667 = vmatpush2.bf16.msra.mxu1 %v5053_v60  ;;  %v4616_v60 = vcombine.high %v74_v51, %v78_v54  ;;  %v42_v39 = vld [vmem:[%s7222_s1 + $0x98] sm:$0xff] }
 0x172   :  { %3668 = vmatprep.subr.bf16.mxu1 %v5046_v0  ;;  %v4744_v0 = vcombine.high %v202_v55, %v206_v56  ;;  %v46_v41 = vld [vmem:[%s7222_s1 + $0xb8] sm:$0xff] }
 0x173   :  { %3628 = vmatpush2.bf16.msra.mxu0 %v4917_v5  ;;  %v170_v42 = vld [vmem:[%s7222_s1 + $0x498] sm:$0xff]  ;;  %v4583_v56 = vcombine.low %v42_v39, %v46_v41 }
 0x174   :  { %3629 = vmatprep.subr.bf16.mxu0 %v4910_v7  ;;  %v4615_v7 = vcombine.low %v74_v51, %v78_v54  ;;  %v34_v49 = vld [vmem:[%s7222_s1 + $0x58] sm:$0xff] }
 0x175   :  { %3669 = vmatpush2.bf16.msra.mxu1 %v5045_v6  ;;  %v38_v51 = vld [vmem:[%s7222_s1 + $0x78] sm:$0xff] }
 0x176   :  { %3670 = vmatprep.subr.bf16.mxu1 %v5038_v8  ;;  %v162_v54 = vld [vmem:[%s7222_s1 + $0x458] sm:$0xff] }
 0x177   :  { %3630 = vmatpush2.bf16.msra.mxu0 %v4909_v15  ;;  %v166_v55 = vld [vmem:[%s7222_s1 + $0x478] sm:$0xff] }
 0x178   :  { %3631 = vmatprep.subr.bf16.mxu0 %v4902_v17  ;;  %v58_v17 = vld [vmem:[%s7222_s1 + $0x118] sm:$0xff] }
 0x179   :  { %3671 = vmatpush2.bf16.msra.mxu1 %v5037_v16  ;;  %v4736_v16 = vcombine.high %v194_v4, %v198_v22 }
 0x17a   :  { %3672 = vmatprep.subr.bf16.mxu1 %v5030_v18  ;;  %v62_v18 = vld [vmem:[%s7222_s1 + $0x138] sm:$0xff] }
 0x17b   :  { %3632 = vmatpush2.bf16.msra.mxu0 %v4901_v25 }
 0x17c   :  { %3633 = vmatprep.subr.bf16.mxu0 %v4894_v27 }
 0x17d   :  { %3673 = vmatpush2.bf16.msra.mxu1 %v5029_v26  ;;  %v4607_v26 = vcombine.low %v66_v1, %v70_v2  ;;  %v158_v1 = vld [vmem:[%s7222_s1 + $0x438] sm:$0xff]  ;;  %v4575_v2 = vcombine.low %v34_v49, %v38_v51 }
 0x17e   :  { %3674 = vmatprep.subr.bf16.mxu1 %v5022_v28  ;;  %v4600_v28 = vcombine.high %v58_v17, %v62_v18 }
 0x17f   :  { %3634 = vmatpush2.bf16.msra.mxu0 %v4893_v52  ;;  %v182_v52 = vld [vmem:[%s7222_s1 + $0x4f8] sm:$0xff] }
 0x180   :  { %3635 = vmatprep.subr.bf16.mxu0 %v4886_v37  ;;  %v4727_v37 = vcombine.low %v186_v20, %v190_v21  ;;  %v4720_v62 = vcombine.high %v178_v35, %v182_v52 }
 0x181   :  { %3675 = vmatpush2.bf16.msra.mxu1 %v5021_v36  ;;  %v4599_v36 = vcombine.low %v58_v17, %v62_v18  ;;  %v142_v17 = vld [vmem:[%s7222_s1 + $0x3b8] sm:$0xff] }
 0x182   :  { %3676 = vmatprep.subr.bf16.mxu1 %v5014_v53  ;;  %v266_v18 = vld [vmem:[%s7222_s1 + $0x798] sm:$0xff] }
 0x183   :  { %3636 = vmatpush2.bf16.msra.mxu0 %v4885_v44  ;;  %v174_v44 = vld [vmem:[%s7222_s1 + $0x4b8] sm:$0xff] }
 0x184   :  { %3687 = vmatprep.subr.bf16.mxu0 %v4624_v47  ;;  %v4584_v47 = vcombine.high %v42_v39, %v46_v41 }
 0x185   :  { %3677 = vmatpush2.bf16.msra.mxu1 %v5013_v46  ;;  %v4719_v46 = vcombine.low %v178_v35, %v182_v52  ;;  %v122_v52 = vld [vmem:[%s7222_s1 + $0x318] sm:$0xff] }
 0x186   :  { %3728 = vmatprep.subr.bf16.mxu1 %v4752_v48  ;;  %v3393_v3 = vpop.f32.mrf.mxu0  ;;  %3638 = vmatmul.mubr.bf16.vlgmr.msra.gmra.mxu0 %v5507_v32  ;;  %v4712_v48 = vcombine.high %v170_v42, %v174_v44 }
 0x187   :  { %v3394_v5 = vadd.f32 %v3393_v3, %v548_v57  ;;  %3688 = vmatpush1.bf16.msra.mxu0 %v4623_v58  ;;  %3719 = vmatprep.mubr.bf16.mxu0 %v5464_v9  ;;  %v4735_v9 = vcombine.low %v194_v4, %v198_v22  ;;  %v4711_v57 = vcombine.low %v170_v42, %v174_v44  ;;  %v114_v44 = vld [vmem:[%s7222_s1 + $0x2d8] sm:$0xff] }
 0x188   :  { %v3434_v6 = vpop.f32.mrf.mxu1  ;;  %3679 = vmatmul.mubr.bf16.vlgmr.msra.gmra.mxu1 %v5808_v50  ;;  %v3395_v8 = vpop.f32.mrf.mxu0  ;;  %3689 = vmatprep.subr.bf16.mxu0 %v4616_v60  ;;  %v4576_v58 = vcombine.high %v34_v49, %v38_v51  ;;  %v26_v60 = vld [vmem:[%s7222_s1 + $0x18] sm:$0xff]  ;;  %v4703_v3 = vcombine.low %v162_v54, %v166_v55 }
 0x189   :  { %3729 = vmatpush1.bf16.msra.mxu1 %v4751_v59  ;;  %v6631_v12 = vadd.f32 %v3434_v6, %v3394_v5  ;;  %v3396_v14 = vadd.f32 %v3395_v8, %v552_v61  ;;  %3760 = vmatprep.mubr.bf16.mxu1 %v5475_v13  ;;  %v54_v13 = vld [vmem:[%s7222_s1 + $0xf8] sm:$0xff]  ;;  %v4704_v59 = vcombine.high %v162_v54, %v166_v55 }
 0x18a   :  { %v3436_v15 = vpop.f32.mrf.mxu1  ;;  %3730 = vmatprep.subr.bf16.mxu1 %v4744_v0  ;;  %v3397_v19 = vpop.f32.mrf.mxu0  ;;  %v4592_v53 = vcombine.high %v50_v34, %v54_v13  ;;  %v4591_v45 = vcombine.low %v50_v34, %v54_v13  ;;  %v30_v61 = vld [vmem:[%s7222_s1 + $0x38] sm:$0xff] }
 0x18b   :  { %v6647_v24 = vadd.f32 %v3436_v15, %v3396_v14  ;;  %3690 = vmatpush1.bf16.msra.mxu0 %v4615_v7  ;;  %v154_v0 = vld [vmem:[%s7222_s1 + $0x418] sm:$0xff]  ;;  %v4568_v4 = vcombine.high %v26_v60, %v30_v61 }
 0x18c   :  { %v3438_v25 = vpop.f32.mrf.mxu1  ;;  %v3398_v27 = vpop.f32.mrf.mxu0  ;;  %3691 = vmatprep.subr.bf16.mxu0 %v4608_v11  ;;  %v4696_v22 = vcombine.high %v154_v0, %v158_v1  ;;  %v146_v5 = vld [vmem:[%s7222_s1 + $0x3d8] sm:$0xff]  ;;  %v4695_v11 = vcombine.low %v154_v0, %v158_v1 }
 0x18d   :  { %3731 = vmatpush1.bf16.msra.mxu1 %v4743_v10  ;;  %v150_v6 = vld [vmem:[%s7222_s1 + $0x3f8] sm:$0xff]  ;;  %v4567_v10 = vcombine.low %v26_v60, %v30_v61 }
 0x18e   :  { %v3439_v29 = vpop.f32.mrf.mxu1  ;;  %3732 = vmatprep.subr.bf16.mxu1 %v4736_v16  ;;  %v274_v7 = vld [vmem:[%s7222_s1 + $0x7d8] sm:$0xff]  ;;  %v4688_v14 = vcombine.high %v146_v5, %v150_v6  ;;  %v4687_v20 = vcombine.low %v146_v5, %v150_v6 }
 0x18f   :  { %3692 = vmatpush1.bf16.msra.mxu0 %v4607_v26  ;;  %v278_v8 = vld [vmem:[%s7222_s1 + $0x7f8] sm:$0xff] }
 0x190   :  { %3693 = vmatprep.subr.bf16.mxu0 %v4600_v28  ;;  %v4816_v15 = vcombine.high %v274_v7, %v278_v8  ;;  %v138_v16 = vld [vmem:[%s7222_s1 + $0x398] sm:$0xff]  ;;  %v4815_v21 = vcombine.low %v274_v7, %v278_v8 }
 0x191   :  { %3733 = vmatpush1.bf16.msra.mxu1 %v4735_v9  ;;  %v270_v19 = vld [vmem:[%s7222_s1 + $0x7b8] sm:$0xff]  ;;  %v4680_v25 = vcombine.high %v138_v16, %v142_v17 }
 0x192   :  { %3734 = vmatprep.subr.bf16.mxu1 %v4728_v33  ;;  %v4808_v26 = vcombine.high %v266_v18, %v270_v19  ;;  %v130_v27 = vld [vmem:[%s7222_s1 + $0x358] sm:$0xff]  ;;  %v4679_v33 = vcombine.low %v138_v16, %v142_v17  ;;  %v4807_v34 = vcombine.low %v266_v18, %v270_v19 }
 0x193   :  { %3694 = vmatpush1.bf16.msra.mxu0 %v4599_v36  ;;  %v134_v9 = vld [vmem:[%s7222_s1 + $0x378] sm:$0xff] }
 0x194   :  { %3695 = vmatprep.subr.bf16.mxu0 %v4592_v53  ;;  %v258_v28 = vld [vmem:[%s7222_s1 + $0x758] sm:$0xff]  ;;  %v4672_v13 = vcombine.high %v130_v27, %v134_v9 }
 0x195   :  { %3735 = vmatpush1.bf16.msra.mxu1 %v4727_v37  ;;  %v262_v29 = vld [vmem:[%s7222_s1 + $0x778] sm:$0xff] }
 0x196   :  { %3736 = vmatprep.subr.bf16.mxu1 %v4720_v62  ;;  %v4800_v35 = vcombine.high %v258_v28, %v262_v29  ;;  %v126_v36 = vld [vmem:[%s7222_s1 + $0x338] sm:$0xff]  ;;  %v4671_v62 = vcombine.low %v130_v27, %v134_v9  ;;  %v4799_v39 = vcombine.low %v258_v28, %v262_v29 }
 0x197   :  { %3696 = vmatpush1.bf16.msra.mxu0 %v4591_v45  ;;  %v250_v37 = vld [vmem:[%s7222_s1 + $0x718] sm:$0xff]  ;;  %v4664_v41 = vcombine.high %v122_v52, %v126_v36 }
 0x198   :  { %3697 = vmatprep.subr.bf16.mxu0 %v4584_v47  ;;  %v254_v53 = vld [vmem:[%s7222_s1 + $0x738] sm:$0xff] }
 0x199   :  { %3737 = vmatpush1.bf16.msra.mxu1 %v4719_v46  ;;  %v4792_v42 = vcombine.high %v250_v37, %v254_v53  ;;  %v118_v45 = vld [vmem:[%s7222_s1 + $0x2f8] sm:$0xff]  ;;  %v4791_v49 = vcombine.low %v250_v37, %v254_v53 }
 0x19a   :  { %3738 = vmatprep.subr.bf16.mxu1 %v4712_v48  ;;  %v242_v46 = vld [vmem:[%s7222_s1 + $0x6d8] sm:$0xff]  ;;  %v4663_v48 = vcombine.low %v122_v52, %v126_v36  ;;  %v4656_v51 = vcombine.high %v114_v44, %v118_v45 }
 0x19b   :  { %3698 = vmatpush1.bf16.msra.mxu0 %v4583_v56  ;;  %v246_v47 = vld [vmem:[%s7222_s1 + $0x6f8] sm:$0xff] }
 0x19c   :  { %3699 = vmatprep.subr.bf16.mxu0 %v4576_v58  ;;  %v4784_v54 = vcombine.high %v242_v46, %v246_v47  ;;  %v106_v55 = vld [vmem:[%s7222_s1 + $0x298] sm:$0xff]  ;;  %v4783_v60 = vcombine.low %v242_v46, %v246_v47 }
 0x19d   :  { %3739 = vmatpush1.bf16.msra.mxu1 %v4711_v57  ;;  %v110_v56 = vld [vmem:[%s7222_s1 + $0x2b8] sm:$0xff] }
 0x19e   :  { %3740 = vmatprep.subr.bf16.mxu1 %v4704_v59  ;;  %v234_v57 = vld [vmem:[%s7222_s1 + $0x698] sm:$0xff]  ;;  %v4655_v59 = vcombine.low %v114_v44, %v118_v45  ;;  %v4648_v61 = vcombine.high %v106_v55, %v110_v56 }
 0x19f   :  { %3700 = vmatpush1.bf16.msra.mxu0 %v4575_v2  ;;  %v238_v58 = vld [vmem:[%s7222_s1 + $0x6b8] sm:$0xff] }
 0x1a0   :  { %3701 = vmatprep.subr.bf16.mxu0 %v4568_v4  ;;  %v4776_v0 = vcombine.high %v234_v57, %v238_v58  ;;  %v98_v1 = vld [vmem:[%s7222_s1 + $0x258] sm:$0xff]  ;;  %v4775_v5 = vcombine.low %v234_v57, %v238_v58 }
 0x1a1   :  { %3741 = vmatpush1.bf16.msra.mxu1 %v4703_v3  ;;  %v102_v2 = vld [vmem:[%s7222_s1 + $0x278] sm:$0xff] }
 0x1a2   :  { %3742 = vmatprep.subr.bf16.mxu1 %v4696_v22  ;;  %v226_v3 = vld [vmem:[%s7222_s1 + $0x658] sm:$0xff]  ;;  %v4647_v22 = vcombine.low %v106_v55, %v110_v56  ;;  %v4640_v6 = vcombine.high %v98_v1, %v102_v2 }
 0x1a3   :  { %3702 = vmatpush1.bf16.msra.mxu0 %v4567_v10  ;;  %v230_v4 = vld [vmem:[%s7222_s1 + $0x678] sm:$0xff] }
 0x1a4   :  { %3703 = vmatprep.subr.bf16.mxu0 %v4688_v14  ;;  %v4768_v7 = vcombine.high %v226_v3, %v230_v4  ;;  %v90_v8 = vld [vmem:[%s7222_s1 + $0x218] sm:$0xff]  ;;  %v4767_v16 = vcombine.low %v226_v3, %v230_v4 }
 0x1a5   :  { %3743 = vmatpush1.bf16.msra.mxu1 %v4695_v11  ;;  %v94_v10 = vld [vmem:[%s7222_s1 + $0x238] sm:$0xff] }
 0x1a6   :  { %3744 = vmatprep.subr.bf16.mxu1 %v4816_v15  ;;  %v218_v11 = vld [vmem:[%s7222_s1 + $0x618] sm:$0xff]  ;;  %v4639_v15 = vcombine.low %v98_v1, %v102_v2  ;;  %v4632_v17 = vcombine.high %v90_v8, %v94_v10 }
 0x1a7   :  { %3704 = vmatpush2.bf16.msra.mxu0 %v4687_v20  ;;  %v222_v14 = vld [vmem:[%s7222_s1 + $0x638] sm:$0xff] }
 0x1a8   :  { %3705 = vmatprep.subr.bf16.mxu0 %v4680_v25  ;;  %v4760_v18 = vcombine.high %v218_v11, %v222_v14  ;;  %v338_v19 = vld [vmem:[%s7222_s1 + $0x9d8] sm:$0xff]  ;;  %v4759_v27 = vcombine.low %v218_v11, %v222_v14 }
 0x1a9   :  { %3745 = vmatpush2.bf16.msra.mxu1 %v4815_v21  ;;  %v342_v20 = vld [vmem:[%s7222_s1 + $0x9f8] sm:$0xff] }
 0x1aa   :  { %3746 = vmatprep.subr.bf16.mxu1 %v4808_v26  ;;  %v466_v21 = vld [vmem:[%s7222_s1 + $0xdd8] sm:$0xff]  ;;  %v4631_v26 = vcombine.low %v90_v8, %v94_v10  ;;  %v4880_v9 = vcombine.high %v338_v19, %v342_v20 }
 0x1ab   :  { %3706 = vmatpush2.bf16.msra.mxu0 %v4679_v33  ;;  %v470_v25 = vld [vmem:[%s7222_s1 + $0xdf8] sm:$0xff] }
 0x1ac   :  { %3707 = vmatprep.subr.bf16.mxu0 %v4672_v13  ;;  %v5008_v28 = vcombine.high %v466_v21, %v470_v25  ;;  %v330_v29 = vld [vmem:[%s7222_s1 + $0x998] sm:$0xff]  ;;  %v5007_v52 = vcombine.low %v466_v21, %v470_v25 }
 0x1ad   :  { %3747 = vmatpush2.bf16.msra.mxu1 %v4807_v34  ;;  %v334_v33 = vld [vmem:[%s7222_s1 + $0x9b8] sm:$0xff] }
 0x1ae   :  { %3748 = vmatprep.subr.bf16.mxu1 %v4800_v35  ;;  %v458_v34 = vld [vmem:[%s7222_s1 + $0xd98] sm:$0xff]  ;;  %v4879_v35 = vcombine.low %v338_v19, %v342_v20  ;;  %v4872_v36 = vcombine.high %v330_v29, %v334_v33  ;;  %v4871_v46 = vcombine.low %v330_v29, %v334_v33 }
 0x1af   :  { %3708 = vmatpush2.bf16.msra.mxu0 %v4671_v62  ;;  %v462_v13 = vld [vmem:[%s7222_s1 + $0xdb8] sm:$0xff] }
 0x1b0   :  { %3709 = vmatprep.subr.bf16.mxu0 %v4664_v41  ;;  %v5000_v37 = vcombine.high %v458_v34, %v462_v13  ;;  %v322_v53 = vld [vmem:[%s7222_s1 + $0x958] sm:$0xff] }
 0x1b1   :  { %3749 = vmatpush2.bf16.msra.mxu1 %v4799_v39  ;;  %v326_v62 = vld [vmem:[%s7222_s1 + $0x978] sm:$0xff] }
 0x1b2   :  { %3750 = vmatprep.subr.bf16.mxu1 %v4792_v42  ;;  %v450_v41 = vld [vmem:[%s7222_s1 + $0xd58] sm:$0xff] }
 0x1b3   :  { %3710 = vmatpush2.bf16.msra.mxu0 %v4663_v48  ;;  %v454_v42 = vld [vmem:[%s7222_s1 + $0xd78] sm:$0xff]  ;;  %v4864_v48 = vcombine.high %v322_v53, %v326_v62 }
 0x1b4   :  { %3711 = vmatprep.subr.bf16.mxu0 %v4656_v51  ;;  %v442_v56 = vld [vmem:[%s7222_s1 + $0xd18] sm:$0xff] }
 0x1b5   :  { %3751 = vmatpush2.bf16.msra.mxu1 %v4791_v49  ;;  %v446_v57 = vld [vmem:[%s7222_s1 + $0xd38] sm:$0xff] }
 0x1b6   :  { %3752 = vmatprep.subr.bf16.mxu1 %v4784_v54  ;;  %v4992_v54 = vcombine.high %v450_v41, %v454_v42  ;;  %v4984_v1 = vcombine.high %v442_v56, %v446_v57  ;;  %v306_v2 = vld [vmem:[%s7222_s1 + $0x8d8] sm:$0xff] }
 0x1b7   :  { %3712 = vmatpush2.bf16.msra.mxu0 %v4655_v59  ;;  %v4863_v59 = vcombine.low %v322_v53, %v326_v62  ;;  %v310_v3 = vld [vmem:[%s7222_s1 + $0x8f8] sm:$0xff] }
 0x1b8   :  { %3713 = vmatprep.subr.bf16.mxu0 %v4648_v61  ;;  %v4991_v61 = vcombine.low %v450_v41, %v454_v42  ;;  %v438_v4 = vld [vmem:[%s7222_s1 + $0xcf8] sm:$0xff] }
 0x1b9   :  { %3753 = vmatpush2.bf16.msra.mxu1 %v4783_v60  ;;  %v298_v8 = vld [vmem:[%s7222_s1 + $0x898] sm:$0xff] }
 0x1ba   :  { %3754 = vmatprep.subr.bf16.mxu1 %v4776_v0  ;;  %v302_v10 = vld [vmem:[%s7222_s1 + $0x8b8] sm:$0xff] }
 0x1bb   :  { %3714 = vmatpush2.bf16.msra.mxu0 %v4647_v22  ;;  %v426_v11 = vld [vmem:[%s7222_s1 + $0xc98] sm:$0xff] }
 0x1bc   :  { %3715 = vmatprep.subr.bf16.mxu0 %v4640_v6  ;;  %v4848_v6 = vcombine.high %v306_v2, %v310_v3  ;;  %v430_v14 = vld [vmem:[%s7222_s1 + $0xcb8] sm:$0xff] }
 0x1bd   :  { %3755 = vmatpush2.bf16.msra.mxu1 %v4775_v5  ;;  %v4983_v5 = vcombine.low %v442_v56, %v446_v57  ;;  %v290_v19 = vld [vmem:[%s7222_s1 + $0x858] sm:$0xff] }
 0x1be   :  { %3756 = vmatprep.subr.bf16.mxu1 %v4768_v7  ;;  %v294_v20 = vld [vmem:[%s7222_s1 + $0x878] sm:$0xff] }
 0x1bf   :  { %3716 = vmatpush2.bf16.msra.mxu0 %v4639_v15  ;;  %v4847_v15 = vcombine.low %v306_v2, %v310_v3  ;;  %v418_v21 = vld [vmem:[%s7222_s1 + $0xc58] sm:$0xff] }
 0x1c0   :  { %3717 = vmatprep.subr.bf16.mxu0 %v4632_v17  ;;  %v4840_v17 = vcombine.high %v298_v8, %v302_v10  ;;  %v422_v25 = vld [vmem:[%s7222_s1 + $0xc78] sm:$0xff] }
 0x1c1   :  { %3757 = vmatpush2.bf16.msra.mxu1 %v4767_v16  ;;  %v282_v29 = vld [vmem:[%s7222_s1 + $0x818] sm:$0xff] }
 0x1c2   :  { %3758 = vmatprep.subr.bf16.mxu1 %v4760_v18  ;;  %v4968_v18 = vcombine.high %v426_v11, %v430_v14  ;;  %v286_v33 = vld [vmem:[%s7222_s1 + $0x838] sm:$0xff] }
 0x1c3   :  { %3718 = vmatpush2.bf16.msra.mxu0 %v4631_v26  ;;  %v4839_v26 = vcombine.low %v298_v8, %v302_v10  ;;  %v402_v53 = vld [vmem:[%s7222_s1 + $0xbd8] sm:$0xff]  ;;  %v4823_v42 = vcombine.low %v282_v29, %v286_v33 }
 0x1c4   :  { %3769 = vmatprep.subr.bf16.mxu0 %v4880_v9  ;;  %v4832_v9 = vcombine.high %v290_v19, %v294_v20  ;;  %v406_v62 = vld [vmem:[%s7222_s1 + $0xbf8] sm:$0xff] }
 0x1c5   :  { %3759 = vmatpush2.bf16.msra.mxu1 %v4759_v27  ;;  %v4967_v27 = vcombine.low %v426_v11, %v430_v14  ;;  %v534_v41 = vld [vmem:[%s7222_s1 + $0xff8] sm:$0xff] }
 0x1c6   :  { %3810 = vmatprep.subr.bf16.mxu1 %v5008_v28  ;;  %v3475_v39 = vpop.f32.mrf.mxu0  ;;  %3720 = vmatmul.mubr.bf16.vlgmr.msra.gmra.mxu0 %v5585_v23  ;;  %v4999_v23 = vcombine.low %v458_v34, %v462_v13  ;;  %v4960_v28 = vcombine.high %v418_v21, %v422_v25  ;;  %v410_v34 = vld [vmem:[%s7222_s1 + $0xc18] sm:$0xff] }
 0x1c7   :  { %v3476_v44 = vadd.f32 %v3475_v39, %v6631_v12  ;;  %3770 = vmatpush1.bf16.msra.mxu0 %v4879_v35  ;;  %v314_v12 = vld [vmem:[%s7222_s1 + $0x918] sm:$0xff]  ;;  %3801 = vmatprep.mubr.bf16.mxu0 %v5600_v30  ;;  %v4831_v35 = vcombine.low %v290_v19, %v294_v20 }
 0x1c8   :  { %v3516_v45 = vpop.f32.mrf.mxu1  ;;  %3761 = vmatmul.mubr.bf16.vlgmr.msra.gmra.mxu1 %v5604_v31  ;;  %v6832_v47 = vpop.f32.mrf.mxu0  ;;  %3771 = vmatprep.subr.bf16.mxu0 %v4872_v36  ;;  %v318_v31 = vld [vmem:[%s7222_s1 + $0x938] sm:$0xff]  ;;  %v4824_v36 = vcombine.high %v282_v29, %v286_v33 }
 0x1c9   :  { %3811 = vmatpush1.bf16.msra.mxu1 %v5007_v52  ;;  %v6834_v49 = vadd.f32 %v3516_v45, %v3476_v44  ;;  %3842 = vmatprep.mubr.bf16.mxu1 %v5621_v40  ;;  %v4856_v0 = vcombine.high %v314_v12, %v318_v31  ;;  %v434_v40 = vld [vmem:[%s7222_s1 + $0xcd8] sm:$0xff]  ;;  %v4855_v22 = vcombine.low %v314_v12, %v318_v31 }
 0x1ca   :  { %v6836_v51 = vpop.f32.mrf.mxu1  ;;  %3812 = vmatprep.subr.bf16.mxu1 %v5000_v37  ;;  %v3479_v55 = vpop.f32.mrf.mxu0  ;;  %v4976_v7 = vcombine.high %v434_v40, %v438_v4  ;;  %v4975_v16 = vcombine.low %v434_v40, %v438_v4  ;;  %v414_v13 = vld [vmem:[%s7222_s1 + $0xc38] sm:$0xff]  ;;  %v4959_v52 = vcombine.low %v418_v21, %v422_v25  ;;  %v4944_v45 = vcombine.high %v402_v53, %v406_v62 }
 0x1cb   :  { %3772 = vmatpush1.bf16.msra.mxu0 %v4871_v46  ;;  %v4952_v37 = vcombine.high %v410_v34, %v414_v13  ;;  %v530_v39 = vld [vmem:[%s7222_s1 + $0xfd8] sm:$0xff]  ;;  %v4951_v44 = vcombine.low %v410_v34, %v414_v13  ;;  %v4943_v31 = vcombine.low %v402_v53, %v406_v62 }
 0x1cc   :  { %v3520_v58 = vpop.f32.mrf.mxu1  ;;  %v3480_v60 = vpop.f32.mrf.mxu0  ;;  %3773 = vmatprep.subr.bf16.mxu0 %v4864_v48  ;;  %v5072_v46 = vcombine.high %v530_v39, %v534_v41  ;;  %v398_v48 = vld [vmem:[%s7222_s1 + $0xbb8] sm:$0xff]  ;;  %v5071_v55 = vcombine.low %v530_v39, %v534_v41 }
 0x1cd   :  { %3813 = vmatpush1.bf16.msra.mxu1 %v4999_v23  ;;  %v394_v23 = vld [vmem:[%s7222_s1 + $0xb98] sm:$0xff] }
 0x1ce   :  { %v3521_v30 = vpop.f32.mrf.mxu1  ;;  %3814 = vmatprep.subr.bf16.mxu1 %v4992_v54  ;;  %v522_v54 = vld [vmem:[%s7222_s1 + $0xf98] sm:$0xff]  ;;  %v4936_v56 = vcombine.high %v394_v23, %v398_v48 }
 0x1cf   :  { %3774 = vmatpush1.bf16.msra.mxu0 %v4863_v59  ;;  %v526_v12 = vld [vmem:[%s7222_s1 + $0xfb8] sm:$0xff] }
 0x1d0   :  { %3775 = vmatprep.subr.bf16.mxu0 %v4856_v0  ;;  %v5064_v57 = vcombine.high %v522_v54, %v526_v12  ;;  %v386_v58 = vld [vmem:[%s7222_s1 + $0xb58] sm:$0xff]  ;;  %v4935_v0 = vcombine.low %v394_v23, %v398_v48  ;;  %v5063_v30 = vcombine.low %v522_v54, %v526_v12 }
 0x1d1   :  { %3815 = vmatpush1.bf16.msra.mxu1 %v4991_v61  ;;  %v390_v59 = vld [vmem:[%s7222_s1 + $0xb78] sm:$0xff] }
 0x1d2   :  { %3816 = vmatprep.subr.bf16.mxu1 %v4984_v1  ;;  %v514_v60 = vld [vmem:[%s7222_s1 + $0xf58] sm:$0xff]  ;;  %v4928_v1 = vcombine.high %v386_v58, %v390_v59 }
 0x1d3   :  { %3776 = vmatpush1.bf16.msra.mxu0 %v4855_v22  ;;  %v518_v61 = vld [vmem:[%s7222_s1 + $0xf78] sm:$0xff] }
 0x1d4   :  { %3777 = vmatprep.subr.bf16.mxu0 %v4848_v6  ;;  %v5056_v2 = vcombine.high %v514_v60, %v518_v61  ;;  %v378_v3 = vld [vmem:[%s7222_s1 + $0xb18] sm:$0xff]  ;;  %v5055_v6 = vcombine.low %v514_v60, %v518_v61 }
 0x1d5   :  { %3817 = vmatpush1.bf16.msra.mxu1 %v4983_v5  ;;  %v382_v40 = vld [vmem:[%s7222_s1 + $0xb38] sm:$0xff]  ;;  %v4927_v5 = vcombine.low %v386_v58, %v390_v59  ;;  %v5233_v58 = vld [vmem:[%s7224_s3 + $0x70] sm:$0xff]  }
 0x1d6   :  { %3818 = vmatprep.subr.bf16.mxu1 %v4976_v7  ;;  %v506_v4 = vld [vmem:[%s7222_s1 + $0xf18] sm:$0xff]  ;;  %v4920_v7 = vcombine.high %v378_v3, %v382_v40 }
 0x1d7   :  { %3778 = vmatpush1.bf16.msra.mxu0 %v4847_v15  ;;  %v510_v22 = vld [vmem:[%s7222_s1 + $0xf38] sm:$0xff] }
 0x1d8   :  { %3779 = vmatprep.subr.bf16.mxu0 %v4840_v17  ;;  %v5048_v8 = vcombine.high %v506_v4, %v510_v22  ;;  %v370_v10 = vld [vmem:[%s7222_s1 + $0xad8] sm:$0xff]  ;;  %v5047_v17 = vcombine.low %v506_v4, %v510_v22  ;;  %v5239_v22 = vld [vmem:[%s7224_s3 + $0x28] sm:$0xff]  }
 0x1d9   :  { %3819 = vmatpush1.bf16.msra.mxu1 %v4975_v16  ;;  %v374_v11 = vld [vmem:[%s7222_s1 + $0xaf8] sm:$0xff]  ;;  %v4919_v16 = vcombine.low %v378_v3, %v382_v40 }
 0x1da   :  { %3820 = vmatprep.subr.bf16.mxu1 %v4968_v18  ;;  %v498_v14 = vld [vmem:[%s7222_s1 + $0xed8] sm:$0xff]  ;;  %v4912_v18 = vcombine.high %v370_v10, %v374_v11 }
 0x1db   :  { %3780 = vmatpush1.bf16.msra.mxu0 %v4839_v26  ;;  %v502_v15 = vld [vmem:[%s7222_s1 + $0xef8] sm:$0xff] }
 0x1dc   :  { %3781 = vmatprep.subr.bf16.mxu0 %v4832_v9  ;;  %v5040_v19 = vcombine.high %v498_v14, %v502_v15  ;;  %v362_v20 = vld [vmem:[%s7222_s1 + $0xa98] sm:$0xff]  ;;  %v5039_v9 = vcombine.low %v498_v14, %v502_v15  ;;  %v5244_v14 = vld [vmem:[%s7224_s3 + $0xa0] sm:$0xff]  }
 0x1dd   :  { %3821 = vmatpush1.bf16.msra.mxu1 %v4967_v27  ;;  %v366_v21 = vld [vmem:[%s7222_s1 + $0xab8] sm:$0xff]  ;;  %v4911_v27 = vcombine.low %v370_v10, %v374_v11  ;;  %v5242_v10 = vld [vmem:[%s7224_s3 + $0xe0] sm:$0xff]  }
 0x1de   :  { %3822 = vmatprep.subr.bf16.mxu1 %v4960_v28  ;;  %v490_v25 = vld [vmem:[%s7222_s1 + $0xe98] sm:$0xff]  ;;  %v4904_v28 = vcombine.high %v362_v20, %v366_v21  ;;  %v5243_v11 = vld [vmem:[%s7224_s3 + $0x20] sm:$0xff]  }
 0x1df   :  { %3782 = vmatpush1.bf16.msra.mxu0 %v4831_v35  ;;  %v494_v26 = vld [vmem:[%s7222_s1 + $0xeb8] sm:$0xff] }
 0x1e0   :  { %3783 = vmatprep.subr.bf16.mxu0 %v4824_v36  ;;  %v5032_v29 = vcombine.high %v490_v25, %v494_v26  ;;  %v354_v33 = vld [vmem:[%s7222_s1 + $0xa58] sm:$0xff]  ;;  %v5031_v36 = vcombine.low %v490_v25, %v494_v26  ;;  %v5252_v25 = vld [vmem:[%s7224_s3 + $0x90] sm:$0xff]   ;;  %v5253_v26 = vld [vmem:[%s7224_s3 + $0x48] sm:$0xff]  }
 0x1e1   :  { %3823 = vmatpush1.bf16.msra.mxu1 %v4959_v52  ;;  %v358_v34 = vld [vmem:[%s7222_s1 + $0xa78] sm:$0xff]  ;;  %v4903_v52 = vcombine.low %v362_v20, %v366_v21  ;;  %v5250_v20 = vld [vmem:[%s7224_s3 + $0xd0] sm:$0xff]  }
 0x1e2   :  { %3824 = vmatprep.subr.bf16.mxu1 %v4952_v37  ;;  %v482_v13 = vld [vmem:[%s7222_s1 + $0xe58] sm:$0xff]  ;;  %v4896_v37 = vcombine.high %v354_v33, %v358_v34  ;;  %v5251_v21 = vld [vmem:[%s7224_s3 + $0x10] sm:$0xff]  }
 0x1e3   :  { %3784 = vmatpush1.bf16.msra.mxu0 %v4823_v42  ;;  %v486_v35 = vld [vmem:[%s7222_s1 + $0xe78] sm:$0xff] }
 0x1e4   :  { %3785 = vmatprep.subr.bf16.mxu0 %v4944_v45  ;;  %v5024_v53 = vcombine.high %v482_v13, %v486_v35  ;;  %v346_v62 = vld [vmem:[%s7222_s1 + $0xa18] sm:$0xff]  ;;  %v4895_v45 = vcombine.low %v354_v33, %v358_v34  ;;  %v5258_v33 = vld [vmem:[%s7224_s3 + $0xc0] sm:$0xff]  }
 0x1e5   :  { %3825 = vmatpush1.bf16.msra.mxu1 %v4951_v44  ;;  %v350_v39 = vld [vmem:[%s7222_s1 + $0xa38] sm:$0xff]  ;;  %v3478_v44 = vadd.f32 %v6832_v47, %v6647_v24  ;;  %v3852_v47 = vmax.f32 %v6443_v38, 0.0  ;;  %v5234_v38 = vld [vmem:[%s7224_s3 + $0xf0] sm:$0xff]   ;;  %v5259_v34 = vld [vmem:[%s7224_s3] sm:$0xff]  }
 0x1e6   :  { %3826 = vmatprep.subr.bf16.mxu1 %v5072_v46  ;;  %v474_v41 = vld [vmem:[%s7222_s1 + $0xe18] sm:$0xff]  ;;  %v5023_v46 = vcombine.low %v482_v13, %v486_v35  ;;  %v4888_v23 = vcombine.high %v346_v62, %v350_v39  ;;  %v4887_v12 = vcombine.low %v346_v62, %v350_v39  ;;  %v3851_v13 = vmax.f32 %v6426_v63, 0.0  ;;  %v5260_v35 = vld [vmem:[%s7224_s3 + $0x80] sm:$0xff]   ;;  %v5263_v62 = vld [vmem:[%s7224_s3 + $0x170] sm:$0xff]  }
 0x1e7   :  { %3786 = vmatpush2.bf16.msra.mxu0 %v4943_v31  ;;  %v478_v42 = vld [vmem:[%s7222_s1 + $0xe38] sm:$0xff]  ;;  %v3519_v54 = vadd.f32 %v6836_v51, %v3478_v44  ;;  %v3860_v59 = vpack.c.bf16 %v3852_v47, %v3852_v47  ;;  %v5265_v44 = vld [vmem:[%s7224_s3 + $0x168] sm:$0xff]  }
 0x1e8   :  { %3787 = vmatprep.subr.bf16.mxu0 %v4936_v56  ;;  %v5016_v48 = vcombine.high %v474_v41, %v478_v42  ;;  %v5015_v31 = vcombine.low %v474_v41, %v478_v42  ;;  %v5230_v24 = vld [vmem:[%s7224_s3 + $0xf8] sm:$0xff]   ;;  %v5279_v41 = vld [vmem:[%s7224_s3 + $0x1f0] sm:$0xff]  }
 0x1e9   :  { %3827 = vmatpush2.bf16.msra.mxu1 %v5071_v55  ;;  %v5229_v55 = vld [vmem:[%s7224_s3 + $0x78] sm:$0xff]   ;;  %v3854_v56 = vmax.f32 %v3519_v54, 0.0  ;;  %v5264_v42 = vld [vmem:[%s7224_s3 + $0x130] sm:$0xff]   ;;  %v5282_v54 = vld [vmem:[%s7224_s3 + $0x1a8] sm:$0xff]  }
 0x1ea   :  { %3828 = vmatprep.subr.bf16.mxu1 %v5064_v57  ;;  %v5231_v51 = vld [vmem:[%s7224_s3 + $0x38] sm:$0xff]  }
 0x1eb   :  { %3788 = vmatpush2.bf16.msra.mxu0 %v4935_v0  ;;  %v5232_v57 = vld [vmem:[%s7224_s3 + $0xb8] sm:$0xff]   ;;  %v3862_v61 = vpack.c.bf16 %v3854_v56, %v3854_v56 }
 0x1ec   :  { %3789 = vmatprep.subr.bf16.mxu0 %v4928_v1  ;;  %v5245_v15 = vld [vmem:[%s7224_s3 + $0x58] sm:$0xff]  }
 0x1ed   :  { %3829 = vmatpush2.bf16.msra.mxu1 %v5063_v30  ;;  %v5235_v30 = vld [vmem:[%s7224_s3 + $0x30] sm:$0xff]   ;;  %v5262_v63 = vld [vmem:[%s7224_s3 + $0x138] sm:$0xff]  }
 0x1ee   :  { %3830 = vmatprep.subr.bf16.mxu1 %v5056_v2  ;;  %v5237_v2 = vld [vmem:[%s7224_s3 + $0x68] sm:$0xff]   ;;  %v5285_v47 = vld [vmem:[%s7224_s3 + $0x1d8] sm:$0xff]  }
 0x1ef   :  { %3790 = vmatpush2.bf16.msra.mxu0 %v4927_v5  ;;  %v5270_v56 = vld [vmem:[%s7224_s3 + $0x118] sm:$0xff]  }
 0x1f0   :  { %3791 = vmatprep.subr.bf16.mxu0 %v4920_v7  ;;  %v5241_v7 = vld [vmem:[%s7224_s3 + $0x60] sm:$0xff]  }
 0x1f1   :  { %3831 = vmatpush2.bf16.msra.mxu1 %v5055_v6  ;;  %v5240_v6 = vld [vmem:[%s7224_s3 + $0xa8] sm:$0xff]  }
 0x1f2   :  { %3832 = vmatprep.subr.bf16.mxu1 %v5048_v8 }
 0x1f3   :  { %3792 = vmatpush2.bf16.msra.mxu0 %v4919_v16  ;;  %v5246_v16 = vld [vmem:[%s7224_s3 + $0xd8] sm:$0xff]  }
 0x1f4   :  { %3793 = vmatprep.subr.bf16.mxu0 %v4912_v18  ;;  %v5248_v18 = vld [vmem:[%s7224_s3 + $0x98] sm:$0xff]  }
 0x1f5   :  { %3833 = vmatpush2.bf16.msra.mxu1 %v5047_v17  ;;  %v5247_v17 = vld [vmem:[%s7224_s3 + $0x18] sm:$0xff]  }
 0x1f6   :  { %3834 = vmatprep.subr.bf16.mxu1 %v5040_v19  ;;  %v5249_v19 = vld [vmem:[%s7224_s3 + $0x50] sm:$0xff]  }
 0x1f7   :  { %3794 = vmatpush2.bf16.msra.mxu0 %v4911_v27  ;;  %v5254_v27 = vld [vmem:[%s7224_s3 + $0xc8] sm:$0xff]  }
 0x1f8   :  { %3795 = vmatprep.subr.bf16.mxu0 %v4904_v28  ;;  %v5256_v28 = vld [vmem:[%s7224_s3 + $0x88] sm:$0xff]  }
 0x1f9   :  { %3835 = vmatpush2.bf16.msra.mxu1 %v5039_v9  ;;  %v5255_v9 = vld [vmem:[%s7224_s3 + $0x8] sm:$0xff]  }
 0x1fa   :  { %3836 = vmatprep.subr.bf16.mxu1 %v5032_v29  ;;  %v5257_v29 = vld [vmem:[%s7224_s3 + $0x40] sm:$0xff]  }
 0x1fb   :  { %3796 = vmatpush2.bf16.msra.mxu0 %v4903_v52  ;;  %v5261_v52 = vld [vmem:[%s7224_s3 + $0x178] sm:$0xff]  }
 0x1fc   :  { %3797 = vmatprep.subr.bf16.mxu0 %v4896_v37  ;;  %v5277_v37 = vld [vmem:[%s7224_s3 + $0x1f8] sm:$0xff]  }
 0x1fd   :  { %3837 = vmatpush2.bf16.msra.mxu1 %v5031_v36  ;;  %v3853_v36 = vmax.f32 %v6834_v49, 0.0  ;;  %v5278_v49 = vld [vmem:[%s7224_s3 + $0x1b8] sm:$0xff]  }
 0x1fe   :  { %3838 = vmatprep.subr.bf16.mxu1 %v5024_v53  ;;  %v3859_v53 = vpack.c.bf16 %v3851_v13, %v3851_v13 }
 0x1ff   :  { %3798 = vmatpush2.bf16.msra.mxu0 %v4895_v45  ;;  %v3861_v39 = vpack.c.bf16 %v3853_v36, %v3853_v36  ;;  %v5280_v45 = vld [vmem:[%s7224_s3 + $0x1b0] sm:$0xff]  }
 0x200   :  { %3799 = vmatprep.subr.bf16.mxu0 %v4888_v23  ;;  %v5266_v23 = vld [vmem:[%s7224_s3 + $0x128] sm:$0xff]  }
 0x201   :  { %3839 = vmatpush2.bf16.msra.mxu1 %v5023_v46  ;;  %v5281_v46 = vld [vmem:[%s7224_s3 + $0x1e8] sm:$0xff]  }
 0x202   :  { %3840 = vmatprep.subr.bf16.mxu1 %v5016_v48  ;;  %v5267_v48 = vld [vmem:[%s7224_s3 + $0x160] sm:$0xff]  }
 0x203   :  { %3800 = vmatpush2.bf16.msra.mxu0 %v4887_v12  ;;  %v5283_v12 = vld [vmem:[%s7224_s3 + $0x1e0] sm:$0xff]  }
 0x204   :  { %5138 = vmatprep.subr.bf16.mxu0 %v5229_v55  ;;  %v5269_v55 = vld [vmem:[%s7224_s3 + $0x158] sm:$0xff]  }
 0x205   :  { %3841 = vmatpush2.bf16.msra.mxu1 %v5015_v31  ;;  %v5268_v31 = vld [vmem:[%s7224_s3 + $0x120] sm:$0xff]  }
 0x206   :  { %5160 = vmatprep.subr.bf16.mxu1 %v5230_v24  ;;  %v7015_v60 = vpop.f32.mrf.mxu0  ;;  %3802 = vmatmul.mubr.bf16.vlgmr.msra.gmra.mxu0 %v5507_v32  ;;  %v5236_v32 = vld [vmem:[%s7224_s3 + $0xb0] sm:$0xff]   ;;  %v5284_v24 = vld [vmem:[%s7224_s3 + $0x1a0] sm:$0xff]  }
 0x207   :  { %5139 = vmatpush3.bf16.msra.mxu0 %v5231_v51  ;;  %4418 = vmatprep.mubr.bf16.mxu0 %v3860_v59  ;;  %v5271_v51 = vld [vmem:[%s7224_s3 + $0x150] sm:$0xff]   ;;  %v5273_v59 = vld [vmem:[%s7224_s3 + $0x148] sm:$0xff]  }
 0x208   :  { %v7021_v0 = vpop.f32.mrf.mxu1  ;;  %3843 = vmatmul.mubr.bf16.vlgmr.msra.gmra.mxu1 %v5808_v50  ;;  %v7027_v1 = vpop.f32.mrf.mxu0  ;;  %5140 = vmatprep.subr.bf16.mxu0 %v5233_v58  ;;  %v5238_v50 = vld [vmem:[%s7224_s3 + $0xe8] sm:$0xff]   ;;  %v5272_v58 = vld [vmem:[%s7224_s3 + $0x110] sm:$0xff]  }
 0x209   :  { %5161 = vmatpush3.bf16.msra.mxu1 %v5232_v57  ;;  %4458 = vmatprep.mubr.bf16.mxu1 %v3862_v61  ;;  %v5286_v57 = vld [vmem:[%s7224_s3 + $0x198] sm:$0xff]   ;;  %v559_v61 = vsub.s32 5, %v5414_v43 }
 0x20a   :  { %v7035_v3 = vpop.f32.mrf.mxu1  ;;  %v3561_v40 = vpop.f32.mrf.mxu0  ;;  %5162 = vmatprep.subr.bf16.mxu1 %v5234_v38  ;;  %v555_v38 = vsub.s32 4, %v5414_v43 }
 0x20b   :  { %5141 = vmatpush3.bf16.msra.mxu0 %v5235_v30  ;;  %v5274_v30 = vld [vmem:[%s7224_s3 + $0x108] sm:$0xff]  }
 0x20c   :  { %v3602_v4 = vpop.f32.mrf.mxu1  ;;  %v3562_v5 = vpop.f32.mrf.mxu0  ;;  %5142 = vmatprep.subr.bf16.mxu0 %v5237_v2  ;;  %v5293_v2 = vld [vmem:[%s7223_s2] sm:$0xff] }
 0x20d   :  { %5163 = vmatpush3.bf16.msra.mxu1 %v5236_v32  ;;  %v5275_v32 = vld [vmem:[%s7224_s3 + $0x140] sm:$0xff]   ;;  %v560_v40 = vrot.slane %v5293_v2, %v559_v61 }
 0x20e   :  { %v3603_v8 = vpop.f32.mrf.mxu1  ;;  %5164 = vmatprep.subr.bf16.mxu1 %v5238_v50  ;;  %v556_v50 = vrot.slane %v5293_v2, %v555_v38  ;;  %v5276_v4 = vld [vmem:[%s7224_s3 + $0x100] sm:$0xff]  }
 0x20f   :  { %5143 = vmatpush3.bf16.msra.mxu0 %v5239_v22  ;;  %v3560_v5 = vadd.f32 %v7027_v1, %v560_v40  ;;  %v5287_v8 = vld [vmem:[%s7224_s3 + $0x1d0] sm:$0xff]  }
 0x210   :  { %5144 = vmatprep.subr.bf16.mxu0 %v5241_v7  ;;  %v3558_v22 = vadd.f32 %v7015_v60, %v556_v50 }
 0x211   :  { %5165 = vmatpush3.bf16.msra.mxu1 %v5240_v6 }
 0x212   :  { %5166 = vmatprep.subr.bf16.mxu1 %v5242_v10  ;;  %v3599_v6 = vadd.f32 %v7021_v0, %v3558_v22  ;;  %v3601_v10 = vadd.f32 %v7035_v3, %v3560_v5  ;;  %v5290_v3 = vld [vmem:[%s7224_s3 + $0x188] sm:$0xff]  }
 0x213   :  { %5145 = vmatpush3.bf16.msra.mxu0 %v5243_v11 }
 0x214   :  { %5146 = vmatprep.subr.bf16.mxu0 %v5245_v15  ;;  %v5288_v15 = vld [vmem:[%s7224_s3 + $0x190] sm:$0xff]  }
 0x215   :  { %5167 = vmatpush3.bf16.msra.mxu1 %v5244_v14 }
 0x216   :  { %5168 = vmatprep.subr.bf16.mxu1 %v5246_v16 }
 0x217   :  { %5147 = vmatpush3.bf16.msra.mxu0 %v5247_v17 }
 0x218   :  { %5148 = vmatprep.subr.bf16.mxu0 %v5249_v19 }
 0x219   :  { %5169 = vmatpush3.bf16.msra.mxu1 %v5248_v18  ;;  %v5289_v18 = vld [vmem:[%s7224_s3 + $0x1c8] sm:$0xff]  }
 0x21a   :  { %5170 = vmatprep.subr.bf16.mxu1 %v5250_v20 }
 0x21b   :  { %5149 = vmatpush3.bf16.msra.mxu0 %v5251_v21 }
 0x21c   :  { %5150 = vmatprep.subr.bf16.mxu0 %v5253_v26 }
 0x21d   :  { %5171 = vmatpush3.bf16.msra.mxu1 %v5252_v25 }
 0x21e   :  { %5172 = vmatprep.subr.bf16.mxu1 %v5254_v27 }
 0x21f   :  { %5151 = vmatpush3.bf16.msra.mxu0 %v5255_v9  ;;  %v5291_v9 = vld [vmem:[%s7224_s3 + $0x1c0] sm:$0xff]  }
 0x220   :  { %5152 = vmatprep.subr.bf16.mxu0 %v5257_v29  ;;  %v5292_v29 = vld [vmem:[%s7224_s3 + $0x180] sm:$0xff]  }
 0x221   :  { %5173 = vmatpush3.bf16.msra.mxu1 %v5256_v28 }
 0x222   :  { %5174 = vmatprep.subr.bf16.mxu1 %v5258_v33 }
 0x223   :  { %5153 = vmatpush3.bf16.msra.mxu0 %v5259_v34 }
 0x224   :  { %5182 = vmatprep.subr.bf16.mxu0 %v5261_v52 }
 0x225   :  { %5175 = vmatpush3.bf16.msra.mxu1 %v5260_v35 }
 0x226   :  { %5204 = vmatprep.subr.bf16.mxu1 %v5277_v37  ;;  %4419 = vmatmul.mubr.bf16.vlgmr.msra.gmra.mxu0 %v3859_v53 }
 0x227   :  { %5183 = vmatpush3.bf16.msra.mxu0 %v5262_v63 }
 0x228   :  { %4459 = vmatmul.mubr.bf16.vlgmr.msra.gmra.mxu1 %v3861_v39  ;;  %5184 = vmatprep.subr.bf16.mxu0 %v5263_v62  ;;  %v563_v62 = vsub.s32 6, %v5414_v43 }
 0x229   :  { %5205 = vmatpush3.bf16.msra.mxu1 %v5278_v49  ;;  %v567_v49 = vsub.s32 7, %v5414_v43 }
 0x22a   :  { %5206 = vmatprep.subr.bf16.mxu1 %v5279_v41  ;;  %v564_v39 = vrot.slane %v5293_v2, %v563_v62 }
 0x22b   :  { %5185 = vmatpush3.bf16.msra.mxu0 %v5264_v42  ;;  %v568_v41 = vrot.slane %v5293_v2, %v567_v49  ;;  %v5073_v2 = vld [vmem:[%s7225_s4] ss:$0 sm:$0xff]  ;;  %s4553_s4 = sshll.u32 %s5317_s29, 4  ;;  %s4554_s4 = int_to_ptr.vmem [resolvable:$true] %s4553_s4 }
 0x22c   :  { %5186 = vmatprep.subr.bf16.mxu0 %v5265_v44  ;;  %s5294_s30 = scalar_lea.vmem %s4554_s4, 32  ;;  %p5299_p1 = scmp.lt.s32.totalorder %s4554_s4, %s4554_s4 }
 0x22d   :  { %5207 = vmatpush3.bf16.msra.mxu1 %v5280_v45  ;;  %p5295_p0 = scmp.ne.s32.totalorder %s4554_s4, %s5294_s30  ;;  %p5300_p2 = scmp.lt.s32.totalorder %s5294_s30, %s5294_s30 }
 0x22e   :  { %5208 = vmatprep.subr.bf16.mxu1 %v5281_v46 }
 0x22f   :  { %5187 = vmatpush3.bf16.msra.mxu0 %v5266_v23  ;;  %p5301_p3 = por %p5300_p2, %p5299_p1 }
 0x230   :  { %5188 = vmatprep.subr.bf16.mxu0 %v5267_v48 }
 0x231   :  { %5209 = vmatpush3.bf16.msra.mxu1 %v5282_v54  ;;  %p5302_p4 = pnand %p5301_p3, %p5295_p0 }
 0x232   :  { %5210 = vmatprep.subr.bf16.mxu1 %v5283_v12 }
 0x233   :  { %5189 = vmatpush3.bf16.msra.mxu0 %v5268_v31 }
 0x234   :  { %5190 = vmatprep.subr.bf16.mxu0 %v5269_v55 }
 0x235   :  { %5211 = vmatpush3.bf16.msra.mxu1 %v5284_v24 }
 0x236   :  { %5212 = vmatprep.subr.bf16.mxu1 %v5285_v47 }
 0x237   :  { %5191 = vmatpush3.bf16.msra.mxu0 %v5270_v56 }
 0x238   :  { %5192 = vmatprep.subr.bf16.mxu0 %v5271_v51 }
 0x239   :  { %5213 = vmatpush3.bf16.msra.mxu1 %v5286_v57 }
 0x23a   :  { %5214 = vmatprep.subr.bf16.mxu1 %v5287_v8 }
 0x23b   :  { %5193 = vmatpush3.bf16.msra.mxu0 %v5272_v58 }
 0x23c   :  { %5194 = vmatprep.subr.bf16.mxu0 %v5273_v59 }
 0x23d   :  { %5215 = vmatpush3.bf16.msra.mxu1 %v5288_v15 }
 0x23e   :  { %5216 = vmatprep.subr.bf16.mxu1 %v5289_v18 }
 0x23f   :  { %5195 = vmatpush3.bf16.msra.mxu0 %v5274_v30 }
 0x240   :  { %5196 = vmatprep.subr.bf16.mxu0 %v5275_v32 }
 0x241   :  { %5217 = vmatpush3.bf16.msra.mxu1 %v5290_v3 }
 0x242   :  { %5218 = vmatprep.subr.bf16.mxu1 %v5291_v9 }
 0x243   :  { %5197 = vmatpush3.bf16.msra.mxu0 %v5276_v4 }
 0x245   :  { %5219 = vmatpush3.bf16.msra.mxu1 %v5292_v29 }
 0x246   :  { %v3639_v7 = vpop.f32.mrf.mxu0 }
 0x247   :  { %v3640_v11 = vadd.f32 %v3639_v7, %v3599_v6 }
 0x248   :  { %v3680_v14 = vpop.f32.mrf.mxu1  ;;  %v3641_v16 = vpop.f32.mrf.mxu0 }
 0x249   :  { %v3681_v60 = vadd.f32 %v3680_v14, %v3640_v11  ;;  %v3642_v1 = vadd.f32 %v3641_v16, %v3601_v10 }
 0x24a   :  { %v3682_v17 = vpop.f32.mrf.mxu1  ;;  %v3643_v0 = vpop.f32.mrf.mxu0 }
 0x24b   :  { %v3683_v19 = vadd.f32 %v3682_v17, %v3642_v1  ;;  %v3855_v21 = vmax.f32 %v3681_v60, 0.0 }
 0x24c   :  { %v3684_v20 = vpop.f32.mrf.mxu1  ;;  %v3644_v25 = vpop.f32.mrf.mxu0 }
 0x24d   :  { %v3856_v26 = vmax.f32 %v3683_v19, 0.0  ;;  %v3863_v33 = vpack.c.bf16 %v3855_v21, %v3855_v21 }
 0x24e   :  { %v3685_v27 = vpop.f32.mrf.mxu1 }
 0x24f   :  { %v3864_v28 = vpack.c.bf16 %v3856_v26, %v3856_v26 }
 0x251   :  { %4498 = vmatprep.mubr.bf16.mxu0 %v3864_v28 }
 0x252   :  { %4499 = vmatmul.mubr.bf16.vlgmr.msra.gmra.mxu0 %v3863_v33 }
 0x286   :  { %v3721_v34 = vpop.f32.mrf.mxu0 }
 0x287   :  { %v3722_v42 = vadd.f32 %v3721_v34, %v564_v39 }
 0x288   :  { %v3762_v13 = vpop.f32.mrf.mxu1  ;;  %v3723_v35 = vpop.f32.mrf.mxu0 }
 0x289   :  { %v3724_v44 = vadd.f32 %v3723_v35, %v568_v41  ;;  %v3763_v45 = vadd.f32 %v3762_v13, %v3722_v42 }
 0x28a   :  { %v3764_v52 = vpop.f32.mrf.mxu1  ;;  %v3725_v36 = vpop.f32.mrf.mxu0 }
 0x28b   :  { %v3765_v23 = vadd.f32 %v3764_v52, %v3724_v44 }
 0x28c   :  { %v3766_v37 = vpop.f32.mrf.mxu1  ;;  %v3726_v63 = vpop.f32.mrf.mxu0 }
 0x28e   :  { %v3767_v53 = vpop.f32.mrf.mxu1 }
 0x2c6   :  { %v3803_v46 = vpop.f32.mrf.mxu0 }
 0x2c7   :  { %v3804_v48 = vadd.f32 %v3803_v46, %v3763_v45 }
 0x2c8   :  { %v3844_v54 = vpop.f32.mrf.mxu1  ;;  %v3805_v12 = vpop.f32.mrf.mxu0 }
 0x2c9   :  { %v3845_v31 = vadd.f32 %v3844_v54, %v3804_v48  ;;  %v3806_v55 = vadd.f32 %v3805_v12, %v3765_v23 }
 0x2ca   :  { %v3846_v24 = vpop.f32.mrf.mxu1  ;;  %v3807_v47 = vpop.f32.mrf.mxu0 }
 0x2cb   :  { %v3847_v56 = vadd.f32 %v3846_v24, %v3806_v55  ;;  %v3857_v57 = vmax.f32 %v3845_v31, 0.0 }
 0x2cc   :  { %v3848_v51 = vpop.f32.mrf.mxu1  ;;  %v3808_v58 = vpop.f32.mrf.mxu0 }
 0x2cd   :  { %v3858_v59 = vmax.f32 %v3847_v56, 0.0  ;;  %v3865_v61 = vpack.c.bf16 %v3857_v57, %v3857_v57 }
 0x2ce   :  { %v3849_v43 = vpop.f32.mrf.mxu1 }
 0x2cf   :  { %v3866_v38 = vpack.c.bf16 %v3858_v59, %v3858_v59 }
 0x2d1   :  { %4538 = vmatprep.mubr.bf16.mxu1 %v3866_v38 }
 0x2d2   :  { %4539 = vmatmul.mubr.bf16.vlgmr.msra.gmra.mxu1 %v3865_v61 }
 0x2e6   :  { %v5154_v30 = vpop.f32.mrf.mxu0 }
 0x2e8   :  { %v5176_v32 = vpop.f32.mrf.mxu1  ;;  %v5155_v50 = vpop.f32.mrf.mxu0 }
 0x2e9   :  { %v5156_v40 = vadd.f32 %v5155_v50, %v5154_v30 }
 0x2ea   :  { %v5177_v4 = vpop.f32.mrf.mxu1  ;;  %v5157_v5 = vpop.f32.mrf.mxu0 }
 0x2eb   :  { %v5178_v22 = vadd.f32 %v5177_v4, %v5176_v32  ;;  %v4421_v6 = vadd.f32 %v5156_v40, %v5073_v2 }
 0x2ec   :  { %v5179_v7 = vpop.f32.mrf.mxu1  ;;  %v5158_v8 = vpop.f32.mrf.mxu0 }
 0x2ed   :  { %v4461_v10 = vadd.f32 %v5178_v22, %v4421_v6 }
 0x2ee   :  { %v5180_v11 = vpop.f32.mrf.mxu1 }
 0x312   :  { %v5198_v14 = vpop.f32.mrf.mxu0 }
 0x314   :  { %v5199_v15 = vpop.f32.mrf.mxu0 }
 0x315   :  { %v5200_v16 = vadd.f32 %v5199_v15, %v5198_v14 }
 0x316   :  { %v5201_v60 = vpop.f32.mrf.mxu0 }
 0x317   :  { %v4501_v1 = vadd.f32 %v5200_v16, %v4461_v10 }
 0x318   :  { %v5202_v17 = vpop.f32.mrf.mxu0 }
 0x392   :  { %v5220_v0 = vpop.f32.mrf.mxu1 }
 0x394   :  { %v5221_v18 = vpop.f32.mrf.mxu1 }
 0x395   :  { %v5222_v19 = vadd.f32 %v5221_v18, %v5220_v0 }
 0x396   :  { %v5223_v20 = vpop.f32.mrf.mxu1 }
 0x397   :  { %v4541_v3 = vadd.f32 %v5222_v19, %v4501_v1 }
 0x398   :  { %v5224_v21 = vpop.f32.mrf.mxu1 }
 0x399   :  { %4546 = vst [vmem:[#allocation2] sm:$0x3] %v4541_v3 }
 0x39a   :  { %5305 = shalt.err (!%p5302_p4)
}
 0x39b   :  { %4556 = dma.vmem_to_hbm [thread:$0]  %s4554_s4, 32, %s7226_s5, [#allocation3]  }
 0x39c   :  { %5314 = dma.done.wait [#allocation3], 32  }
 0x39d   :  { %5315 = vsyncadd [#allocation3], 4294967264 }
 0x39e   :  { %4560 = vsyncpa [#allocation3], 1 }

</bundles_post_ra>
